<compile_context>
chip_gen: v5e
topology: v5e:2x2
jax: 0.10.0
libtpu: 0.0.40
codegen_flags: <defaults>
</compile_context>

<pallas_src>
import jax
import jax.numpy as jnp
from jax.experimental import pallas as pl
from jax.experimental.pallas import tpu as pltpu


def _round_up(x, m):
    return ((x + m - 1) // m) * m


# ----------------------------------------------------------------------------
# Fused kernel: all layers + FC head, sequence kept in VMEM scratch.
# ----------------------------------------------------------------------------
def _make_fused_lstm_kernel(num_layers, T, B, Bp, Hp):
    def kernel(*refs):
        x2d_ref = refs[0]                                  # (T*Bp, D_in0)
        layer_refs = refs[1:1 + 3 * num_layers]            # (wih, whh, bias) * L
        fcw_ref = refs[1 + 3 * num_layers]                 # (Hp, O)
        fcb_ref = refs[2 + 3 * num_layers]                 # (1, O)
        out_ref = refs[3 + 3 * num_layers]                 # (B, O)
        gx_ref = refs[4 + 3 * num_layers]                  # (T*Bp, 4*Hp) scratch
        hseq_ref = refs[5 + 3 * num_layers]                # (T*Bp, Hp)   scratch

        layer_in = x2d_ref[...]                            # (T*Bp, D_in)
        h_last = None
        for layer in range(num_layers):
            wih_ref = layer_refs[3 * layer]
            whh_ref = layer_refs[3 * layer + 1]
            b_ref = layer_refs[3 * layer + 2]

            # Hoisted input projection for ALL timesteps (one big MXU matmul);
            # bias folded in so the serial loop carries no broadcast/add.
            gx_ref[...] = (
                jnp.dot(layer_in, wih_ref[...],
                        preferred_element_type=jnp.float32)
                + b_ref[...]
            )

            store_seq = layer < num_layers - 1  # last layer only needs last h

            def step(t, carry, whh_ref=whh_ref, store_seq=store_seq):
                h, c = carry
                row = pl.multiple_of(t * Bp, Bp)           # 8-aligned row start
                gates = gx_ref[pl.ds(row, Bp), :] + jnp.dot(
                    h, whh_ref[...], preferred_element_type=jnp.float32
                )                                          # (Bp, 4*Hp)
                # 128-lane aligned gate slices (free vreg views).
                i_g = jax.nn.sigmoid(gates[:, 0 * Hp:1 * Hp])
                f_g = jax.nn.sigmoid(gates[:, 1 * Hp:2 * Hp])
                g_g = jnp.tanh(gates[:, 2 * Hp:3 * Hp])
                o_g = jax.nn.sigmoid(gates[:, 3 * Hp:4 * Hp])
                c_new = f_g * c + i_g * g_g
                h_new = o_g * jnp.tanh(c_new)
                if store_seq:
                    hseq_ref[pl.ds(row, Bp), :] = h_new
                return h_new, c_new

            zeros = jnp.zeros((Bp, Hp), jnp.float32)
            # Sequential recurrence; unrolled so the scheduler sees across steps.
            h_last, _ = jax.lax.fori_loop(0, T, step, (zeros, zeros),
                                          unroll=True)

            if store_seq:
                layer_in = hseq_ref[...]                   # next layer's input

        # FC head on the last timestep of the last layer (== output[:, -1, :]).
        fc_out = (
            jnp.dot(h_last, fcw_ref[...], preferred_element_type=jnp.float32)
            + fcb_ref[...]
        )                                                  # (Bp, O)
        out_ref[...] = fc_out[:B, :].astype(out_ref.dtype)

    return kernel


def _fused_lstm_call(x2d, layer_flat, fc_w, fc_b, *,
                     num_layers, T, B, Bp, Hp, out_dim):
    kernel = _make_fused_lstm_kernel(num_layers, T, B, Bp, Hp)
    operands = [x2d] + list(layer_flat) + [fc_w, fc_b]
    # Every operand is resident in VMEM as one full-array block.
    in_specs = [pl.BlockSpec(op.shape, lambda i: (0, 0)) for op in operands]
    return pl.pallas_call(
        kernel,
        out_shape=jax.ShapeDtypeStruct((B, out_dim), jnp.float32),
        grid_spec=pltpu.PrefetchScalarGridSpec(
            num_scalar_prefetch=0,
            grid=(1,),
            in_specs=in_specs,
            out_specs=pl.BlockSpec((B, out_dim), lambda i: (0, 0)),
            scratch_shapes=[
                pltpu.VMEM((T * Bp, 4 * Hp), jnp.float32),  # hoisted x-projection
                pltpu.VMEM((T * Bp, Hp), jnp.float32),      # per-layer h sequence
            ],
        ),
        compiler_params=pltpu.CompilerParams(
            # single sequential step; must NOT be megacore-sharded
            dimension_semantics=("arbitrary",),
        ),
    )(*operands)


@jax.jit
def lstm_forward(params, x_btd):
    """x_btd: (B, T, D) batch-first, same as the PyTorch module's input."""
    layers = params["layers"]
    num_layers = len(layers)
    B, T, D = x_btd.shape
    Hp = layers[0]["whh"].shape[0]
    out_dim = params["fc_w"].shape[1]
    Bp = _round_up(max(B, 8), 8)

    # time-major, batch padded to a sublane multiple, flattened to 2-D
    x_tbd = jnp.transpose(x_btd, (1, 0, 2)).astype(jnp.float32)   # (T, B, D)
    x_tbd = jnp.pad(x_tbd, ((0, 0), (0, Bp - B), (0, 0)))         # (T, Bp, D)
    x2d = x_tbd.reshape(T * Bp, D)

    flat = []
    for lp in layers:
        flat += [lp["wih"], lp["whh"], lp["bias"]]

    return _fused_lstm_call(
        x2d, flat, params["fc_w"], params["fc_b"],
        num_layers=num_layers, T=T, B=B, Bp=Bp, Hp=Hp, out_dim=out_dim)


# ----------------------------------------------------------------------------
# Parameter construction (mimics nn.LSTM / nn.Linear init: U(-1/sqrt(H), 1/sqrt(H))).
# Returns padded kernel params + raw (PyTorch-layout) params for the reference.
# ----------------------------------------------------------------------------
def _pad_gate_cols(w, H, Hp):
    """w: (rows, 4H) with gates [i,f,g,o] -> (rows, 4*Hp), each gate 128-aligned."""
    rows = w.shape[0]
    w = w.reshape(rows, 4, H)
    w = jnp.pad(w, ((0, 0), (0, 0), (0, Hp - H)))
    return w.reshape(rows, 4 * Hp)


def init_params(key, input_size, hidden_size, num_layers, output_size):
    H = hidden_size
    Hp = _round_up(H, 128)
    k = 1.0 / jnp.sqrt(jnp.float32(H))
    params = {"layers": []}
    raw = {"layers": []}
    for layer in range(num_layers):
        d_in = input_size if layer == 0 else H
        d_in_p = input_size if layer == 0 else Hp
        key, k1, k2, k3, k4 = jax.random.split(key, 5)
        w_ih = jax.random.uniform(k1, (4 * H, d_in), jnp.float32, -k, k)
        w_hh = jax.random.uniform(k2, (4 * H, H), jnp.float32, -k, k)
        b_ih = jax.random.uniform(k3, (4 * H,), jnp.float32, -k, k)
        b_hh = jax.random.uniform(k4, (4 * H,), jnp.float32, -k, k)

        wih_t = _pad_gate_cols(jnp.transpose(w_ih), H, Hp)          # (d_in, 4Hp)
        wih_t = jnp.pad(wih_t, ((0, d_in_p - d_in), (0, 0)))        # (d_in_p, 4Hp)
        whh_t = _pad_gate_cols(jnp.transpose(w_hh), H, Hp)          # (H, 4Hp)
        whh_t = jnp.pad(whh_t, ((0, Hp - H), (0, 0)))               # (Hp, 4Hp)
        bias = _pad_gate_cols((b_ih + b_hh)[None, :], H, Hp)        # (1, 4Hp)

        params["layers"].append(dict(wih=wih_t, whh=whh_t, bias=bias))
        raw["layers"].append(dict(w_ih=w_ih, w_hh=w_hh, b=b_ih + b_hh))

    key, k5, k6 = jax.random.split(key, 3)
    w_fc = jax.random.uniform(k5, (output_size, H), jnp.float32, -k, k)
    b_fc = jax.random.uniform(k6, (output_size,), jnp.float32, -k, k)
    params["fc_w"] = jnp.pad(jnp.transpose(w_fc), ((0, Hp - H), (0, 0)))  # (Hp, O)
    params["fc_b"] = b_fc[None, :]                                        # (1, O)
    raw["fc_w"] = w_fc
    raw["fc_b"] = b_fc
    return params, raw


# ----------------------------------------------------------------------------
# Pure-JAX reference (unpadded weights) for a correctness smoke check.
# ----------------------------------------------------------------------------
def lstm_reference(raw, x_btd):
    h_seq = jnp.transpose(x_btd, (1, 0, 2)).astype(jnp.float32)  # (T, B, D)
    B = h_seq.shape[1]
    for lp in raw["layers"]:
        w_ih, w_hh, b = lp["w_ih"], lp["w_hh"], lp["b"]
        H = w_hh.shape[1]

        def step(carry, x_t, w_ih=w_ih, w_hh=w_hh, b=b, H=H):
            h, c = carry
            gates = x_t @ w_ih.T + h @ w_hh.T + b
            i = jax.nn.sigmoid(gates[:, 0 * H:1 * H])
            f = jax.nn.sigmoid(gates[:, 1 * H:2 * H])
            g = jnp.tanh(gates[:, 2 * H:3 * H])
            o = jax.nn.sigmoid(gates[:, 3 * H:4 * H])
            c = f * c + i * g
            h = o * jnp.tanh(c)
            return (h, c), h

        init = (jnp.zeros((B, H), jnp.float32), jnp.zeros((B, H), jnp.float32))
        _, ys = jax.lax.scan(step, init, h_seq)
        h_seq = ys
    last = h_seq[-1]
    return last @ raw["fc_w"].T + raw["fc_b"]


if __name__ == "__main__":
    batch = 2
    seq_length = 8
    input_size = 16
    hidden_size = 32
    num_layers = 2
    output_size = 4

    key = jax.random.PRNGKey(0)
    key_p, key_x = jax.random.split(key)
    params, raw = init_params(key_p, input_size, hidden_size, num_layers,
                              output_size)
    x = jax.random.normal(key_x, (batch, seq_length, input_size), jnp.float32)

    out = lstm_forward(params, x)
    jax.block_until_ready(out)
    assert out.shape == (batch, output_size), out.shape

    ref = lstm_reference(raw, x)
    assert jnp.allclose(out, ref, rtol=1e-2, atol=1e-2), (out, ref)

    print("KERNEL_OK")
</pallas_src>

<mosaic_0001>
module attributes {stable_mosaic.version = 11 : i64} {
  func.func @kernel(%arg0: i32, %arg1: memref<64x16xf32, #tpu.memory_space<vmem>>, %arg2: memref<16x512xf32, #tpu.memory_space<vmem>>, %arg3: memref<128x512xf32, #tpu.memory_space<vmem>>, %arg4: memref<1x512xf32, #tpu.memory_space<vmem>>, %arg5: memref<128x512xf32, #tpu.memory_space<vmem>>, %arg6: memref<128x512xf32, #tpu.memory_space<vmem>>, %arg7: memref<1x512xf32, #tpu.memory_space<vmem>>, %arg8: memref<128x4xf32, #tpu.memory_space<vmem>>, %arg9: memref<1x4xf32, #tpu.memory_space<vmem>>, %arg10: memref<2x4xf32, #tpu.memory_space<vmem>>, %arg11: memref<64x512xf32, #tpu.memory_space<vmem>>, %arg12: memref<64x128xf32, #tpu.memory_space<vmem>>) attributes {dimension_semantics = [#tpu.dimension_semantics<arbitrary>], iteration_bounds = array<i64: 1>, scalar_prefetch = 0 : i64, scratch_operands = 2 : i64, tpu.core_type = #tpu.core_type<tc>, window_params = [{pipeline_mode = #tpu.pipeline_mode<synchronous>, transform_indices = @transform_0, window_bounds = array<i64: 64, 16>}, {pipeline_mode = #tpu.pipeline_mode<synchronous>, transform_indices = @transform_1, window_bounds = array<i64: 16, 512>}, {pipeline_mode = #tpu.pipeline_mode<synchronous>, transform_indices = @transform_2, window_bounds = array<i64: 128, 512>}, {pipeline_mode = #tpu.pipeline_mode<synchronous>, transform_indices = @transform_3, window_bounds = array<i64: 1, 512>}, {pipeline_mode = #tpu.pipeline_mode<synchronous>, transform_indices = @transform_4, window_bounds = array<i64: 128, 512>}, {pipeline_mode = #tpu.pipeline_mode<synchronous>, transform_indices = @transform_5, window_bounds = array<i64: 128, 512>}, {pipeline_mode = #tpu.pipeline_mode<synchronous>, transform_indices = @transform_6, window_bounds = array<i64: 1, 512>}, {pipeline_mode = #tpu.pipeline_mode<synchronous>, transform_indices = @transform_7, window_bounds = array<i64: 128, 4>}, {pipeline_mode = #tpu.pipeline_mode<synchronous>, transform_indices = @transform_8, window_bounds = array<i64: 1, 4>}, {pipeline_mode = #tpu.pipeline_mode<synchronous>, transform_indices = @transform_9, window_bounds = array<i64: 2, 4>}]} {
    %c0 = arith.constant 0 : index
    %c0_0 = arith.constant 0 : index
    %0 = vector.load %arg1[%c0, %c0_0] : memref<64x16xf32, #tpu.memory_space<vmem>>, vector<64x16xf32>
    %c0_1 = arith.constant 0 : index
    %c0_2 = arith.constant 0 : index
    %1 = vector.load %arg2[%c0_1, %c0_2] : memref<16x512xf32, #tpu.memory_space<vmem>>, vector<16x512xf32>
    %cst = arith.constant dense<0.000000e+00> : vector<64x512xf32>
    %2 = tpu.matmul %0, %1, %cst {dimension_numbers = #tpu.dot_dimension_numbers<[1], [0], [0], [1], [0, 0, 1, 1], [], []>} : vector<64x16xf32>, vector<16x512xf32>, vector<64x512xf32> -> vector<64x512xf32>
    %c0_3 = arith.constant 0 : index
    %c0_4 = arith.constant 0 : index
    %3 = vector.load %arg4[%c0_3, %c0_4] : memref<1x512xf32, #tpu.memory_space<vmem>>, vector<1x512xf32>
    %4 = vector.broadcast %3 : vector<1x512xf32> to vector<64x512xf32>
    %5 = arith.addf %2, %4 : vector<64x512xf32>
    %c0_5 = arith.constant 0 : index
    %c0_6 = arith.constant 0 : index
    %6 = vector.load %arg11[%c0_5, %c0_6] : memref<64x512xf32, #tpu.memory_space<vmem>>, vector<64x512xf32>
    tpu.vector_store %arg11[%c0_5, %c0_6], %5 {strides = array<i32>} : memref<64x512xf32, #tpu.memory_space<vmem>>, vector<64x512xf32>,
    %cst_7 = arith.constant 0.000000e+00 : f32
    %7 = vector.broadcast %cst_7 : f32 to vector<8x128xf32>
    %c0_i32 = arith.constant 0 : i32
    %c8_i32 = arith.constant 8 : i32
    %8 = arith.muli %c0_i32, %c8_i32 : i32
    %9 = tpu.assume_multiple %8, 8 : i32
    %10 = arith.index_cast %9 : i32 to index
    %c0_8 = arith.constant 0 : index
    %11 = vector.load %arg11[%10, %c0_8] : memref<64x512xf32, #tpu.memory_space<vmem>>, vector<8x512xf32>
    %c0_9 = arith.constant 0 : index
    %c0_10 = arith.constant 0 : index
    %12 = vector.load %arg3[%c0_9, %c0_10] : memref<128x512xf32, #tpu.memory_space<vmem>>, vector<128x512xf32>
    %cst_11 = arith.constant dense<0.000000e+00> : vector<8x512xf32>
    %13 = tpu.matmul %7, %12, %cst_11 {dimension_numbers = #tpu.dot_dimension_numbers<[1], [0], [0], [1], [0, 0, 1, 1], [], []>} : vector<8x128xf32>, vector<128x512xf32>, vector<8x512xf32> -> vector<8x512xf32>
    %14 = arith.addf %11, %13 : vector<8x512xf32>
    %15 = vector.extract_strided_slice %14 {offsets = [0, 0], sizes = [8, 128], strides = [1, 1]} : vector<8x512xf32> to vector<8x128xf32>
    %16 = arith.negf %15 : vector<8x128xf32>
    %17 = math.exp %16 : vector<8x128xf32>
    %cst_12 = arith.constant 1.000000e+00 : f32
    %18 = vector.broadcast %cst_12 : f32 to vector<8x128xf32>
    %19 = arith.addf %18, %17 : vector<8x128xf32>
    %20 = arith.divf %18, %19 : vector<8x128xf32>
    %21 = vector.extract_strided_slice %14 {offsets = [0, 128], sizes = [8, 128], strides = [1, 1]} : vector<8x512xf32> to vector<8x128xf32>
    %22 = arith.negf %21 : vector<8x128xf32>
    %23 = math.exp %22 : vector<8x128xf32>
    %cst_13 = arith.constant 1.000000e+00 : f32
    %24 = vector.broadcast %cst_13 : f32 to vector<8x128xf32>
    %25 = arith.addf %24, %23 : vector<8x128xf32>
    %26 = arith.divf %24, %25 : vector<8x128xf32>
    %27 = vector.extract_strided_slice %14 {offsets = [0, 256], sizes = [8, 128], strides = [1, 1]} : vector<8x512xf32> to vector<8x128xf32>
    %28 = math.tanh %27 : vector<8x128xf32>
    %29 = vector.extract_strided_slice %14 {offsets = [0, 384], sizes = [8, 128], strides = [1, 1]} : vector<8x512xf32> to vector<8x128xf32>
    %30 = arith.negf %29 : vector<8x128xf32>
    %31 = math.exp %30 : vector<8x128xf32>
    %cst_14 = arith.constant 1.000000e+00 : f32
    %32 = vector.broadcast %cst_14 : f32 to vector<8x128xf32>
    %33 = arith.addf %32, %31 : vector<8x128xf32>
    %34 = arith.divf %32, %33 : vector<8x128xf32>
    %35 = arith.mulf %26, %7 : vector<8x128xf32>
    %36 = arith.mulf %20, %28 : vector<8x128xf32>
    %37 = arith.addf %35, %36 : vector<8x128xf32>
    %38 = math.tanh %37 : vector<8x128xf32>
    %39 = arith.mulf %34, %38 : vector<8x128xf32>
    %40 = arith.index_cast %9 : i32 to index
    %c0_15 = arith.constant 0 : index
    %41 = vector.load %arg12[%40, %c0_15] : memref<64x128xf32, #tpu.memory_space<vmem>>, vector<8x128xf32>
    tpu.vector_store %arg12[%40, %c0_15], %39 {strides = array<i32>} : memref<64x128xf32, #tpu.memory_space<vmem>>, vector<8x128xf32>,
    %c1_i32 = arith.constant 1 : i32
    %c8_i32_16 = arith.constant 8 : i32
    %42 = arith.muli %c1_i32, %c8_i32_16 : i32
    %43 = tpu.assume_multiple %42, 8 : i32
    %44 = arith.index_cast %43 : i32 to index
    %c0_17 = arith.constant 0 : index
    %45 = vector.load %arg11[%44, %c0_17] : memref<64x512xf32, #tpu.memory_space<vmem>>, vector<8x512xf32>
    %c0_18 = arith.constant 0 : index
    %c0_19 = arith.constant 0 : index
    %46 = vector.load %arg3[%c0_18, %c0_19] : memref<128x512xf32, #tpu.memory_space<vmem>>, vector<128x512xf32>
    %cst_20 = arith.constant dense<0.000000e+00> : vector<8x512xf32>
    %47 = tpu.matmul %39, %46, %cst_20 {dimension_numbers = #tpu.dot_dimension_numbers<[1], [0], [0], [1], [0, 0, 1, 1], [], []>} : vector<8x128xf32>, vector<128x512xf32>, vector<8x512xf32> -> vector<8x512xf32>
    %48 = arith.addf %45, %47 : vector<8x512xf32>
    %49 = vector.extract_strided_slice %48 {offsets = [0, 0], sizes = [8, 128], strides = [1, 1]} : vector<8x512xf32> to vector<8x128xf32>
    %50 = arith.negf %49 : vector<8x128xf32>
    %51 = math.exp %50 : vector<8x128xf32>
    %cst_21 = arith.constant 1.000000e+00 : f32
    %52 = vector.broadcast %cst_21 : f32 to vector<8x128xf32>
    %53 = arith.addf %52, %51 : vector<8x128xf32>
    %54 = arith.divf %52, %53 : vector<8x128xf32>
    %55 = vector.extract_strided_slice %48 {offsets = [0, 128], sizes = [8, 128], strides = [1, 1]} : vector<8x512xf32> to vector<8x128xf32>
    %56 = arith.negf %55 : vector<8x128xf32>
    %57 = math.exp %56 : vector<8x128xf32>
    %cst_22 = arith.constant 1.000000e+00 : f32
    %58 = vector.broadcast %cst_22 : f32 to vector<8x128xf32>
    %59 = arith.addf %58, %57 : vector<8x128xf32>
    %60 = arith.divf %58, %59 : vector<8x128xf32>
    %61 = vector.extract_strided_slice %48 {offsets = [0, 256], sizes = [8, 128], strides = [1, 1]} : vector<8x512xf32> to vector<8x128xf32>
    %62 = math.tanh %61 : vector<8x128xf32>
    %63 = vector.extract_strided_slice %48 {offsets = [0, 384], sizes = [8, 128], strides = [1, 1]} : vector<8x512xf32> to vector<8x128xf32>
    %64 = arith.negf %63 : vector<8x128xf32>
    %65 = math.exp %64 : vector<8x128xf32>
    %cst_23 = arith.constant 1.000000e+00 : f32
    %66 = vector.broadcast %cst_23 : f32 to vector<8x128xf32>
    %67 = arith.addf %66, %65 : vector<8x128xf32>
    %68 = arith.divf %66, %67 : vector<8x128xf32>
    %69 = arith.mulf %60, %37 : vector<8x128xf32>
    %70 = arith.mulf %54, %62 : vector<8x128xf32>
    %71 = arith.addf %69, %70 : vector<8x128xf32>
    %72 = math.tanh %71 : vector<8x128xf32>
    %73 = arith.mulf %68, %72 : vector<8x128xf32>
    %74 = arith.index_cast %43 : i32 to index
    %c0_24 = arith.constant 0 : index
    %75 = vector.load %arg12[%74, %c0_24] : memref<64x128xf32, #tpu.memory_space<vmem>>, vector<8x128xf32>
    tpu.vector_store %arg12[%74, %c0_24], %73 {strides = array<i32>} : memref<64x128xf32, #tpu.memory_space<vmem>>, vector<8x128xf32>,
    %c2_i32 = arith.constant 2 : i32
    %c8_i32_25 = arith.constant 8 : i32
    %76 = arith.muli %c2_i32, %c8_i32_25 : i32
    %77 = tpu.assume_multiple %76, 8 : i32
    %78 = arith.index_cast %77 : i32 to index
    %c0_26 = arith.constant 0 : index
    %79 = vector.load %arg11[%78, %c0_26] : memref<64x512xf32, #tpu.memory_space<vmem>>, vector<8x512xf32>
    %c0_27 = arith.constant 0 : index
    %c0_28 = arith.constant 0 : index
    %80 = vector.load %arg3[%c0_27, %c0_28] : memref<128x512xf32, #tpu.memory_space<vmem>>, vector<128x512xf32>
    %cst_29 = arith.constant dense<0.000000e+00> : vector<8x512xf32>
    %81 = tpu.matmul %73, %80, %cst_29 {dimension_numbers = #tpu.dot_dimension_numbers<[1], [0], [0], [1], [0, 0, 1, 1], [], []>} : vector<8x128xf32>, vector<128x512xf32>, vector<8x512xf32> -> vector<8x512xf32>
    %82 = arith.addf %79, %81 : vector<8x512xf32>
    %83 = vector.extract_strided_slice %82 {offsets = [0, 0], sizes = [8, 128], strides = [1, 1]} : vector<8x512xf32> to vector<8x128xf32>
    %84 = arith.negf %83 : vector<8x128xf32>
    %85 = math.exp %84 : vector<8x128xf32>
    %cst_30 = arith.constant 1.000000e+00 : f32
    %86 = vector.broadcast %cst_30 : f32 to vector<8x128xf32>
    %87 = arith.addf %86, %85 : vector<8x128xf32>
    %88 = arith.divf %86, %87 : vector<8x128xf32>
    %89 = vector.extract_strided_slice %82 {offsets = [0, 128], sizes = [8, 128], strides = [1, 1]} : vector<8x512xf32> to vector<8x128xf32>
    %90 = arith.negf %89 : vector<8x128xf32>
    %91 = math.exp %90 : vector<8x128xf32>
    %cst_31 = arith.constant 1.000000e+00 : f32
    %92 = vector.broadcast %cst_31 : f32 to vector<8x128xf32>
    %93 = arith.addf %92, %91 : vector<8x128xf32>
    %94 = arith.divf %92, %93 : vector<8x128xf32>
    %95 = vector.extract_strided_slice %82 {offsets = [0, 256], sizes = [8, 128], strides = [1, 1]} : vector<8x512xf32> to vector<8x128xf32>
    %96 = math.tanh %95 : vector<8x128xf32>
    %97 = vector.extract_strided_slice %82 {offsets = [0, 384], sizes = [8, 128], strides = [1, 1]} : vector<8x512xf32> to vector<8x128xf32>
    %98 = arith.negf %97 : vector<8x128xf32>
    %99 = math.exp %98 : vector<8x128xf32>
    %cst_32 = arith.constant 1.000000e+00 : f32
    %100 = vector.broadcast %cst_32 : f32 to vector<8x128xf32>
    %101 = arith.addf %100, %99 : vector<8x128xf32>
    %102 = arith.divf %100, %101 : vector<8x128xf32>
    %103 = arith.mulf %94, %71 : vector<8x128xf32>
    %104 = arith.mulf %88, %96 : vector<8x128xf32>
    %105 = arith.addf %103, %104 : vector<8x128xf32>
    %106 = math.tanh %105 : vector<8x128xf32>
    %107 = arith.mulf %102, %106 : vector<8x128xf32>
    %108 = arith.index_cast %77 : i32 to index
    %c0_33 = arith.constant 0 : index
    %109 = vector.load %arg12[%108, %c0_33] : memref<64x128xf32, #tpu.memory_space<vmem>>, vector<8x128xf32>
    tpu.vector_store %arg12[%108, %c0_33], %107 {strides = array<i32>} : memref<64x128xf32, #tpu.memory_space<vmem>>, vector<8x128xf32>,
    %c3_i32 = arith.constant 3 : i32
    %c8_i32_34 = arith.constant 8 : i32
    %110 = arith.muli %c3_i32, %c8_i32_34 : i32
    %111 = tpu.assume_multiple %110, 8 : i32
    %112 = arith.index_cast %111 : i32 to index
    %c0_35 = arith.constant 0 : index
    %113 = vector.load %arg11[%112, %c0_35] : memref<64x512xf32, #tpu.memory_space<vmem>>, vector<8x512xf32>
    %c0_36 = arith.constant 0 : index
    %c0_37 = arith.constant 0 : index
    %114 = vector.load %arg3[%c0_36, %c0_37] : memref<128x512xf32, #tpu.memory_space<vmem>>, vector<128x512xf32>
    %cst_38 = arith.constant dense<0.000000e+00> : vector<8x512xf32>
    %115 = tpu.matmul %107, %114, %cst_38 {dimension_numbers = #tpu.dot_dimension_numbers<[1], [0], [0], [1], [0, 0, 1, 1], [], []>} : vector<8x128xf32>, vector<128x512xf32>, vector<8x512xf32> -> vector<8x512xf32>
    %116 = arith.addf %113, %115 : vector<8x512xf32>
    %117 = vector.extract_strided_slice %116 {offsets = [0, 0], sizes = [8, 128], strides = [1, 1]} : vector<8x512xf32> to vector<8x128xf32>
    %118 = arith.negf %117 : vector<8x128xf32>
    %119 = math.exp %118 : vector<8x128xf32>
    %cst_39 = arith.constant 1.000000e+00 : f32
    %120 = vector.broadcast %cst_39 : f32 to vector<8x128xf32>
    %121 = arith.addf %120, %119 : vector<8x128xf32>
    %122 = arith.divf %120, %121 : vector<8x128xf32>
    %123 = vector.extract_strided_slice %116 {offsets = [0, 128], sizes = [8, 128], strides = [1, 1]} : vector<8x512xf32> to vector<8x128xf32>
    %124 = arith.negf %123 : vector<8x128xf32>
    %125 = math.exp %124 : vector<8x128xf32>
    %cst_40 = arith.constant 1.000000e+00 : f32
    %126 = vector.broadcast %cst_40 : f32 to vector<8x128xf32>
    %127 = arith.addf %126, %125 : vector<8x128xf32>
    %128 = arith.divf %126, %127 : vector<8x128xf32>
    %129 = vector.extract_strided_slice %116 {offsets = [0, 256], sizes = [8, 128], strides = [1, 1]} : vector<8x512xf32> to vector<8x128xf32>
    %130 = math.tanh %129 : vector<8x128xf32>
    %131 = vector.extract_strided_slice %116 {offsets = [0, 384], sizes = [8, 128], strides = [1, 1]} : vector<8x512xf32> to vector<8x128xf32>
    %132 = arith.negf %131 : vector<8x128xf32>
    %133 = math.exp %132 : vector<8x128xf32>
    %cst_41 = arith.constant 1.000000e+00 : f32
    %134 = vector.broadcast %cst_41 : f32 to vector<8x128xf32>
    %135 = arith.addf %134, %133 : vector<8x128xf32>
    %136 = arith.divf %134, %135 : vector<8x128xf32>
    %137 = arith.mulf %128, %105 : vector<8x128xf32>
    %138 = arith.mulf %122, %130 : vector<8x128xf32>
    %139 = arith.addf %137, %138 : vector<8x128xf32>
    %140 = math.tanh %139 : vector<8x128xf32>
    %141 = arith.mulf %136, %140 : vector<8x128xf32>
    %142 = arith.index_cast %111 : i32 to index
    %c0_42 = arith.constant 0 : index
    %143 = vector.load %arg12[%142, %c0_42] : memref<64x128xf32, #tpu.memory_space<vmem>>, vector<8x128xf32>
    tpu.vector_store %arg12[%142, %c0_42], %141 {strides = array<i32>} : memref<64x128xf32, #tpu.memory_space<vmem>>, vector<8x128xf32>,
    %c4_i32 = arith.constant 4 : i32
    %c8_i32_43 = arith.constant 8 : i32
    %144 = arith.muli %c4_i32, %c8_i32_43 : i32
    %145 = tpu.assume_multiple %144, 8 : i32
    %146 = arith.index_cast %145 : i32 to index
    %c0_44 = arith.constant 0 : index
    %147 = vector.load %arg11[%146, %c0_44] : memref<64x512xf32, #tpu.memory_space<vmem>>, vector<8x512xf32>
    %c0_45 = arith.constant 0 : index
    %c0_46 = arith.constant 0 : index
    %148 = vector.load %arg3[%c0_45, %c0_46] : memref<128x512xf32, #tpu.memory_space<vmem>>, vector<128x512xf32>
    %cst_47 = arith.constant dense<0.000000e+00> : vector<8x512xf32>
    %149 = tpu.matmul %141, %148, %cst_47 {dimension_numbers = #tpu.dot_dimension_numbers<[1], [0], [0], [1], [0, 0, 1, 1], [], []>} : vector<8x128xf32>, vector<128x512xf32>, vector<8x512xf32> -> vector<8x512xf32>
    %150 = arith.addf %147, %149 : vector<8x512xf32>
    %151 = vector.extract_strided_slice %150 {offsets = [0, 0], sizes = [8, 128], strides = [1, 1]} : vector<8x512xf32> to vector<8x128xf32>
    %152 = arith.negf %151 : vector<8x128xf32>
    %153 = math.exp %152 : vector<8x128xf32>
    %cst_48 = arith.constant 1.000000e+00 : f32
    %154 = vector.broadcast %cst_48 : f32 to vector<8x128xf32>
    %155 = arith.addf %154, %153 : vector<8x128xf32>
    %156 = arith.divf %154, %155 : vector<8x128xf32>
    %157 = vector.extract_strided_slice %150 {offsets = [0, 128], sizes = [8, 128], strides = [1, 1]} : vector<8x512xf32> to vector<8x128xf32>
    %158 = arith.negf %157 : vector<8x128xf32>
    %159 = math.exp %158 : vector<8x128xf32>
    %cst_49 = arith.constant 1.000000e+00 : f32
    %160 = vector.broadcast %cst_49 : f32 to vector<8x128xf32>
    %161 = arith.addf %160, %159 : vector<8x128xf32>
    %162 = arith.divf %160, %161 : vector<8x128xf32>
    %163 = vector.extract_strided_slice %150 {offsets = [0, 256], sizes = [8, 128], strides = [1, 1]} : vector<8x512xf32> to vector<8x128xf32>
    %164 = math.tanh %163 : vector<8x128xf32>
    %165 = vector.extract_strided_slice %150 {offsets = [0, 384], sizes = [8, 128], strides = [1, 1]} : vector<8x512xf32> to vector<8x128xf32>
    %166 = arith.negf %165 : vector<8x128xf32>
    %167 = math.exp %166 : vector<8x128xf32>
    %cst_50 = arith.constant 1.000000e+00 : f32
    %168 = vector.broadcast %cst_50 : f32 to vector<8x128xf32>
    %169 = arith.addf %168, %167 : vector<8x128xf32>
    %170 = arith.divf %168, %169 : vector<8x128xf32>
    %171 = arith.mulf %162, %139 : vector<8x128xf32>
    %172 = arith.mulf %156, %164 : vector<8x128xf32>
    %173 = arith.addf %171, %172 : vector<8x128xf32>
    %174 = math.tanh %173 : vector<8x128xf32>
    %175 = arith.mulf %170, %174 : vector<8x128xf32>
    %176 = arith.index_cast %145 : i32 to index
    %c0_51 = arith.constant 0 : index
    %177 = vector.load %arg12[%176, %c0_51] : memref<64x128xf32, #tpu.memory_space<vmem>>, vector<8x128xf32>
    tpu.vector_store %arg12[%176, %c0_51], %175 {strides = array<i32>} : memref<64x128xf32, #tpu.memory_space<vmem>>, vector<8x128xf32>,
    %c5_i32 = arith.constant 5 : i32
    %c8_i32_52 = arith.constant 8 : i32
    %178 = arith.muli %c5_i32, %c8_i32_52 : i32
    %179 = tpu.assume_multiple %178, 8 : i32
    %180 = arith.index_cast %179 : i32 to index
    %c0_53 = arith.constant 0 : index
    %181 = vector.load %arg11[%180, %c0_53] : memref<64x512xf32, #tpu.memory_space<vmem>>, vector<8x512xf32>
    %c0_54 = arith.constant 0 : index
    %c0_55 = arith.constant 0 : index
    %182 = vector.load %arg3[%c0_54, %c0_55] : memref<128x512xf32, #tpu.memory_space<vmem>>, vector<128x512xf32>
    %cst_56 = arith.constant dense<0.000000e+00> : vector<8x512xf32>
    %183 = tpu.matmul %175, %182, %cst_56 {dimension_numbers = #tpu.dot_dimension_numbers<[1], [0], [0], [1], [0, 0, 1, 1], [], []>} : vector<8x128xf32>, vector<128x512xf32>, vector<8x512xf32> -> vector<8x512xf32>
    %184 = arith.addf %181, %183 : vector<8x512xf32>
    %185 = vector.extract_strided_slice %184 {offsets = [0, 0], sizes = [8, 128], strides = [1, 1]} : vector<8x512xf32> to vector<8x128xf32>
    %186 = arith.negf %185 : vector<8x128xf32>
    %187 = math.exp %186 : vector<8x128xf32>
    %cst_57 = arith.constant 1.000000e+00 : f32
    %188 = vector.broadcast %cst_57 : f32 to vector<8x128xf32>
    %189 = arith.addf %188, %187 : vector<8x128xf32>
    %190 = arith.divf %188, %189 : vector<8x128xf32>
    %191 = vector.extract_strided_slice %184 {offsets = [0, 128], sizes = [8, 128], strides = [1, 1]} : vector<8x512xf32> to vector<8x128xf32>
    %192 = arith.negf %191 : vector<8x128xf32>
    %193 = math.exp %192 : vector<8x128xf32>
    %cst_58 = arith.constant 1.000000e+00 : f32
    %194 = vector.broadcast %cst_58 : f32 to vector<8x128xf32>
    %195 = arith.addf %194, %193 : vector<8x128xf32>
    %196 = arith.divf %194, %195 : vector<8x128xf32>
    %197 = vector.extract_strided_slice %184 {offsets = [0, 256], sizes = [8, 128], strides = [1, 1]} : vector<8x512xf32> to vector<8x128xf32>
    %198 = math.tanh %197 : vector<8x128xf32>
    %199 = vector.extract_strided_slice %184 {offsets = [0, 384], sizes = [8, 128], strides = [1, 1]} : vector<8x512xf32> to vector<8x128xf32>
    %200 = arith.negf %199 : vector<8x128xf32>
    %201 = math.exp %200 : vector<8x128xf32>
    %cst_59 = arith.constant 1.000000e+00 : f32
    %202 = vector.broadcast %cst_59 : f32 to vector<8x128xf32>
    %203 = arith.addf %202, %201 : vector<8x128xf32>
    %204 = arith.divf %202, %203 : vector<8x128xf32>
    %205 = arith.mulf %196, %173 : vector<8x128xf32>
    %206 = arith.mulf %190, %198 : vector<8x128xf32>
    %207 = arith.addf %205, %206 : vector<8x128xf32>
    %208 = math.tanh %207 : vector<8x128xf32>
    %209 = arith.mulf %204, %208 : vector<8x128xf32>
    %210 = arith.index_cast %179 : i32 to index
    %c0_60 = arith.constant 0 : index
    %211 = vector.load %arg12[%210, %c0_60] : memref<64x128xf32, #tpu.memory_space<vmem>>, vector<8x128xf32>
    tpu.vector_store %arg12[%210, %c0_60], %209 {strides = array<i32>} : memref<64x128xf32, #tpu.memory_space<vmem>>, vector<8x128xf32>,
    %c6_i32 = arith.constant 6 : i32
    %c8_i32_61 = arith.constant 8 : i32
    %212 = arith.muli %c6_i32, %c8_i32_61 : i32
    %213 = tpu.assume_multiple %212, 8 : i32
    %214 = arith.index_cast %213 : i32 to index
    %c0_62 = arith.constant 0 : index
    %215 = vector.load %arg11[%214, %c0_62] : memref<64x512xf32, #tpu.memory_space<vmem>>, vector<8x512xf32>
    %c0_63 = arith.constant 0 : index
    %c0_64 = arith.constant 0 : index
    %216 = vector.load %arg3[%c0_63, %c0_64] : memref<128x512xf32, #tpu.memory_space<vmem>>, vector<128x512xf32>
    %cst_65 = arith.constant dense<0.000000e+00> : vector<8x512xf32>
    %217 = tpu.matmul %209, %216, %cst_65 {dimension_numbers = #tpu.dot_dimension_numbers<[1], [0], [0], [1], [0, 0, 1, 1], [], []>} : vector<8x128xf32>, vector<128x512xf32>, vector<8x512xf32> -> vector<8x512xf32>
    %218 = arith.addf %215, %217 : vector<8x512xf32>
    %219 = vector.extract_strided_slice %218 {offsets = [0, 0], sizes = [8, 128], strides = [1, 1]} : vector<8x512xf32> to vector<8x128xf32>
    %220 = arith.negf %219 : vector<8x128xf32>
    %221 = math.exp %220 : vector<8x128xf32>
    %cst_66 = arith.constant 1.000000e+00 : f32
    %222 = vector.broadcast %cst_66 : f32 to vector<8x128xf32>
    %223 = arith.addf %222, %221 : vector<8x128xf32>
    %224 = arith.divf %222, %223 : vector<8x128xf32>
    %225 = vector.extract_strided_slice %218 {offsets = [0, 128], sizes = [8, 128], strides = [1, 1]} : vector<8x512xf32> to vector<8x128xf32>
    %226 = arith.negf %225 : vector<8x128xf32>
    %227 = math.exp %226 : vector<8x128xf32>
    %cst_67 = arith.constant 1.000000e+00 : f32
    %228 = vector.broadcast %cst_67 : f32 to vector<8x128xf32>
    %229 = arith.addf %228, %227 : vector<8x128xf32>
    %230 = arith.divf %228, %229 : vector<8x128xf32>
    %231 = vector.extract_strided_slice %218 {offsets = [0, 256], sizes = [8, 128], strides = [1, 1]} : vector<8x512xf32> to vector<8x128xf32>
    %232 = math.tanh %231 : vector<8x128xf32>
    %233 = vector.extract_strided_slice %218 {offsets = [0, 384], sizes = [8, 128], strides = [1, 1]} : vector<8x512xf32> to vector<8x128xf32>
    %234 = arith.negf %233 : vector<8x128xf32>
    %235 = math.exp %234 : vector<8x128xf32>
    %cst_68 = arith.constant 1.000000e+00 : f32
    %236 = vector.broadcast %cst_68 : f32 to vector<8x128xf32>
    %237 = arith.addf %236, %235 : vector<8x128xf32>
    %238 = arith.divf %236, %237 : vector<8x128xf32>
    %239 = arith.mulf %230, %207 : vector<8x128xf32>
    %240 = arith.mulf %224, %232 : vector<8x128xf32>
    %241 = arith.addf %239, %240 : vector<8x128xf32>
    %242 = math.tanh %241 : vector<8x128xf32>
    %243 = arith.mulf %238, %242 : vector<8x128xf32>
    %244 = arith.index_cast %213 : i32 to index
    %c0_69 = arith.constant 0 : index
    %245 = vector.load %arg12[%244, %c0_69] : memref<64x128xf32, #tpu.memory_space<vmem>>, vector<8x128xf32>
    tpu.vector_store %arg12[%244, %c0_69], %243 {strides = array<i32>} : memref<64x128xf32, #tpu.memory_space<vmem>>, vector<8x128xf32>,
    %c7_i32 = arith.constant 7 : i32
    %c8_i32_70 = arith.constant 8 : i32
    %246 = arith.muli %c7_i32, %c8_i32_70 : i32
    %247 = tpu.assume_multiple %246, 8 : i32
    %248 = arith.index_cast %247 : i32 to index
    %c0_71 = arith.constant 0 : index
    %249 = vector.load %arg11[%248, %c0_71] : memref<64x512xf32, #tpu.memory_space<vmem>>, vector<8x512xf32>
    %c0_72 = arith.constant 0 : index
    %c0_73 = arith.constant 0 : index
    %250 = vector.load %arg3[%c0_72, %c0_73] : memref<128x512xf32, #tpu.memory_space<vmem>>, vector<128x512xf32>
    %cst_74 = arith.constant dense<0.000000e+00> : vector<8x512xf32>
    %251 = tpu.matmul %243, %250, %cst_74 {dimension_numbers = #tpu.dot_dimension_numbers<[1], [0], [0], [1], [0, 0, 1, 1], [], []>} : vector<8x128xf32>, vector<128x512xf32>, vector<8x512xf32> -> vector<8x512xf32>
    %252 = arith.addf %249, %251 : vector<8x512xf32>
    %253 = vector.extract_strided_slice %252 {offsets = [0, 0], sizes = [8, 128], strides = [1, 1]} : vector<8x512xf32> to vector<8x128xf32>
    %254 = arith.negf %253 : vector<8x128xf32>
    %255 = math.exp %254 : vector<8x128xf32>
    %cst_75 = arith.constant 1.000000e+00 : f32
    %256 = vector.broadcast %cst_75 : f32 to vector<8x128xf32>
    %257 = arith.addf %256, %255 : vector<8x128xf32>
    %258 = arith.divf %256, %257 : vector<8x128xf32>
    %259 = vector.extract_strided_slice %252 {offsets = [0, 128], sizes = [8, 128], strides = [1, 1]} : vector<8x512xf32> to vector<8x128xf32>
    %260 = arith.negf %259 : vector<8x128xf32>
    %261 = math.exp %260 : vector<8x128xf32>
    %cst_76 = arith.constant 1.000000e+00 : f32
    %262 = vector.broadcast %cst_76 : f32 to vector<8x128xf32>
    %263 = arith.addf %262, %261 : vector<8x128xf32>
    %264 = arith.divf %262, %263 : vector<8x128xf32>
    %265 = vector.extract_strided_slice %252 {offsets = [0, 256], sizes = [8, 128], strides = [1, 1]} : vector<8x512xf32> to vector<8x128xf32>
    %266 = math.tanh %265 : vector<8x128xf32>
    %267 = vector.extract_strided_slice %252 {offsets = [0, 384], sizes = [8, 128], strides = [1, 1]} : vector<8x512xf32> to vector<8x128xf32>
    %268 = arith.negf %267 : vector<8x128xf32>
    %269 = math.exp %268 : vector<8x128xf32>
    %cst_77 = arith.constant 1.000000e+00 : f32
    %270 = vector.broadcast %cst_77 : f32 to vector<8x128xf32>
    %271 = arith.addf %270, %269 : vector<8x128xf32>
    %272 = arith.divf %270, %271 : vector<8x128xf32>
    %273 = arith.mulf %264, %241 : vector<8x128xf32>
    %274 = arith.mulf %258, %266 : vector<8x128xf32>
    %275 = arith.addf %273, %274 : vector<8x128xf32>
    %276 = math.tanh %275 : vector<8x128xf32>
    %277 = arith.mulf %272, %276 : vector<8x128xf32>
    %278 = arith.index_cast %247 : i32 to index
    %c0_78 = arith.constant 0 : index
    %279 = vector.load %arg12[%278, %c0_78] : memref<64x128xf32, #tpu.memory_space<vmem>>, vector<8x128xf32>
    tpu.vector_store %arg12[%278, %c0_78], %277 {strides = array<i32>} : memref<64x128xf32, #tpu.memory_space<vmem>>, vector<8x128xf32>,
    %c8_i32_79 = arith.constant 8 : i32
    %c0_80 = arith.constant 0 : index
    %c0_81 = arith.constant 0 : index
    %280 = vector.load %arg12[%c0_80, %c0_81] : memref<64x128xf32, #tpu.memory_space<vmem>>, vector<64x128xf32>
    %c0_82 = arith.constant 0 : index
    %c0_83 = arith.constant 0 : index
    %281 = vector.load %arg5[%c0_82, %c0_83] : memref<128x512xf32, #tpu.memory_space<vmem>>, vector<128x512xf32>
    %cst_84 = arith.constant dense<0.000000e+00> : vector<64x512xf32>
    %282 = tpu.matmul %280, %281, %cst_84 {dimension_numbers = #tpu.dot_dimension_numbers<[1], [0], [0], [1], [0, 0, 1, 1], [], []>} : vector<64x128xf32>, vector<128x512xf32>, vector<64x512xf32> -> vector<64x512xf32>
    %c0_85 = arith.constant 0 : index
    %c0_86 = arith.constant 0 : index
    %283 = vector.load %arg7[%c0_85, %c0_86] : memref<1x512xf32, #tpu.memory_space<vmem>>, vector<1x512xf32>
    %284 = vector.broadcast %283 : vector<1x512xf32> to vector<64x512xf32>
    %285 = arith.addf %282, %284 : vector<64x512xf32>
    %c0_87 = arith.constant 0 : index
    %c0_88 = arith.constant 0 : index
    %286 = vector.load %arg11[%c0_87, %c0_88] : memref<64x512xf32, #tpu.memory_space<vmem>>, vector<64x512xf32>
    tpu.vector_store %arg11[%c0_87, %c0_88], %285 {strides = array<i32>} : memref<64x512xf32, #tpu.memory_space<vmem>>, vector<64x512xf32>,
    %cst_89 = arith.constant 0.000000e+00 : f32
    %287 = vector.broadcast %cst_89 : f32 to vector<8x128xf32>
    %c0_i32_90 = arith.constant 0 : i32
    %c8_i32_91 = arith.constant 8 : i32
    %288 = arith.muli %c0_i32_90, %c8_i32_91 : i32
    %289 = tpu.assume_multiple %288, 8 : i32
    %290 = arith.index_cast %289 : i32 to index
    %c0_92 = arith.constant 0 : index
    %291 = vector.load %arg11[%290, %c0_92] : memref<64x512xf32, #tpu.memory_space<vmem>>, vector<8x512xf32>
    %c0_93 = arith.constant 0 : index
    %c0_94 = arith.constant 0 : index
    %292 = vector.load %arg6[%c0_93, %c0_94] : memref<128x512xf32, #tpu.memory_space<vmem>>, vector<128x512xf32>
    %cst_95 = arith.constant dense<0.000000e+00> : vector<8x512xf32>
    %293 = tpu.matmul %287, %292, %cst_95 {dimension_numbers = #tpu.dot_dimension_numbers<[1], [0], [0], [1], [0, 0, 1, 1], [], []>} : vector<8x128xf32>, vector<128x512xf32>, vector<8x512xf32> -> vector<8x512xf32>
    %294 = arith.addf %291, %293 : vector<8x512xf32>
    %295 = vector.extract_strided_slice %294 {offsets = [0, 0], sizes = [8, 128], strides = [1, 1]} : vector<8x512xf32> to vector<8x128xf32>
    %296 = arith.negf %295 : vector<8x128xf32>
    %297 = math.exp %296 : vector<8x128xf32>
    %cst_96 = arith.constant 1.000000e+00 : f32
    %298 = vector.broadcast %cst_96 : f32 to vector<8x128xf32>
    %299 = arith.addf %298, %297 : vector<8x128xf32>
    %300 = arith.divf %298, %299 : vector<8x128xf32>
    %301 = vector.extract_strided_slice %294 {offsets = [0, 128], sizes = [8, 128], strides = [1, 1]} : vector<8x512xf32> to vector<8x128xf32>
    %302 = arith.negf %301 : vector<8x128xf32>
    %303 = math.exp %302 : vector<8x128xf32>
    %cst_97 = arith.constant 1.000000e+00 : f32
    %304 = vector.broadcast %cst_97 : f32 to vector<8x128xf32>
    %305 = arith.addf %304, %303 : vector<8x128xf32>
    %306 = arith.divf %304, %305 : vector<8x128xf32>
    %307 = vector.extract_strided_slice %294 {offsets = [0, 256], sizes = [8, 128], strides = [1, 1]} : vector<8x512xf32> to vector<8x128xf32>
    %308 = math.tanh %307 : vector<8x128xf32>
    %309 = vector.extract_strided_slice %294 {offsets = [0, 384], sizes = [8, 128], strides = [1, 1]} : vector<8x512xf32> to vector<8x128xf32>
    %310 = arith.negf %309 : vector<8x128xf32>
    %311 = math.exp %310 : vector<8x128xf32>
    %cst_98 = arith.constant 1.000000e+00 : f32
    %312 = vector.broadcast %cst_98 : f32 to vector<8x128xf32>
    %313 = arith.addf %312, %311 : vector<8x128xf32>
    %314 = arith.divf %312, %313 : vector<8x128xf32>
    %315 = arith.mulf %306, %287 : vector<8x128xf32>
    %316 = arith.mulf %300, %308 : vector<8x128xf32>
    %317 = arith.addf %315, %316 : vector<8x128xf32>
    %318 = math.tanh %317 : vector<8x128xf32>
    %319 = arith.mulf %314, %318 : vector<8x128xf32>
    %c1_i32_99 = arith.constant 1 : i32
    %c8_i32_100 = arith.constant 8 : i32
    %320 = arith.muli %c1_i32_99, %c8_i32_100 : i32
    %321 = tpu.assume_multiple %320, 8 : i32
    %322 = arith.index_cast %321 : i32 to index
    %c0_101 = arith.constant 0 : index
    %323 = vector.load %arg11[%322, %c0_101] : memref<64x512xf32, #tpu.memory_space<vmem>>, vector<8x512xf32>
    %c0_102 = arith.constant 0 : index
    %c0_103 = arith.constant 0 : index
    %324 = vector.load %arg6[%c0_102, %c0_103] : memref<128x512xf32, #tpu.memory_space<vmem>>, vector<128x512xf32>
    %cst_104 = arith.constant dense<0.000000e+00> : vector<8x512xf32>
    %325 = tpu.matmul %319, %324, %cst_104 {dimension_numbers = #tpu.dot_dimension_numbers<[1], [0], [0], [1], [0, 0, 1, 1], [], []>} : vector<8x128xf32>, vector<128x512xf32>, vector<8x512xf32> -> vector<8x512xf32>
    %326 = arith.addf %323, %325 : vector<8x512xf32>
    %327 = vector.extract_strided_slice %326 {offsets = [0, 0], sizes = [8, 128], strides = [1, 1]} : vector<8x512xf32> to vector<8x128xf32>
    %328 = arith.negf %327 : vector<8x128xf32>
    %329 = math.exp %328 : vector<8x128xf32>
    %cst_105 = arith.constant 1.000000e+00 : f32
    %330 = vector.broadcast %cst_105 : f32 to vector<8x128xf32>
    %331 = arith.addf %330, %329 : vector<8x128xf32>
    %332 = arith.divf %330, %331 : vector<8x128xf32>
    %333 = vector.extract_strided_slice %326 {offsets = [0, 128], sizes = [8, 128], strides = [1, 1]} : vector<8x512xf32> to vector<8x128xf32>
    %334 = arith.negf %333 : vector<8x128xf32>
    %335 = math.exp %334 : vector<8x128xf32>
    %cst_106 = arith.constant 1.000000e+00 : f32
    %336 = vector.broadcast %cst_106 : f32 to vector<8x128xf32>
    %337 = arith.addf %336, %335 : vector<8x128xf32>
    %338 = arith.divf %336, %337 : vector<8x128xf32>
    %339 = vector.extract_strided_slice %326 {offsets = [0, 256], sizes = [8, 128], strides = [1, 1]} : vector<8x512xf32> to vector<8x128xf32>
    %340 = math.tanh %339 : vector<8x128xf32>
    %341 = vector.extract_strided_slice %326 {offsets = [0, 384], sizes = [8, 128], strides = [1, 1]} : vector<8x512xf32> to vector<8x128xf32>
    %342 = arith.negf %341 : vector<8x128xf32>
    %343 = math.exp %342 : vector<8x128xf32>
    %cst_107 = arith.constant 1.000000e+00 : f32
    %344 = vector.broadcast %cst_107 : f32 to vector<8x128xf32>
    %345 = arith.addf %344, %343 : vector<8x128xf32>
    %346 = arith.divf %344, %345 : vector<8x128xf32>
    %347 = arith.mulf %338, %317 : vector<8x128xf32>
    %348 = arith.mulf %332, %340 : vector<8x128xf32>
    %349 = arith.addf %347, %348 : vector<8x128xf32>
    %350 = math.tanh %349 : vector<8x128xf32>
    %351 = arith.mulf %346, %350 : vector<8x128xf32>
    %c2_i32_108 = arith.constant 2 : i32
    %c8_i32_109 = arith.constant 8 : i32
    %352 = arith.muli %c2_i32_108, %c8_i32_109 : i32
    %353 = tpu.assume_multiple %352, 8 : i32
    %354 = arith.index_cast %353 : i32 to index
    %c0_110 = arith.constant 0 : index
    %355 = vector.load %arg11[%354, %c0_110] : memref<64x512xf32, #tpu.memory_space<vmem>>, vector<8x512xf32>
    %c0_111 = arith.constant 0 : index
    %c0_112 = arith.constant 0 : index
    %356 = vector.load %arg6[%c0_111, %c0_112] : memref<128x512xf32, #tpu.memory_space<vmem>>, vector<128x512xf32>
    %cst_113 = arith.constant dense<0.000000e+00> : vector<8x512xf32>
    %357 = tpu.matmul %351, %356, %cst_113 {dimension_numbers = #tpu.dot_dimension_numbers<[1], [0], [0], [1], [0, 0, 1, 1], [], []>} : vector<8x128xf32>, vector<128x512xf32>, vector<8x512xf32> -> vector<8x512xf32>
    %358 = arith.addf %355, %357 : vector<8x512xf32>
    %359 = vector.extract_strided_slice %358 {offsets = [0, 0], sizes = [8, 128], strides = [1, 1]} : vector<8x512xf32> to vector<8x128xf32>
    %360 = arith.negf %359 : vector<8x128xf32>
    %361 = math.exp %360 : vector<8x128xf32>
    %cst_114 = arith.constant 1.000000e+00 : f32
    %362 = vector.broadcast %cst_114 : f32 to vector<8x128xf32>
    %363 = arith.addf %362, %361 : vector<8x128xf32>
    %364 = arith.divf %362, %363 : vector<8x128xf32>
    %365 = vector.extract_strided_slice %358 {offsets = [0, 128], sizes = [8, 128], strides = [1, 1]} : vector<8x512xf32> to vector<8x128xf32>
    %366 = arith.negf %365 : vector<8x128xf32>
    %367 = math.exp %366 : vector<8x128xf32>
    %cst_115 = arith.constant 1.000000e+00 : f32
    %368 = vector.broadcast %cst_115 : f32 to vector<8x128xf32>
    %369 = arith.addf %368, %367 : vector<8x128xf32>
    %370 = arith.divf %368, %369 : vector<8x128xf32>
    %371 = vector.extract_strided_slice %358 {offsets = [0, 256], sizes = [8, 128], strides = [1, 1]} : vector<8x512xf32> to vector<8x128xf32>
    %372 = math.tanh %371 : vector<8x128xf32>
    %373 = vector.extract_strided_slice %358 {offsets = [0, 384], sizes = [8, 128], strides = [1, 1]} : vector<8x512xf32> to vector<8x128xf32>
    %374 = arith.negf %373 : vector<8x128xf32>
    %375 = math.exp %374 : vector<8x128xf32>
    %cst_116 = arith.constant 1.000000e+00 : f32
    %376 = vector.broadcast %cst_116 : f32 to vector<8x128xf32>
    %377 = arith.addf %376, %375 : vector<8x128xf32>
    %378 = arith.divf %376, %377 : vector<8x128xf32>
    %379 = arith.mulf %370, %349 : vector<8x128xf32>
    %380 = arith.mulf %364, %372 : vector<8x128xf32>
    %381 = arith.addf %379, %380 : vector<8x128xf32>
    %382 = math.tanh %381 : vector<8x128xf32>
    %383 = arith.mulf %378, %382 : vector<8x128xf32>
    %c3_i32_117 = arith.constant 3 : i32
    %c8_i32_118 = arith.constant 8 : i32
    %384 = arith.muli %c3_i32_117, %c8_i32_118 : i32
    %385 = tpu.assume_multiple %384, 8 : i32
    %386 = arith.index_cast %385 : i32 to index
    %c0_119 = arith.constant 0 : index
    %387 = vector.load %arg11[%386, %c0_119] : memref<64x512xf32, #tpu.memory_space<vmem>>, vector<8x512xf32>
    %c0_120 = arith.constant 0 : index
    %c0_121 = arith.constant 0 : index
    %388 = vector.load %arg6[%c0_120, %c0_121] : memref<128x512xf32, #tpu.memory_space<vmem>>, vector<128x512xf32>
    %cst_122 = arith.constant dense<0.000000e+00> : vector<8x512xf32>
    %389 = tpu.matmul %383, %388, %cst_122 {dimension_numbers = #tpu.dot_dimension_numbers<[1], [0], [0], [1], [0, 0, 1, 1], [], []>} : vector<8x128xf32>, vector<128x512xf32>, vector<8x512xf32> -> vector<8x512xf32>
    %390 = arith.addf %387, %389 : vector<8x512xf32>
    %391 = vector.extract_strided_slice %390 {offsets = [0, 0], sizes = [8, 128], strides = [1, 1]} : vector<8x512xf32> to vector<8x128xf32>
    %392 = arith.negf %391 : vector<8x128xf32>
    %393 = math.exp %392 : vector<8x128xf32>
    %cst_123 = arith.constant 1.000000e+00 : f32
    %394 = vector.broadcast %cst_123 : f32 to vector<8x128xf32>
    %395 = arith.addf %394, %393 : vector<8x128xf32>
    %396 = arith.divf %394, %395 : vector<8x128xf32>
    %397 = vector.extract_strided_slice %390 {offsets = [0, 128], sizes = [8, 128], strides = [1, 1]} : vector<8x512xf32> to vector<8x128xf32>
    %398 = arith.negf %397 : vector<8x128xf32>
    %399 = math.exp %398 : vector<8x128xf32>
    %cst_124 = arith.constant 1.000000e+00 : f32
    %400 = vector.broadcast %cst_124 : f32 to vector<8x128xf32>
    %401 = arith.addf %400, %399 : vector<8x128xf32>
    %402 = arith.divf %400, %401 : vector<8x128xf32>
    %403 = vector.extract_strided_slice %390 {offsets = [0, 256], sizes = [8, 128], strides = [1, 1]} : vector<8x512xf32> to vector<8x128xf32>
    %404 = math.tanh %403 : vector<8x128xf32>
    %405 = vector.extract_strided_slice %390 {offsets = [0, 384], sizes = [8, 128], strides = [1, 1]} : vector<8x512xf32> to vector<8x128xf32>
    %406 = arith.negf %405 : vector<8x128xf32>
    %407 = math.exp %406 : vector<8x128xf32>
    %cst_125 = arith.constant 1.000000e+00 : f32
    %408 = vector.broadcast %cst_125 : f32 to vector<8x128xf32>
    %409 = arith.addf %408, %407 : vector<8x128xf32>
    %410 = arith.divf %408, %409 : vector<8x128xf32>
    %411 = arith.mulf %402, %381 : vector<8x128xf32>
    %412 = arith.mulf %396, %404 : vector<8x128xf32>
    %413 = arith.addf %411, %412 : vector<8x128xf32>
    %414 = math.tanh %413 : vector<8x128xf32>
    %415 = arith.mulf %410, %414 : vector<8x128xf32>
    %c4_i32_126 = arith.constant 4 : i32
    %c8_i32_127 = arith.constant 8 : i32
    %416 = arith.muli %c4_i32_126, %c8_i32_127 : i32
    %417 = tpu.assume_multiple %416, 8 : i32
    %418 = arith.index_cast %417 : i32 to index
    %c0_128 = arith.constant 0 : index
    %419 = vector.load %arg11[%418, %c0_128] : memref<64x512xf32, #tpu.memory_space<vmem>>, vector<8x512xf32>
    %c0_129 = arith.constant 0 : index
    %c0_130 = arith.constant 0 : index
    %420 = vector.load %arg6[%c0_129, %c0_130] : memref<128x512xf32, #tpu.memory_space<vmem>>, vector<128x512xf32>
    %cst_131 = arith.constant dense<0.000000e+00> : vector<8x512xf32>
    %421 = tpu.matmul %415, %420, %cst_131 {dimension_numbers = #tpu.dot_dimension_numbers<[1], [0], [0], [1], [0, 0, 1, 1], [], []>} : vector<8x128xf32>, vector<128x512xf32>, vector<8x512xf32> -> vector<8x512xf32>
    %422 = arith.addf %419, %421 : vector<8x512xf32>
    %423 = vector.extract_strided_slice %422 {offsets = [0, 0], sizes = [8, 128], strides = [1, 1]} : vector<8x512xf32> to vector<8x128xf32>
    %424 = arith.negf %423 : vector<8x128xf32>
    %425 = math.exp %424 : vector<8x128xf32>
    %cst_132 = arith.constant 1.000000e+00 : f32
    %426 = vector.broadcast %cst_132 : f32 to vector<8x128xf32>
    %427 = arith.addf %426, %425 : vector<8x128xf32>
    %428 = arith.divf %426, %427 : vector<8x128xf32>
    %429 = vector.extract_strided_slice %422 {offsets = [0, 128], sizes = [8, 128], strides = [1, 1]} : vector<8x512xf32> to vector<8x128xf32>
    %430 = arith.negf %429 : vector<8x128xf32>
    %431 = math.exp %430 : vector<8x128xf32>
    %cst_133 = arith.constant 1.000000e+00 : f32
    %432 = vector.broadcast %cst_133 : f32 to vector<8x128xf32>
    %433 = arith.addf %432, %431 : vector<8x128xf32>
    %434 = arith.divf %432, %433 : vector<8x128xf32>
    %435 = vector.extract_strided_slice %422 {offsets = [0, 256], sizes = [8, 128], strides = [1, 1]} : vector<8x512xf32> to vector<8x128xf32>
    %436 = math.tanh %435 : vector<8x128xf32>
    %437 = vector.extract_strided_slice %422 {offsets = [0, 384], sizes = [8, 128], strides = [1, 1]} : vector<8x512xf32> to vector<8x128xf32>
    %438 = arith.negf %437 : vector<8x128xf32>
    %439 = math.exp %438 : vector<8x128xf32>
    %cst_134 = arith.constant 1.000000e+00 : f32
    %440 = vector.broadcast %cst_134 : f32 to vector<8x128xf32>
    %441 = arith.addf %440, %439 : vector<8x128xf32>
    %442 = arith.divf %440, %441 : vector<8x128xf32>
    %443 = arith.mulf %434, %413 : vector<8x128xf32>
    %444 = arith.mulf %428, %436 : vector<8x128xf32>
    %445 = arith.addf %443, %444 : vector<8x128xf32>
    %446 = math.tanh %445 : vector<8x128xf32>
    %447 = arith.mulf %442, %446 : vector<8x128xf32>
    %c5_i32_135 = arith.constant 5 : i32
    %c8_i32_136 = arith.constant 8 : i32
    %448 = arith.muli %c5_i32_135, %c8_i32_136 : i32
    %449 = tpu.assume_multiple %448, 8 : i32
    %450 = arith.index_cast %449 : i32 to index
    %c0_137 = arith.constant 0 : index
    %451 = vector.load %arg11[%450, %c0_137] : memref<64x512xf32, #tpu.memory_space<vmem>>, vector<8x512xf32>
    %c0_138 = arith.constant 0 : index
    %c0_139 = arith.constant 0 : index
    %452 = vector.load %arg6[%c0_138, %c0_139] : memref<128x512xf32, #tpu.memory_space<vmem>>, vector<128x512xf32>
    %cst_140 = arith.constant dense<0.000000e+00> : vector<8x512xf32>
    %453 = tpu.matmul %447, %452, %cst_140 {dimension_numbers = #tpu.dot_dimension_numbers<[1], [0], [0], [1], [0, 0, 1, 1], [], []>} : vector<8x128xf32>, vector<128x512xf32>, vector<8x512xf32> -> vector<8x512xf32>
    %454 = arith.addf %451, %453 : vector<8x512xf32>
    %455 = vector.extract_strided_slice %454 {offsets = [0, 0], sizes = [8, 128], strides = [1, 1]} : vector<8x512xf32> to vector<8x128xf32>
    %456 = arith.negf %455 : vector<8x128xf32>
    %457 = math.exp %456 : vector<8x128xf32>
    %cst_141 = arith.constant 1.000000e+00 : f32
    %458 = vector.broadcast %cst_141 : f32 to vector<8x128xf32>
    %459 = arith.addf %458, %457 : vector<8x128xf32>
    %460 = arith.divf %458, %459 : vector<8x128xf32>
    %461 = vector.extract_strided_slice %454 {offsets = [0, 128], sizes = [8, 128], strides = [1, 1]} : vector<8x512xf32> to vector<8x128xf32>
    %462 = arith.negf %461 : vector<8x128xf32>
    %463 = math.exp %462 : vector<8x128xf32>
    %cst_142 = arith.constant 1.000000e+00 : f32
    %464 = vector.broadcast %cst_142 : f32 to vector<8x128xf32>
    %465 = arith.addf %464, %463 : vector<8x128xf32>
    %466 = arith.divf %464, %465 : vector<8x128xf32>
    %467 = vector.extract_strided_slice %454 {offsets = [0, 256], sizes = [8, 128], strides = [1, 1]} : vector<8x512xf32> to vector<8x128xf32>
    %468 = math.tanh %467 : vector<8x128xf32>
    %469 = vector.extract_strided_slice %454 {offsets = [0, 384], sizes = [8, 128], strides = [1, 1]} : vector<8x512xf32> to vector<8x128xf32>
    %470 = arith.negf %469 : vector<8x128xf32>
    %471 = math.exp %470 : vector<8x128xf32>
    %cst_143 = arith.constant 1.000000e+00 : f32
    %472 = vector.broadcast %cst_143 : f32 to vector<8x128xf32>
    %473 = arith.addf %472, %471 : vector<8x128xf32>
    %474 = arith.divf %472, %473 : vector<8x128xf32>
    %475 = arith.mulf %466, %445 : vector<8x128xf32>
    %476 = arith.mulf %460, %468 : vector<8x128xf32>
    %477 = arith.addf %475, %476 : vector<8x128xf32>
    %478 = math.tanh %477 : vector<8x128xf32>
    %479 = arith.mulf %474, %478 : vector<8x128xf32>
    %c6_i32_144 = arith.constant 6 : i32
    %c8_i32_145 = arith.constant 8 : i32
    %480 = arith.muli %c6_i32_144, %c8_i32_145 : i32
    %481 = tpu.assume_multiple %480, 8 : i32
    %482 = arith.index_cast %481 : i32 to index
    %c0_146 = arith.constant 0 : index
    %483 = vector.load %arg11[%482, %c0_146] : memref<64x512xf32, #tpu.memory_space<vmem>>, vector<8x512xf32>
    %c0_147 = arith.constant 0 : index
    %c0_148 = arith.constant 0 : index
    %484 = vector.load %arg6[%c0_147, %c0_148] : memref<128x512xf32, #tpu.memory_space<vmem>>, vector<128x512xf32>
    %cst_149 = arith.constant dense<0.000000e+00> : vector<8x512xf32>
    %485 = tpu.matmul %479, %484, %cst_149 {dimension_numbers = #tpu.dot_dimension_numbers<[1], [0], [0], [1], [0, 0, 1, 1], [], []>} : vector<8x128xf32>, vector<128x512xf32>, vector<8x512xf32> -> vector<8x512xf32>
    %486 = arith.addf %483, %485 : vector<8x512xf32>
    %487 = vector.extract_strided_slice %486 {offsets = [0, 0], sizes = [8, 128], strides = [1, 1]} : vector<8x512xf32> to vector<8x128xf32>
    %488 = arith.negf %487 : vector<8x128xf32>
    %489 = math.exp %488 : vector<8x128xf32>
    %cst_150 = arith.constant 1.000000e+00 : f32
    %490 = vector.broadcast %cst_150 : f32 to vector<8x128xf32>
    %491 = arith.addf %490, %489 : vector<8x128xf32>
    %492 = arith.divf %490, %491 : vector<8x128xf32>
    %493 = vector.extract_strided_slice %486 {offsets = [0, 128], sizes = [8, 128], strides = [1, 1]} : vector<8x512xf32> to vector<8x128xf32>
    %494 = arith.negf %493 : vector<8x128xf32>
    %495 = math.exp %494 : vector<8x128xf32>
    %cst_151 = arith.constant 1.000000e+00 : f32
    %496 = vector.broadcast %cst_151 : f32 to vector<8x128xf32>
    %497 = arith.addf %496, %495 : vector<8x128xf32>
    %498 = arith.divf %496, %497 : vector<8x128xf32>
    %499 = vector.extract_strided_slice %486 {offsets = [0, 256], sizes = [8, 128], strides = [1, 1]} : vector<8x512xf32> to vector<8x128xf32>
    %500 = math.tanh %499 : vector<8x128xf32>
    %501 = vector.extract_strided_slice %486 {offsets = [0, 384], sizes = [8, 128], strides = [1, 1]} : vector<8x512xf32> to vector<8x128xf32>
    %502 = arith.negf %501 : vector<8x128xf32>
    %503 = math.exp %502 : vector<8x128xf32>
    %cst_152 = arith.constant 1.000000e+00 : f32
    %504 = vector.broadcast %cst_152 : f32 to vector<8x128xf32>
    %505 = arith.addf %504, %503 : vector<8x128xf32>
    %506 = arith.divf %504, %505 : vector<8x128xf32>
    %507 = arith.mulf %498, %477 : vector<8x128xf32>
    %508 = arith.mulf %492, %500 : vector<8x128xf32>
    %509 = arith.addf %507, %508 : vector<8x128xf32>
    %510 = math.tanh %509 : vector<8x128xf32>
    %511 = arith.mulf %506, %510 : vector<8x128xf32>
    %c7_i32_153 = arith.constant 7 : i32
    %c8_i32_154 = arith.constant 8 : i32
    %512 = arith.muli %c7_i32_153, %c8_i32_154 : i32
    %513 = tpu.assume_multiple %512, 8 : i32
    %514 = arith.index_cast %513 : i32 to index
    %c0_155 = arith.constant 0 : index
    %515 = vector.load %arg11[%514, %c0_155] : memref<64x512xf32, #tpu.memory_space<vmem>>, vector<8x512xf32>
    %c0_156 = arith.constant 0 : index
    %c0_157 = arith.constant 0 : index
    %516 = vector.load %arg6[%c0_156, %c0_157] : memref<128x512xf32, #tpu.memory_space<vmem>>, vector<128x512xf32>
    %cst_158 = arith.constant dense<0.000000e+00> : vector<8x512xf32>
    %517 = tpu.matmul %511, %516, %cst_158 {dimension_numbers = #tpu.dot_dimension_numbers<[1], [0], [0], [1], [0, 0, 1, 1], [], []>} : vector<8x128xf32>, vector<128x512xf32>, vector<8x512xf32> -> vector<8x512xf32>
    %518 = arith.addf %515, %517 : vector<8x512xf32>
    %519 = vector.extract_strided_slice %518 {offsets = [0, 0], sizes = [8, 128], strides = [1, 1]} : vector<8x512xf32> to vector<8x128xf32>
    %520 = arith.negf %519 : vector<8x128xf32>
    %521 = math.exp %520 : vector<8x128xf32>
    %cst_159 = arith.constant 1.000000e+00 : f32
    %522 = vector.broadcast %cst_159 : f32 to vector<8x128xf32>
    %523 = arith.addf %522, %521 : vector<8x128xf32>
    %524 = arith.divf %522, %523 : vector<8x128xf32>
    %525 = vector.extract_strided_slice %518 {offsets = [0, 128], sizes = [8, 128], strides = [1, 1]} : vector<8x512xf32> to vector<8x128xf32>
    %526 = arith.negf %525 : vector<8x128xf32>
    %527 = math.exp %526 : vector<8x128xf32>
    %cst_160 = arith.constant 1.000000e+00 : f32
    %528 = vector.broadcast %cst_160 : f32 to vector<8x128xf32>
    %529 = arith.addf %528, %527 : vector<8x128xf32>
    %530 = arith.divf %528, %529 : vector<8x128xf32>
    %531 = vector.extract_strided_slice %518 {offsets = [0, 256], sizes = [8, 128], strides = [1, 1]} : vector<8x512xf32> to vector<8x128xf32>
    %532 = math.tanh %531 : vector<8x128xf32>
    %533 = vector.extract_strided_slice %518 {offsets = [0, 384], sizes = [8, 128], strides = [1, 1]} : vector<8x512xf32> to vector<8x128xf32>
    %534 = arith.negf %533 : vector<8x128xf32>
    %535 = math.exp %534 : vector<8x128xf32>
    %cst_161 = arith.constant 1.000000e+00 : f32
    %536 = vector.broadcast %cst_161 : f32 to vector<8x128xf32>
    %537 = arith.addf %536, %535 : vector<8x128xf32>
    %538 = arith.divf %536, %537 : vector<8x128xf32>
    %539 = arith.mulf %530, %509 : vector<8x128xf32>
    %540 = arith.mulf %524, %532 : vector<8x128xf32>
    %541 = arith.addf %539, %540 : vector<8x128xf32>
    %542 = math.tanh %541 : vector<8x128xf32>
    %543 = arith.mulf %538, %542 : vector<8x128xf32>
    %c8_i32_162 = arith.constant 8 : i32
    %c0_163 = arith.constant 0 : index
    %c0_164 = arith.constant 0 : index
    %544 = vector.load %arg8[%c0_163, %c0_164] : memref<128x4xf32, #tpu.memory_space<vmem>>, vector<128x4xf32>
    %cst_165 = arith.constant dense<0.000000e+00> : vector<8x4xf32>
    %545 = tpu.matmul %543, %544, %cst_165 {dimension_numbers = #tpu.dot_dimension_numbers<[1], [0], [0], [1], [0, 0, 1, 1], [], []>} : vector<8x128xf32>, vector<128x4xf32>, vector<8x4xf32> -> vector<8x4xf32>
    %c0_166 = arith.constant 0 : index
    %c0_167 = arith.constant 0 : index
    %546 = vector.load %arg9[%c0_166, %c0_167] : memref<1x4xf32, #tpu.memory_space<vmem>>, vector<1x4xf32>
    %547 = vector.broadcast %546 : vector<1x4xf32> to vector<8x4xf32>
    %548 = arith.addf %545, %547 : vector<8x4xf32>
    %549 = vector.extract_strided_slice %548 {offsets = [0, 0], sizes = [2, 4], strides = [1, 1]} : vector<8x4xf32> to vector<2x4xf32>
    %c0_168 = arith.constant 0 : index
    %c0_169 = arith.constant 0 : index
    %550 = vector.load %arg10[%c0_168, %c0_169] : memref<2x4xf32, #tpu.memory_space<vmem>>, vector<2x4xf32>
    tpu.vector_store %arg10[%c0_168, %c0_169], %549 {strides = array<i32>} : memref<2x4xf32, #tpu.memory_space<vmem>>, vector<2x4xf32>,
    return
  }
  func.func @transform_0(%arg0: i32) -> (i32, i32) {
    %c0_i32 = arith.constant 0 : i32
    %c0_i32_0 = arith.constant 0 : i32
    %c0_i32_1 = arith.constant 0 : i32
    return %c0_i32, %c0_i32_0 : i32, i32
  }
  func.func @transform_1(%arg0: i32) -> (i32, i32) {
    %c0_i32 = arith.constant 0 : i32
    %c0_i32_0 = arith.constant 0 : i32
    %c0_i32_1 = arith.constant 0 : i32
    return %c0_i32, %c0_i32_0 : i32, i32
  }
  func.func @transform_2(%arg0: i32) -> (i32, i32) {
    %c0_i32 = arith.constant 0 : i32
    %c0_i32_0 = arith.constant 0 : i32
    %c0_i32_1 = arith.constant 0 : i32
    return %c0_i32, %c0_i32_0 : i32, i32
  }
  func.func @transform_3(%arg0: i32) -> (i32, i32) {
    %c0_i32 = arith.constant 0 : i32
    %c0_i32_0 = arith.constant 0 : i32
    %c0_i32_1 = arith.constant 0 : i32
    return %c0_i32, %c0_i32_0 : i32, i32
  }
  func.func @transform_4(%arg0: i32) -> (i32, i32) {
    %c0_i32 = arith.constant 0 : i32
    %c0_i32_0 = arith.constant 0 : i32
    %c0_i32_1 = arith.constant 0 : i32
    return %c0_i32, %c0_i32_0 : i32, i32
  }
  func.func @transform_5(%arg0: i32) -> (i32, i32) {
    %c0_i32 = arith.constant 0 : i32
    %c0_i32_0 = arith.constant 0 : i32
    %c0_i32_1 = arith.constant 0 : i32
    return %c0_i32, %c0_i32_0 : i32, i32
  }
  func.func @transform_6(%arg0: i32) -> (i32, i32) {
    %c0_i32 = arith.constant 0 : i32
    %c0_i32_0 = arith.constant 0 : i32
    %c0_i32_1 = arith.constant 0 : i32
    return %c0_i32, %c0_i32_0 : i32, i32
  }
  func.func @transform_7(%arg0: i32) -> (i32, i32) {
    %c0_i32 = arith.constant 0 : i32
    %c0_i32_0 = arith.constant 0 : i32
    %c0_i32_1 = arith.constant 0 : i32
    return %c0_i32, %c0_i32_0 : i32, i32
  }
  func.func @transform_8(%arg0: i32) -> (i32, i32) {
    %c0_i32 = arith.constant 0 : i32
    %c0_i32_0 = arith.constant 0 : i32
    %c0_i32_1 = arith.constant 0 : i32
    return %c0_i32, %c0_i32_0 : i32, i32
  }
  func.func @transform_9(%arg0: i32) -> (i32, i32) {
    %c0_i32 = arith.constant 0 : i32
    %c0_i32_0 = arith.constant 0 : i32
    %c0_i32_1 = arith.constant 0 : i32
    return %c0_i32, %c0_i32_0 : i32, i32
  }
}

</mosaic_0001>

<bundles_post_ra>
// kernel: lstm_forward.1
= control target key start
LH: loop header
LB: loop body
LE: loop exit
PB: predicated region body
PF: predicated region fallthrough
CT: control target
= control target key end

     0   :  { %14 = vsyncpa [#allocation5], 0  ;;  %s6583_s0 = inlined_call_operand.vmem [shape: f32[64,16], index: 0, kind: input, shape index: {}]   ;;  %s6584_s1 = inlined_call_operand.vmem [shape: f32[16,512], index: 1, kind: input, shape index: {}]   ;;  %s6585_s2 = inlined_call_operand.hbm [shape: f32[128,512], index: 2, kind: input, shape index: {}]   ;;  %s6586_s3 = inlined_call_operand.vmem [shape: f32[1,512], index: 3, kind: input, shape index: {}]   ;;  %s6587_s4 = inlined_call_operand.hbm [shape: f32[128,512], index: 4, kind: input, shape index: {}]   ;;  %s6588_s5 = inlined_call_operand.hbm [shape: f32[128,512], index: 5, kind: input, shape index: {}]   ;;  %s6589_s6 = inlined_call_operand.vmem [shape: f32[1,512], index: 6, kind: input, shape index: {}]   ;;  %s6590_s7 = inlined_call_operand.vmem [shape: f32[128,4], index: 7, kind: input, shape index: {}]   ;;  %s6591_s8 = inlined_call_operand.vmem [shape: f32[1,4], index: 8, kind: input, shape index: {}]   ;;  %s6592_s9 = inlined_call_operand.hbm [shape: f32[2,4], index: 9, kind: output, shape index: {}]  }
   0x1   :  { %15 = vsyncpa [#allocation8], 0 }
   0x2   :  { %16 = vsyncpa [#allocation6], 0  ;;  %s40_s11 = sshll.u32 %s6587_s4, 4  ;;  %s4219_s12 = smov [#allocation7]   ;;  %s41_s11 = int_to_ptr.hbm [resolvable:$true] %s40_s11 }
   0x3   :  { %s42_s13 = sshll.u32 %s4219_s12, 4  ;;  %s25_s16 = sshll.u32 %s6585_s2, 4  ;;  %s43_s13 = int_to_ptr.vmem [resolvable:$true] %s42_s13  ;;  %s26_s16 = int_to_ptr.hbm [resolvable:$true] %s25_s16 }
   0x4   :  { %s4220_s17 = smov 512   ;;  %s4221_s18 = smov 32  }
   0x5   :  { %48 = dma.hbm_to_vmem [thread:$0]  %s41_s11, 8192, %s43_s13, [#allocation8], %s4220_s17, %s4220_s17, %s4221_s18  }
   0x6   :  { %s4222_s19 = smov [#allocation4]   ;;  %s53_s23 = sshll.u32 %s6588_s5, 4  ;;  %s54_s23 = int_to_ptr.hbm [resolvable:$true] %s53_s23 }
   0x7   :  { %s27_s20 = sshll.u32 %s4222_s19, 4  ;;  %s4223_s4 = smov [#allocation9]   ;;  %s28_s20 = int_to_ptr.vmem [resolvable:$true] %s27_s20 }
   0x8   :  { %33 = dma.hbm_to_vmem [thread:$0]  %s26_s16, 8192, %s28_s20, [#allocation5], %s4220_s17, %s4220_s17, %s4221_s18  }
   0x9   :  { %s55_s24 = sshll.u32 %s4223_s4, 4  ;;  %s56_s24 = int_to_ptr.vmem [resolvable:$true] %s55_s24 }
   0xa   :  { %61 = dma.hbm_to_vmem [thread:$0]  %s54_s23, 8192, %s56_s24, [#allocation8], %s4220_s17, %s4220_s17, %s4221_s18  }
   0xb   :  { %4213 = dma.done.wait [#allocation5], 8192  }
   0xc   :  { %4214 = vsyncadd [#allocation5], 4294959104 }
   0xd   :  { %4215 = dma.done.wait [#allocation8], 16384  }
   0xe   :  { %4216 = vsyncadd [#allocation8], 4294950912  ;;  %v92_v0 = vld [vmem:[%s6584_s1 + $0x20] sm:$0xff]  ;;  %vm106_vm0 = vcmask 130048   ;;  %v4297_v3 = vld [vmem:[%s6583_s0 + $0x28] sm:$0xff]  ;;  %s4225_s15 = smov [#allocation10]  }
   0xf   :  { %v88_v1 = vld [vmem:[%s6584_s1] sm:$0xff]  ;;  %145 = vmatpush.msra.mxu0 %v92_v0  ;;  %3783 = vmatpush.msra.mxu1 %v92_v0  ;;  %v4302_v4 = vld [vmem:[%s6583_s0 + $0x30] sm:$0xff]  ;;  %v4307_v5 = vld [vmem:[%s6583_s0 + $0x38] sm:$0xff]  ;;  %s3683_s16 = sshll.u32 %s4225_s15, 4  ;;  %s3685_s19 = sshll.u32 %s6592_s9, 4  ;;  %s3684_s16 = int_to_ptr.vmem [resolvable:$true] %s3683_s16  ;;  %s3686_s19 = int_to_ptr.hbm [resolvable:$true] %s3685_s19 }
  0x10   :  { %3784 = vmatpush.msra.mxu2 %v92_v0  ;;  %3785 = vmatpush.msra.mxu3 %v92_v0  ;;  %v80_v2 = vld [vmem:[%s6583_s0] sm:$0xff]  ;;  %v93_v6 = vld [vmem:[%s6584_s1 + $0x28] sm:$0xff]  ;;  %v94_v7 = vld [vmem:[%s6584_s1 + $0x30] sm:$0xff] }
  0x11   :  { %146 = vmatpush.msra.mxu0 %v88_v1  ;;  %3786 = vmatpush.msra.mxu1 %v88_v1  ;;  %v95_v8 = vld [vmem:[%s6584_s1 + $0x38] sm:$0xff]  ;;  %v4321_v9 = vld [vmem:[#allocation4 + $0x1e0] sm:$0xff]  ;;  %v89_v10 = vld [vmem:[%s6584_s1 + $0x8] sm:$0xff] }
  0x12   :  { %3787 = vmatpush.msra.mxu2 %v88_v1  ;;  %3788 = vmatpush.msra.mxu3 %v88_v1  ;;  %v90_v11 = vld [vmem:[%s6584_s1 + $0x10] sm:$0xff]  ;;  %v91_v12 = vld [vmem:[%s6584_s1 + $0x18] sm:$0xff]  ;;  %v4336_v13 = vld [vmem:[#allocation4 + $0x1e8] sm:$0xff] }
  0x13   :  { %3703 = vmatmul.msk.f32.vlgmr.msra.gmra.mxu0 %vm106_vm0, %v80_v2  ;;  %3708 = vmatmul.msk.f32.vlgmr.msra.gmra.mxu1 %vm106_vm0, %v4297_v3  ;;  %v4339_v14 = vld [vmem:[#allocation4 + $0x1c0] sm:$0xff]  ;;  %v4341_v15 = vld [vmem:[#allocation4 + $0x1f8] sm:$0xff]  ;;  %v4343_v16 = vld [vmem:[#allocation4 + $0x1c8] sm:$0xff] }
  0x14   :  { %3709 = vmatmul.msk.f32.vlgmr.msra.gmra.mxu2 %vm106_vm0, %v4302_v4  ;;  %3710 = vmatmul.msk.f32.vlgmr.msra.gmra.mxu3 %vm106_vm0, %v4307_v5  ;;  %v4345_v17 = vld [vmem:[#allocation4 + $0x1f0] sm:$0xff]  ;;  %v81_v18 = vld [vmem:[%s6583_s0 + $0x8] sm:$0xff]  ;;  %v4354_v19 = vld [vmem:[#allocation4 + $0x1a0] sm:$0xff] }
  0x15   :  { %186 = vmatpush.msrb.mxu1 %v93_v6  ;;  %227 = vmatpush.msrb.mxu2 %v94_v7  ;;  %v4356_v20 = vld [vmem:[#allocation4 + $0x1a8] sm:$0xff]  ;;  %v4361_v21 = vld [vmem:[#allocation4 + $0x1d8] sm:$0xff]  ;;  %v4363_v22 = vld [vmem:[#allocation4 + $0x1d0] sm:$0xff] }
  0x16   :  { %268 = vmatpush.msrb.mxu3 %v95_v8  ;;  %398 = vmatpush.msrb.mxu0 %v4321_v9  ;;  %v4367_v23 = vld [vmem:[#allocation4 + $0x180] sm:$0xff]  ;;  %v4369_v24 = vld [vmem:[#allocation4 + $0x188] sm:$0xff]  ;;  %v4373_v25 = vld [vmem:[#allocation4 + $0x1b8] sm:$0xff] }
  0x17   :  { %187 = vmatpush.msrb.mxu1 %v89_v10  ;;  %228 = vmatpush.msrb.mxu2 %v90_v11  ;;  %v4375_v26 = vld [vmem:[#allocation4 + $0x1b0] sm:$0xff]  ;;  %v4377_v27 = vld [vmem:[#allocation4 + $0x160] sm:$0xff]  ;;  %v4380_v28 = vld [vmem:[#allocation4 + $0x168] sm:$0xff] }
  0x18   :  { %269 = vmatpush.msrb.mxu3 %v91_v12  ;;  %399 = vmatpush.msrb.mxu0 %v4339_v14  ;;  %v4385_v29 = vld [vmem:[#allocation4 + $0x198] sm:$0xff]  ;;  %v4387_v30 = vld [vmem:[#allocation4 + $0x190] sm:$0xff]  ;;  %v4396_v32 = vld [vmem:[#allocation4 + $0x140] sm:$0xff] }
  0x19   :  { %418 = vmatpush.msra.mxu1 %v4336_v13  ;;  %438 = vmatpush.msra.mxu2 %v4345_v17  ;;  %v82_v31 = vld [vmem:[%s6583_s0 + $0x10] sm:$0xff]  ;;  %v4399_v33 = vld [vmem:[#allocation4 + $0x148] sm:$0xff]  ;;  %v4404_v34 = vld [vmem:[#allocation4 + $0x178] sm:$0xff] }
  0x1a   :  { %458 = vmatpush.msra.mxu3 %v4341_v15  ;;  %400 = vmatpush.msrb.mxu0 %v4354_v19  ;;  %v4406_v35 = vld [vmem:[#allocation4 + $0x170] sm:$0xff]  ;;  %v4410_v36 = vld [vmem:[#allocation4 + $0x120] sm:$0xff]  ;;  %v4412_v37 = vld [vmem:[#allocation4 + $0x128] sm:$0xff] }
  0x1b   :  { %419 = vmatpush.msra.mxu1 %v4343_v16  ;;  %3704 = vmatmul.msk.f32.gmra.mxu0 %vm106_vm0, %v81_v18  ;;  %v4416_v38 = vld [vmem:[#allocation4 + $0x158] sm:$0xff]  ;;  %v4418_v39 = vld [vmem:[#allocation4 + $0x150] sm:$0xff]  ;;  %v4420_v40 = vld [vmem:[#allocation4 + $0x100] sm:$0xff] }
  0x1c   :  { %3711 = vmatmul.msk.f32.vlgmr.msrb.gmra.mxu1 %vm106_vm0, %v80_v2  ;;  %3719 = vmatmul.msk.f32.vlgmr.msrb.gmra.mxu2 %vm106_vm0, %v80_v2  ;;  %v4423_v41 = vld [vmem:[#allocation4 + $0x108] sm:$0xff]  ;;  %v4428_v42 = vld [vmem:[#allocation4 + $0x138] sm:$0xff]  ;;  %v4430_v43 = vld [vmem:[#allocation4 + $0x130] sm:$0xff] }
  0x1d   :  { %3727 = vmatmul.msk.f32.vlgmr.msrb.gmra.mxu3 %vm106_vm0, %v80_v2  ;;  %420 = vmatpush.msra.mxu1 %v4356_v20  ;;  %v83_v44 = vld [vmem:[%s6583_s0 + $0x18] sm:$0xff]  ;;  %v4439_v45 = vld [vmem:[#allocation4 + $0xe0] sm:$0xff]  ;;  %v4442_v46 = vld [vmem:[#allocation4 + $0xe8] sm:$0xff] }
  0x1e   :  { %459 = vmatpush.msra.mxu3 %v4361_v21  ;;  %439 = vmatpush.msra.mxu2 %v4363_v22  ;;  %v4447_v47 = vld [vmem:[#allocation4 + $0x118] sm:$0xff]  ;;  %v4449_v48 = vld [vmem:[#allocation4 + $0x110] sm:$0xff]  ;;  %v4453_v49 = vld [vmem:[#allocation4 + $0xc0] sm:$0xff] }
  0x1f   :  { %401 = vmatpush.msrb.mxu0 %v4367_v23  ;;  %421 = vmatpush.msra.mxu1 %v4369_v24  ;;  %v4455_v50 = vld [vmem:[#allocation4 + $0xc8] sm:$0xff]  ;;  %v4459_v51 = vld [vmem:[#allocation4 + $0xf8] sm:$0xff]  ;;  %v4461_v52 = vld [vmem:[#allocation4 + $0xf0] sm:$0xff] }
  0x20   :  { %460 = vmatpush.msra.mxu3 %v4373_v25  ;;  %440 = vmatpush.msra.mxu2 %v4375_v26  ;;  %v4463_v53 = vld [vmem:[#allocation4 + $0xa0] sm:$0xff]  ;;  %v4466_v54 = vld [vmem:[#allocation4 + $0xa8] sm:$0xff]  ;;  %v4471_v55 = vld [vmem:[#allocation4 + $0xd8] sm:$0xff] }
  0x21   :  { %402 = vmatpush.msrb.mxu0 %v4377_v27  ;;  %422 = vmatpush.msra.mxu1 %v4380_v28  ;;  %v4473_v56 = vld [vmem:[#allocation4 + $0xd0] sm:$0xff]  ;;  %v4475_v57 = vld [vmem:[#allocation4 + $0x80] sm:$0xff]  ;;  %v4490_v60 = vld [vmem:[#allocation4 + $0x88] sm:$0xff] }
  0x22   :  { %461 = vmatpush.msra.mxu3 %v4385_v29  ;;  %441 = vmatpush.msra.mxu2 %v4387_v30  ;;  %v84_v58 = vld [vmem:[%s6583_s0 + $0x20] sm:$0xff]  ;;  %v4492_v61 = vld [vmem:[#allocation4 + $0xb8] sm:$0xff]  ;;  %v4498_v63 = vld [vmem:[#allocation4 + $0xb0] sm:$0xff] }
  0x23   :  { %3705 = vmatmul.msk.f32.gmra.mxu0 %vm106_vm0, %v82_v31  ;;  %423 = vmatpush.msra.mxu1 %v4399_v33  ;;  %v4484_v59 = vld [vmem:[#allocation4 + $0x60] sm:$0xff]  ;;  %v4502_v0 = vld [vmem:[#allocation4 + $0x68] sm:$0xff]  ;;  %v4504_v1 = vld [vmem:[#allocation4 + $0x98] sm:$0xff] }
  0x24   :  { %3712 = vmatmul.msk.f32.gmra.mxu1 %vm106_vm0, %v81_v18  ;;  %3720 = vmatmul.msk.f32.gmra.mxu2 %vm106_vm0, %v81_v18  ;;  %v4496_v62 = vld [vmem:[#allocation4 + $0x40] sm:$0xff]  ;;  %v4510_v6 = vld [vmem:[#allocation4 + $0x90] sm:$0xff]  ;;  %v4513_v7 = vld [vmem:[#allocation4 + $0x48] sm:$0xff] }
  0x25   :  { %3728 = vmatmul.msk.f32.gmra.mxu3 %vm106_vm0, %v81_v18  ;;  %403 = vmatpush.msrb.mxu0 %v4396_v32  ;;  %v4506_v2 = vld [vmem:[#allocation4 + $0x20] sm:$0xff]  ;;  %6789 = vst [vmem:[#allocation15_spill] sm:$0xff] %v4513_v7  ;;  %v4516_v8 = vld [vmem:[#allocation4 + $0x78] sm:$0xff]  ;;  %v4526_v11 = vld [vmem:[#allocation4 + $0x28] sm:$0xff] }
  0x26   :  { %462 = vmatpush.msra.mxu3 %v4404_v34  ;;  %442 = vmatpush.msra.mxu2 %v4406_v35  ;;  %6788 = vst [vmem:[#allocation14_spill] sm:$0xff] %v4506_v2  ;;  %v4518_v10 = vld [vmem:[#allocation4] sm:$0xff]  ;;  %v4530_v12 = vld [vmem:[#allocation4 + $0x70] sm:$0xff]  ;;  %v4532_v18 = vld [vmem:[#allocation4 + $0x58] sm:$0xff] }
  0x27   :  { %404 = vmatpush.msrb.mxu0 %v4410_v36  ;;  %424 = vmatpush.msra.mxu1 %v4412_v37  ;;  %6790 = vst [vmem:[#allocation16_spill] sm:$0xff] %v4516_v8 }
  0x28   :  { %463 = vmatpush.msra.mxu3 %v4416_v38  ;;  %443 = vmatpush.msra.mxu2 %v4418_v39  ;;  %6791 = vst [vmem:[#allocation17_spill] sm:$0xff] %v4518_v10 }
  0x29   :  { %405 = vmatpush.msrb.mxu0 %v4420_v40  ;;  %425 = vmatpush.msra.mxu1 %v4423_v41 }
  0x2a   :  { %464 = vmatpush.msra.mxu3 %v4428_v42  ;;  %444 = vmatpush.msra.mxu2 %v4430_v43 }
  0x2b   :  { %3706 = vmatmul.msk.f32.gmra.mxu0 %vm106_vm0, %v83_v44  ;;  %426 = vmatpush.msra.mxu1 %v4442_v46 }
  0x2c   :  { %3713 = vmatmul.msk.f32.gmra.mxu1 %vm106_vm0, %v82_v31  ;;  %3721 = vmatmul.msk.f32.gmra.mxu2 %vm106_vm0, %v82_v31 }
  0x2d   :  { %3729 = vmatmul.msk.f32.gmra.mxu3 %vm106_vm0, %v82_v31  ;;  %406 = vmatpush.msrb.mxu0 %v4439_v45  ;;  %v6599_v31 = vmov 0.0  }
  0x2e   :  { %465 = vmatpush.msra.mxu3 %v4447_v47  ;;  %445 = vmatpush.msra.mxu2 %v4449_v48 }
  0x2f   :  { %407 = vmatpush.msrb.mxu0 %v4453_v49  ;;  %427 = vmatpush.msra.mxu1 %v4455_v50 }
  0x30   :  { %466 = vmatpush.msra.mxu3 %v4459_v51  ;;  %446 = vmatpush.msra.mxu2 %v4461_v52 }
  0x31   :  { %408 = vmatpush.msrb.mxu0 %v4463_v53  ;;  %428 = vmatpush.msra.mxu1 %v4466_v54 }
  0x32   :  { %467 = vmatpush.msra.mxu3 %v4471_v55  ;;  %447 = vmatpush.msra.mxu2 %v4473_v56 }
  0x33   :  { %409 = vmatpush.msrb.mxu0 %v4475_v57  ;;  %429 = vmatpush.msra.mxu1 %v4490_v60 }
  0x34   :  { %3714 = vmatmul.msk.f32.gmra.mxu1 %vm106_vm0, %v83_v44  ;;  %3707 = vmatmul.msk.f32.gmra.mxu0 %vm106_vm0, %v84_v58 }
  0x35   :  { %3722 = vmatmul.msk.f32.gmra.mxu2 %vm106_vm0, %v83_v44  ;;  %3730 = vmatmul.msk.f32.gmra.mxu3 %vm106_vm0, %v83_v44  ;;  %v4536_v44 = vld [vmem:[#allocation4 + $0x8] sm:$0xff] }
  0x36   :  { %410 = vmatpush.msrb.mxu0 %v4484_v59  ;;  %468 = vmatpush.msra.mxu3 %v4492_v61 }
  0x37   :  { %448 = vmatpush.msra.mxu2 %v4498_v63  ;;  %430 = vmatpush.msra.mxu1 %v4502_v0 }
  0x38   :  { %411 = vmatpush.msrb.mxu0 %v4496_v62  ;;  %469 = vmatpush.msra.mxu3 %v4504_v1 }
  0x39   :  { %449 = vmatpush.msra.mxu2 %v4510_v6  ;;  %431 = vmatpush.msra.mxu1 %v4513_v7  ;;  %v4547_v7 = vld [vmem:[#allocation4 + $0x30] sm:$0xff] }
  0x3a   :  { %412 = vmatpush.msrb.mxu0 %v4506_v2  ;;  %470 = vmatpush.msra.mxu3 %v4516_v8  ;;  %v4540_v2 = vld [vmem:[#allocation4 + $0x50] sm:$0xff]  ;;  %v4549_v8 = vld [vmem:[#allocation4 + $0x18] sm:$0xff] }
  0x3b   :  { %432 = vmatpush.msra.mxu1 %v4526_v11  ;;  %450 = vmatpush.msra.mxu2 %v4530_v12 }
  0x3c   :  { %413 = vmatpush.msrb.mxu0 %v4518_v10  ;;  %3715 = vmatmul.msk.f32.gmra.mxu1 %vm106_vm0, %v84_v58  ;;  %v4542_v10 = vld [vmem:[#allocation4 + $0x38] sm:$0xff] }
  0x3d   :  { %3723 = vmatmul.msk.f32.gmra.mxu2 %vm106_vm0, %v84_v58  ;;  %414 = vmatmul.f32.vlgmr.msrb.gmra.mxu0 %v6599_v31 }
  0x3e   :  { %3731 = vmatmul.msk.f32.gmra.mxu3 %vm106_vm0, %v84_v58  ;;  %433 = vmatpush.msra.mxu1 %v4536_v44  ;;  %v4557_v58 = vld [vmem:[#allocation4 + $0x10] sm:$0xff] }
  0x3f   :  { %471 = vmatpush.msra.mxu3 %v4532_v18  ;;  %617 = vmatpush.msra.mxu0 %v4321_v9 }
  0x40   :  { %451 = vmatpush.msra.mxu2 %v4540_v2  ;;  %637 = vmatpush.msrb.mxu1 %v4336_v13 }
  0x41   :  { %472 = vmatpush.msra.mxu3 %v4542_v10  ;;  %618 = vmatpush.msra.mxu0 %v4339_v14 }
  0x42   :  { %452 = vmatpush.msra.mxu2 %v4547_v7  ;;  %638 = vmatpush.msrb.mxu1 %v4343_v16 }
  0x43   :  { %473 = vmatpush.msra.mxu3 %v4549_v8  ;;  %619 = vmatpush.msra.mxu0 %v4354_v19 }
  0x44   :  { %3716 = vmatmul.msk.f32.gmra.mxu1 %vm106_vm0, %v4297_v3  ;;  %453 = vmatpush.msra.mxu2 %v4557_v58 }
  0x45   :  { %677 = vmatpush.msrb.mxu3 %v4341_v15  ;;  %3724 = vmatmul.msk.f32.gmra.mxu2 %vm106_vm0, %v4297_v3 }
  0x46   :  { %3732 = vmatmul.msk.f32.gmra.mxu3 %vm106_vm0, %v4297_v3  ;;  %657 = vmatpush.msrb.mxu2 %v4345_v17  ;;  %v6792_v3 = vld [vmem:[#allocation16_spill] sm:$0xff] }
  0x47   :  { %678 = vmatpush.msrb.mxu3 %v4361_v21  ;;  %639 = vmatpush.msrb.mxu1 %v4356_v20 }
  0x48   :  { %658 = vmatpush.msrb.mxu2 %v4363_v22  ;;  %620 = vmatpush.msra.mxu0 %v4367_v23 }
  0x49   :  { %679 = vmatpush.msrb.mxu3 %v4373_v25  ;;  %640 = vmatpush.msrb.mxu1 %v4369_v24 }
  0x4a   :  { %659 = vmatpush.msrb.mxu2 %v4375_v26  ;;  %621 = vmatpush.msra.mxu0 %v4377_v27 }
  0x4b   :  { %680 = vmatpush.msrb.mxu3 %v4385_v29  ;;  %641 = vmatpush.msrb.mxu1 %v4380_v28 }
  0x4c   :  { %3717 = vmatmul.msk.f32.gmra.mxu1 %vm106_vm0, %v4302_v4  ;;  %660 = vmatpush.msrb.mxu2 %v4387_v30 }
  0x4d   :  { %3725 = vmatmul.msk.f32.gmra.mxu2 %vm106_vm0, %v4302_v4  ;;  %681 = vmatpush.msrb.mxu3 %v4404_v34 }
  0x4e   :  { %3733 = vmatmul.msk.f32.gmra.mxu3 %vm106_vm0, %v4302_v4  ;;  %622 = vmatpush.msra.mxu0 %v4396_v32  ;;  %v6793_v4 = vld [vmem:[#allocation15_spill] sm:$0xff] }
  0x4f   :  { %661 = vmatpush.msrb.mxu2 %v4406_v35  ;;  %642 = vmatpush.msrb.mxu1 %v4399_v33 }
  0x50   :  { %682 = vmatpush.msrb.mxu3 %v4416_v38  ;;  %623 = vmatpush.msra.mxu0 %v4410_v36 }
  0x51   :  { %662 = vmatpush.msrb.mxu2 %v4418_v39  ;;  %643 = vmatpush.msrb.mxu1 %v4412_v37 }
  0x52   :  { %683 = vmatpush.msrb.mxu3 %v4428_v42  ;;  %624 = vmatpush.msra.mxu0 %v4420_v40  ;;  %v6795_v40 = vld [vmem:[#allocation17_spill] sm:$0xff] }
  0x53   :  { %663 = vmatpush.msrb.mxu2 %v4430_v43  ;;  %644 = vmatpush.msrb.mxu1 %v4423_v41 }
  0x54   :  { %3718 = vmatmul.msk.f32.gmra.mxu1 %vm106_vm0, %v4307_v5  ;;  %684 = vmatpush.msrb.mxu3 %v4447_v47 }
  0x55   :  { %3726 = vmatmul.msk.f32.gmra.mxu2 %vm106_vm0, %v4307_v5  ;;  %625 = vmatpush.msra.mxu0 %v4439_v45 }
  0x56   :  { %3734 = vmatmul.msk.f32.gmra.mxu3 %vm106_vm0, %v4307_v5  ;;  %664 = vmatpush.msrb.mxu2 %v4449_v48  ;;  %v6794_v5 = vld [vmem:[#allocation14_spill] sm:$0xff] }
  0x57   :  { %645 = vmatpush.msrb.mxu1 %v4442_v46  ;;  %685 = vmatpush.msrb.mxu3 %v4459_v51 }
  0x58   :  { %665 = vmatpush.msrb.mxu2 %v4461_v52  ;;  %626 = vmatpush.msra.mxu0 %v4453_v49 }
  0x59   :  { %646 = vmatpush.msrb.mxu1 %v4455_v50  ;;  %686 = vmatpush.msrb.mxu3 %v4471_v55 }
  0x5a   :  { %666 = vmatpush.msrb.mxu2 %v4473_v56  ;;  %627 = vmatpush.msra.mxu0 %v4463_v53 }
  0x5b   :  { %647 = vmatpush.msrb.mxu1 %v4466_v54  ;;  %687 = vmatpush.msrb.mxu3 %v4492_v61 }
  0x5c   :  { %434 = vmatmul.f32.vlgmr.msra.gmra.mxu1 %v6599_v31  ;;  %667 = vmatpush.msrb.mxu2 %v4498_v63 }
  0x5d   :  { %454 = vmatmul.f32.vlgmr.msra.gmra.mxu2 %v6599_v31  ;;  %628 = vmatpush.msra.mxu0 %v4475_v57 }
  0x5e   :  { %474 = vmatmul.f32.vlgmr.msra.gmra.mxu3 %v6599_v31  ;;  %648 = vmatpush.msrb.mxu1 %v4490_v60  ;;  %v4893_v31 = vld [vmem:[#allocation4 + $0x120] sm:$0xff] }
  0x5f   :  { %668 = vmatpush.msrb.mxu2 %v4510_v6  ;;  %629 = vmatpush.msra.mxu0 %v4484_v59 }
  0x60   :  { %688 = vmatpush.msrb.mxu3 %v4504_v1  ;;  %649 = vmatpush.msrb.mxu1 %v4502_v0 }
  0x61   :  { %669 = vmatpush.msrb.mxu2 %v4530_v12  ;;  %630 = vmatpush.msra.mxu0 %v4496_v62 }
  0x62   :  { %689 = vmatpush.msrb.mxu3 %v6792_v3  ;;  %650 = vmatpush.msrb.mxu1 %v6793_v4 }
  0x63   :  { %670 = vmatpush.msrb.mxu2 %v4540_v2  ;;  %631 = vmatpush.msra.mxu0 %v6794_v5 }
  0x64   :  { %690 = vmatpush.msrb.mxu3 %v4532_v18  ;;  %651 = vmatpush.msrb.mxu1 %v4526_v11 }
  0x65   :  { %671 = vmatpush.msrb.mxu2 %v4547_v7  ;;  %632 = vmatpush.msra.mxu0 %v6795_v40 }
  0x66   :  { %691 = vmatpush.msrb.mxu3 %v4542_v10  ;;  %652 = vmatpush.msrb.mxu1 %v4536_v44 }
  0x67   :  { %672 = vmatpush.msrb.mxu2 %v4557_v58  ;;  %837 = vmatpush.msrb.mxu0 %v4321_v9 }
  0x68   :  { %692 = vmatpush.msrb.mxu3 %v4549_v8  ;;  %857 = vmatpush.msra.mxu1 %v4336_v13 }
  0x69   :  { %877 = vmatpush.msra.mxu2 %v4345_v17  ;;  %838 = vmatpush.msrb.mxu0 %v4339_v14 }
  0x6a   :  { %897 = vmatpush.msra.mxu3 %v4341_v15  ;;  %858 = vmatpush.msra.mxu1 %v4343_v16 }
  0x6b   :  { %878 = vmatpush.msra.mxu2 %v4363_v22  ;;  %839 = vmatpush.msrb.mxu0 %v4354_v19 }
  0x6c   :  { %898 = vmatpush.msra.mxu3 %v4361_v21  ;;  %859 = vmatpush.msra.mxu1 %v4356_v20 }
  0x6d   :  { %879 = vmatpush.msra.mxu2 %v4375_v26  ;;  %840 = vmatpush.msrb.mxu0 %v4367_v23 }
  0x6e   :  { %899 = vmatpush.msra.mxu3 %v4373_v25  ;;  %860 = vmatpush.msra.mxu1 %v4369_v24 }
  0x6f   :  { %880 = vmatpush.msra.mxu2 %v4387_v30  ;;  %841 = vmatpush.msrb.mxu0 %v4377_v27 }
  0x70   :  { %900 = vmatpush.msra.mxu3 %v4385_v29  ;;  %861 = vmatpush.msra.mxu1 %v4380_v28 }
  0x71   :  { %881 = vmatpush.msra.mxu2 %v4406_v35  ;;  %842 = vmatpush.msrb.mxu0 %v4396_v32  ;;  %v96_v35 = vld [vmem:[%s6586_s3] sm:$0xf] }
  0x72   :  { %901 = vmatpush.msra.mxu3 %v4404_v34  ;;  %862 = vmatpush.msra.mxu1 %v4399_v33 }
  0x73   :  { %882 = vmatpush.msra.mxu2 %v4418_v39  ;;  %843 = vmatpush.msrb.mxu0 %v4410_v36  ;;  %v4741_v39 = vperm.slane %v96_v35, 0 }
  0x74   :  { %902 = vmatpush.msra.mxu3 %v4416_v38  ;;  %863 = vmatpush.msra.mxu1 %v4412_v37 }
  0x75   :  { %883 = vmatpush.msra.mxu2 %v4430_v43  ;;  %6808 = vst [vmem:[#allocation26_spill] sm:$0xff] %v4741_v39 }
  0x76   :  { %903 = vmatpush.msra.mxu3 %v4428_v42  ;;  %864 = vmatpush.msra.mxu1 %v4423_v41 }
  0x77   :  { %884 = vmatpush.msra.mxu2 %v4449_v48 }
  0x78   :  { %904 = vmatpush.msra.mxu3 %v4447_v47  ;;  %865 = vmatpush.msra.mxu1 %v4442_v46 }
  0x79   :  { %885 = vmatpush.msra.mxu2 %v4461_v52 }
  0x7a   :  { %905 = vmatpush.msra.mxu3 %v4459_v51  ;;  %866 = vmatpush.msra.mxu1 %v4455_v50 }
  0x7b   :  { %886 = vmatpush.msra.mxu2 %v4473_v56 }
  0x7c   :  { %906 = vmatpush.msra.mxu3 %v4471_v55  ;;  %867 = vmatpush.msra.mxu1 %v4466_v54  ;;  %v4756_v54 = vperm.slane %v96_v35, 1 }
  0x7d   :  { %887 = vmatpush.msra.mxu2 %v4498_v63 }
  0x7e   :  { %907 = vmatpush.msra.mxu3 %v4492_v61  ;;  %868 = vmatpush.msra.mxu1 %v4490_v60  ;;  %6815 = vst [vmem:[#allocation33_spill] sm:$0xff] %v4756_v54  ;;  %v4761_v61 = vperm.slane %v96_v35, 3 }
  0x7f   :  { %888 = vmatpush.msra.mxu2 %v4510_v6 }
  0x80   :  { %908 = vmatpush.msra.mxu3 %v4504_v1  ;;  %869 = vmatpush.msra.mxu1 %v4502_v0  ;;  %6817 = vst [vmem:[#allocation35_spill] sm:$0xff] %v4761_v61 }
  0x81   :  { %889 = vmatpush.msra.mxu2 %v4530_v12 }
  0x82   :  { %909 = vmatpush.msra.mxu3 %v6792_v3  ;;  %870 = vmatpush.msra.mxu1 %v6793_v4 }
  0x83   :  { %890 = vmatpush.msra.mxu2 %v4540_v2 }
  0x84   :  { %910 = vmatpush.msra.mxu3 %v4532_v18  ;;  %871 = vmatpush.msra.mxu1 %v4526_v11 }
  0x85   :  { %891 = vmatpush.msra.mxu2 %v4547_v7 }
  0x86   :  { %911 = vmatpush.msra.mxu3 %v4542_v10  ;;  %872 = vmatpush.msra.mxu1 %v4536_v44 }
  0x87   :  { %892 = vmatpush.msra.mxu2 %v4557_v58 }
  0x88   :  { %912 = vmatpush.msra.mxu3 %v4549_v8  ;;  %v4766_v8 = vperm.slane %v96_v35, 2 }
  0x8a   :  { %6819 = vst [vmem:[#allocation37_spill] sm:$0xff] %v4766_v8 }
  0x90   :  { %v148_v9 = vpop.f32.mrf.mxu0  ;;  %v4698_v13 = vpop.f32.mrf.mxu1 }
  0x91   :  { %6796 = vst [vmem:[#allocation16_spill] sm:$0xff] %v4698_v13  ;;  %v149_v42 = vadd.f32 %v148_v9, %v4741_v39 }
  0x97   :  { %v4700_v14 = vpop.f32.mrf.mxu2  ;;  %v4702_v15 = vpop.f32.mrf.mxu3 }
  0x98   :  { %6797 = vst [vmem:[#allocation15_spill] sm:$0xff] %v4700_v14  ;;  %v4704_v17 = vpop.f32.mrf.mxu0 }
  0x99   :  { %6798 = vst [vmem:[#allocation14_spill] sm:$0xff] %v4702_v15  ;;  %v189_v16 = vpop.f32.mrf.mxu1  ;;  %v4905_v15 = vld [vmem:[#allocation4 + $0x108] sm:$0xff] }
  0x9a   :  { %v190_v56 = vadd.f32 %v189_v16, %v4756_v54 }
  0x9f   :  { %v230_v19 = vpop.f32.mrf.mxu2 }
  0xa0   :  { %v271_v20 = vpop.f32.mrf.mxu3  ;;  %v4708_v22 = vpop.f32.mrf.mxu0  ;;  %v231_v44 = vadd.f32 %v230_v19, %v4766_v8 }
  0xa1   :  { %v4706_v21 = vpop.f32.mrf.mxu1  ;;  %v272_v0 = vadd.f32 %v271_v20, %v4761_v61  ;;  %v155_v14 = vadd.f32 %v4708_v22, %v4741_v39  ;;  %v4935_v22 = vld [vmem:[#allocation4 + $0xd8] sm:$0xff] }
  0xa7   :  { %v4710_v23 = vpop.f32.mrf.mxu2 }
  0xa8   :  { %v4712_v24 = vpop.f32.mrf.mxu3  ;;  %v4716_v26 = vpop.f32.mrf.mxu0 }
  0xa9   :  { %v4714_v25 = vpop.f32.mrf.mxu1  ;;  %6799 = vst [vmem:[#allocation17_spill] sm:$0xff] %v4716_v26  ;;  %v4967_v26 = vld [vmem:[#allocation4 + $0x78] sm:$0xff] }
  0xaa   :  { %6838 = vst [vmem:[#allocation56_spill] sm:$0xff] %v4967_v26 }
  0xaf   :  { %v4718_v27 = vpop.f32.mrf.mxu2 }
  0xb0   :  { %v4720_v28 = vpop.f32.mrf.mxu3 }
  0xb1   :  { %v4722_v29 = vpop.f32.mrf.mxu1  ;;  %v4724_v30 = vpop.f32.mrf.mxu0 }
  0xb2   :  { %6800 = vst [vmem:[#allocation18_spill] sm:$0xff] %v4722_v29 }
  0xb3   :  { %6801 = vst [vmem:[#allocation19_spill] sm:$0xff] %v4724_v30  ;;  %v4941_v30 = vld [vmem:[#allocation4 + $0xa8] sm:$0xff] }
  0xb8   :  { %v4726_v32 = vpop.f32.mrf.mxu2  ;;  %v4728_v33 = vpop.f32.mrf.mxu3 }
  0xb9   :  { %6802 = vst [vmem:[#allocation20_spill] sm:$0xff] %v4726_v32  ;;  %v4730_v34 = vpop.f32.mrf.mxu1  ;;  %v4943_v32 = vld [vmem:[#allocation4 + $0xb0] sm:$0xff] }
  0xba   :  { %6803 = vst [vmem:[#allocation21_spill] sm:$0xff] %v4728_v33  ;;  %v415_v41 = vpop.f32.mrf.mxu0  ;;  %v4945_v33 = vld [vmem:[#allocation4 + $0xb8] sm:$0xff] }
  0xbb   :  { %6804 = vst [vmem:[#allocation22_spill] sm:$0xff] %v4730_v34  ;;  %v478_v43 = vadd.f32 %v415_v41, %v149_v42 }
  0xbd   :  { %v3735_v49 = vmul.f32 -1.442695, %v478_v43 }
  0xbf   :  { %3797 = vpow2.f32 %v3735_v49 }
  0xc0   :  { %v4735_v36 = vpop.f32.mrf.mxu2 }
  0xc1   :  { %6805 = vst [vmem:[#allocation23_spill] sm:$0xff] %v4735_v36  ;;  %v4737_v37 = vpop.f32.mrf.mxu3  ;;  %v4739_v38 = vpop.f32.mrf.mxu1  ;;  %v4931_v36 = vld [vmem:[#allocation4 + $0xc8] sm:$0xff] }
  0xc2   :  { %6806 = vst [vmem:[#allocation24_spill] sm:$0xff] %v4737_v37  ;;  %v4933_v37 = vld [vmem:[#allocation4 + $0xd0] sm:$0xff] }
  0xc3   :  { %6807 = vst [vmem:[#allocation25_spill] sm:$0xff] %v4739_v38 }
  0xc5   :  { %v3798_v53 = vpop.eup %3797 }
  0xc6   :  { %v485_v55 = vadd.f32 1.0, %v3798_v53 }
  0xc8   :  { %v4744_v46 = vpop.f32.mrf.mxu2  ;;  %3799 = vrcp.f32 %v485_v55  ;;  %vm491_vm2 = vweird.f32 %v485_v55  ;;  %v497_v42 = vand.u32 2147483648, %v485_v55  ;;  %v495_v49 = vand.u32 2147483647, %v485_v55 }
  0xc9   :  { %6809 = vst [vmem:[#allocation27_spill] sm:$0xff] %v4744_v46  ;;  %v4746_v47 = vpop.f32.mrf.mxu3  ;;  %v4748_v48 = vpop.f32.mrf.mxu1  ;;  %v196_v46 = vadd.f32 %v4714_v25, %v4756_v54 }
  0xca   :  { %6810 = vst [vmem:[#allocation28_spill] sm:$0xff] %v4746_v47  ;;  %vm496_vm7 = vcmp.eq.f32.partialorder %v495_v49, 8.507059e+37  ;;  %v4786_v49 = vld [vmem:[#allocation4 + $0xc0] sm:$0xff]  ;;  %v4927_v47 = vld [vmem:[#allocation4 + $0xf8] sm:$0xff] }
  0xcb   :  { %6811 = vst [vmem:[#allocation29_spill] sm:$0xff] %v4748_v48  ;;  %v4919_v48 = vld [vmem:[#allocation4 + $0xf0] sm:$0xff] }
  0xce   :  { %v3800_v1 = vpop.eup %3799 }
  0xcf   :  { %v487_v10 = vmul.f32 %v3800_v1, %v485_v55  ;;  %vm492_vm1 = vweird.f32 %v3800_v1 }
  0xd0   :  { %v4754_v52 = vpop.f32.mrf.mxu2  ;;  %vm493_vm4 = vmor %vm491_vm2, %vm492_vm1 }
  0xd1   :  { %v4750_v50 = vpop.f32.mrf.mxu3  ;;  %v4752_v51 = vpop.f32.mrf.mxu1  ;;  %6814 = vst [vmem:[#allocation32_spill] sm:$0xff] %v4754_v52  ;;  %v488_v58 = vsub.f32 1.0, %v487_v10  ;;  %v4915_v52 = vld [vmem:[#allocation4 + $0xe0] sm:$0xff] }
  0xd2   :  { %6812 = vst [vmem:[#allocation30_spill] sm:$0xff] %v4750_v50  ;;  %v4917_v50 = vld [vmem:[#allocation4 + $0xe8] sm:$0xff] }
  0xd3   :  { %6813 = vst [vmem:[#allocation31_spill] sm:$0xff] %v4752_v51  ;;  %v489_v5 = vmul.f32 %v3800_v1, %v488_v58  ;;  %v4901_v51 = vld [vmem:[#allocation4 + $0x138] sm:$0xff] }
  0xd4   :  { %6834 = vst [vmem:[#allocation52_spill] sm:$0xff] %v4901_v51 }
  0xd5   :  { %v490_v35 = vadd.f32 %v3800_v1, %v489_v5 }
  0xd8   :  { %v4763_v63 = vpop.f32.mrf.mxu2 }
  0xd9   :  { %v4759_v57 = vpop.f32.mrf.mxu3  ;;  %v435_v59 = vpop.f32.mrf.mxu1  ;;  %6818 = vst [vmem:[#allocation36_spill] sm:$0xff] %v4763_v63  ;;  %v4895_v63 = vld [vmem:[#allocation4 + $0x128] sm:$0xff] }
  0xda   :  { %6816 = vst [vmem:[#allocation34_spill] sm:$0xff] %v4759_v57  ;;  %v479_v60 = vadd.f32 %v435_v59, %v190_v56  ;;  %v494_v56 = vsel %vm493_vm4, %v3800_v1, %v490_v35  ;;  %v4778_v35 = vld [vmem:[#allocation4 + $0x100] sm:$0xff]  ;;  %v4897_v57 = vld [vmem:[#allocation4 + $0x130] sm:$0xff] }
  0xdb   :  { %844 = vmatpush.msrb.mxu0 %v4778_v35  ;;  %6832 = vst [vmem:[#allocation50_spill] sm:$0xff] %v4895_v63 }
  0xdc   :  { %v3736_v62 = vmul.f32 -1.442695, %v479_v60  ;;  %6833 = vst [vmem:[#allocation51_spill] sm:$0xff] %v4897_v57 }
  0xdd   :  { %845 = vmatpush.msrb.mxu0 %v4439_v45  ;;  %v275_v45 = vadd.f32 %v4712_v24, %v4761_v61 }
  0xde   :  { %3801 = vpow2.f32 %v3736_v62 }
  0xdf   :  { %846 = vmatpush.msrb.mxu0 %v4786_v49 }
  0xe0   :  { %v455_v18 = vpop.f32.mrf.mxu2 }
  0xe1   :  { %v475_v2 = vpop.f32.mrf.mxu3  ;;  %v480_v3 = vadd.f32 %v455_v18, %v231_v44 }
  0xe2   :  { %v481_v6 = vadd.f32 %v475_v2, %v272_v0  ;;  %v498_v0 = vor.u32 1.1754944e-38, %v497_v42 }
  0xe4   :  { %v3802_v7 = vpop.eup %3801  ;;  %v3737_v11 = vmul.f32 -1.442695, %v481_v6 }
  0xe5   :  { %v504_v12 = vadd.f32 1.0, %v3802_v7  ;;  %v499_v7 = vsel %vm496_vm7, %v498_v0, %v494_v56  ;;  %v4789_v56 = vld [vmem:[#allocation4 + $0xa0] sm:$0xff] }
  0xe6   :  { %3803 = vpow2.f32 %v3737_v11  ;;  %847 = vmatpush.msrb.mxu0 %v4789_v56 }
  0xe7   :  { %3805 = vrcp.f32 %v504_v12  ;;  %v516_v41 = vand.u32 2147483648, %v504_v12  ;;  %v514_v53 = vand.u32 2147483647, %v504_v12  ;;  %vm510_vm5 = vweird.f32 %v504_v12 }
  0xe8   :  { %3807 = vtanh.f32 %v480_v3 }
  0xe9   :  { %v517_v62 = vor.u32 1.1754944e-38, %v516_v41  ;;  %vm515_vm8 = vcmp.eq.f32.partialorder %v514_v53, 8.507059e+37  ;;  %v193_v41 = vadd.f32 %v4706_v21, %v4756_v54  ;;  %v4797_v21 = vld [vmem:[#allocation4 + $0x60] sm:$0xff] }
  0xec   :  { %v3804_v4 = vpop.eup %3803 }
  0xed   :  { %v3806_v40 = vpop.eup %3805  ;;  %v524_v9 = vadd.f32 1.0, %v3804_v4 }
  0xee   :  { %v506_v16 = vmul.f32 %v3806_v40, %v504_v12  ;;  %vm511_vm3 = vweird.f32 %v3806_v40  ;;  %v3808_v19 = vpop.eup %3807 }
  0xef   :  { %3809 = vrcp.f32 %v524_v9  ;;  %vm512_vm6 = vmor %vm510_vm5, %vm511_vm3  ;;  %v541_v18 = vmul.f32 %v3808_v19, %v499_v7  ;;  %v536_v12 = vand.u32 2147483648, %v524_v9  ;;  %vm530_vm10 = vweird.f32 %v524_v9  ;;  %v4803_v7 = vld [vmem:[#allocation4 + $0x20] sm:$0xff] }
  0xf0   :  { %v507_v20 = vsub.f32 1.0, %v506_v16  ;;  %v534_v3 = vand.u32 2147483647, %v524_v9 }
  0xf1   :  { %v537_v5 = vor.u32 1.1754944e-38, %v536_v12  ;;  %v234_v12 = vadd.f32 %v4710_v23, %v4766_v8 }
  0xf2   :  { %v508_v43 = vmul.f32 %v3806_v40, %v507_v20  ;;  %vm535_vm12 = vcmp.eq.f32.partialorder %v534_v3, 8.507059e+37 }
  0xf4   :  { %v509_v59 = vadd.f32 %v3806_v40, %v508_v43 }
  0xf5   :  { %v3810_v60 = vpop.eup %3809 }
  0xf6   :  { %v513_v2 = vsel %vm512_vm6, %v3806_v40, %v509_v59  ;;  %v526_v6 = vmul.f32 %v3810_v60, %v524_v9  ;;  %vm531_vm9 = vweird.f32 %v3810_v60  ;;  %v152_v9 = vadd.f32 %v4704_v17, %v4741_v39  ;;  %v4792_v17 = vld [vmem:[#allocation4 + $0x80] sm:$0xff] }
  0xf7   :  { %v518_v10 = vsel %vm515_vm8, %v517_v62, %v513_v2  ;;  %vm532_vm11 = vmor %vm530_vm10, %vm531_vm9  ;;  %848 = vmatpush.msrb.mxu0 %v4792_v17  ;;  %v4800_v2 = vld [vmem:[#allocation4 + $0x40] sm:$0xff] }
  0xf8   :  { %v540_v11 = vmul.f32 0.0, %v518_v10  ;;  %v527_v55 = vsub.f32 1.0, %v526_v6  ;;  %6821 = vst [vmem:[#allocation39_spill] sm:$0xff] %v4800_v2 }
  0xf9   :  { %849 = vmatpush.msrb.mxu0 %v4797_v21 }
  0xfa   :  { %v4769_v44 = vadd.f32 %v541_v18, %v540_v11  ;;  %v528_v58 = vmul.f32 %v3810_v60, %v527_v55  ;;  %v4806_v11 = vld [vmem:[#allocation4] sm:$0xff] }
  0xfb   :  { %850 = vmatpush.msrb.mxu0 %v4800_v2 }
  0xfc   :  { %3811 = vtanh.f32 %v4769_v44  ;;  %v529_v1 = vadd.f32 %v3810_v60, %v528_v58 }
  0xfd   :  { %851 = vmatpush.msrb.mxu0 %v4803_v7 }
  0xfe   :  { %v533_v4 = vsel %vm532_vm11, %v3810_v60, %v529_v1 }
  0xff   :  { %v538_v16 = vsel %vm535_vm12, %v537_v5, %v533_v4  ;;  %852 = vmatpush.msrb.mxu0 %v4806_v11 }
 0x102   :  { %v3812_v40 = vpop.eup %3811 }
 0x103   :  { %v4772_v20 = vmul.f32 %v3812_v40, %v538_v16 }
 0x105   :  { %6820 = vst [vmem:[#allocation38_spill] sm:$0xff] %v4772_v20  ;;  %633 = vmatmul.f32.vlgmr.msra.gmra.mxu0 %v4772_v20  ;;  %653 = vmatmul.f32.vlgmr.msrb.gmra.mxu1 %v4772_v20 }
 0x106   :  { %673 = vmatmul.f32.vlgmr.msrb.gmra.mxu2 %v4772_v20  ;;  %693 = vmatmul.f32.vlgmr.msrb.gmra.mxu3 %v4772_v20  ;;  %v4909_v20 = vld [vmem:[#allocation4 + $0x118] sm:$0xff] }
 0x182   :  { %v634_v42 = vpop.f32.mrf.mxu0  ;;  %v654_v43 = vpop.f32.mrf.mxu1 }
 0x183   :  { %v697_v53 = vadd.f32 %v634_v42, %v152_v9  ;;  %v698_v19 = vadd.f32 %v654_v43, %v193_v41 }
 0x185   :  { %v3738_v59 = vmul.f32 -1.442695, %v697_v53  ;;  %v3739_v60 = vmul.f32 -1.442695, %v698_v19 }
 0x187   :  { %3813 = vpow2.f32 %v3738_v59 }
 0x188   :  { %3815 = vpow2.f32 %v3739_v60 }
 0x189   :  { %v694_v62 = vpop.f32.mrf.mxu3  ;;  %v674_v58 = vpop.f32.mrf.mxu2 }
 0x18a   :  { %v700_v0 = vadd.f32 %v694_v62, %v275_v45  ;;  %v699_v5 = vadd.f32 %v674_v58, %v234_v12 }
 0x18c   :  { %v3740_v6 = vmul.f32 -1.442695, %v700_v0 }
 0x18d   :  { %v3814_v10 = vpop.eup %3813 }
 0x18e   :  { %v3816_v24 = vpop.eup %3815  ;;  %v704_v18 = vadd.f32 1.0, %v3814_v10  ;;  %3817 = vpow2.f32 %v3740_v6 }
 0x18f   :  { %v723_v55 = vadd.f32 1.0, %v3816_v24 }
 0x190   :  { %3819 = vrcp.f32 %v704_v18  ;;  %v716_v43 = vand.u32 2147483648, %v704_v18  ;;  %v714_v59 = vand.u32 2147483647, %v704_v18  ;;  %vm710_vm15 = vweird.f32 %v704_v18 }
 0x191   :  { %3821 = vrcp.f32 %v723_v55  ;;  %v735_v53 = vand.u32 2147483648, %v723_v55  ;;  %v733_v45 = vand.u32 2147483647, %v723_v55  ;;  %vm729_vm0 = vweird.f32 %v723_v55 }
 0x192   :  { %v717_v0 = vor.u32 1.1754944e-38, %v716_v43  ;;  %vm715_vm3 = vcmp.eq.f32.partialorder %v714_v59, 8.507059e+37 }
 0x193   :  { %v736_v24 = vor.u32 1.1754944e-38, %v735_v53  ;;  %vm734_vm4 = vcmp.eq.f32.partialorder %v733_v45, 8.507059e+37 }
 0x194   :  { %v3818_v1 = vpop.eup %3817 }
 0x195   :  { %v743_v3 = vadd.f32 1.0, %v3818_v1 }
 0x196   :  { %v3820_v4 = vpop.eup %3819 }
 0x197   :  { %v3822_v40 = vpop.eup %3821  ;;  %v706_v16 = vmul.f32 %v3820_v4, %v704_v18  ;;  %3823 = vrcp.f32 %v743_v3  ;;  %vm711_vm13 = vweird.f32 %v3820_v4  ;;  %v755_v43 = vand.u32 2147483648, %v743_v3 }
 0x198   :  { %v725_v9 = vmul.f32 %v3822_v40, %v723_v55  ;;  %3825 = vtanh.f32 %v699_v5  ;;  %vm730_vm14 = vweird.f32 %v3822_v40  ;;  %vm712_vm1 = vmor %vm710_vm15, %vm711_vm13  ;;  %vm749_vm6 = vweird.f32 %v743_v3 }
 0x199   :  { %v707_v41 = vsub.f32 1.0, %v706_v16  ;;  %vm731_vm2 = vmor %vm729_vm0, %vm730_vm14  ;;  %v756_v59 = vor.u32 1.1754944e-38, %v755_v43  ;;  %v4873_v43 = vld [vmem:[#allocation4 + $0x170] sm:$0xff] }
 0x19a   :  { %v726_v42 = vsub.f32 1.0, %v725_v9 }
 0x19b   :  { %v708_v19 = vmul.f32 %v3820_v4, %v707_v41 }
 0x19c   :  { %v727_v60 = vmul.f32 %v3822_v40, %v726_v42 }
 0x19d   :  { %v3824_v62 = vpop.eup %3823  ;;  %v709_v23 = vadd.f32 %v3820_v4, %v708_v19 }
 0x19e   :  { %v728_v6 = vadd.f32 %v3822_v40, %v727_v60  ;;  %v745_v10 = vmul.f32 %v3824_v62, %v743_v3  ;;  %v3826_v1 = vpop.eup %3825  ;;  %vm750_vm5 = vweird.f32 %v3824_v62 }
 0x19f   :  { %v713_v58 = vsel %vm712_vm1, %v3820_v4, %v709_v23  ;;  %v753_v4 = vand.u32 2147483647, %v743_v3  ;;  %vm751_vm7 = vmor %vm749_vm6, %vm750_vm5  ;;  %v4823_v23 = vld [vmem:[#allocation4 + $0x1e8] sm:$0xff]  ;;  %v4825_v3 = vld [vmem:[#allocation4 + $0x1f0] sm:$0xff] }
 0x1a0   :  { %v718_v12 = vsel %vm715_vm3, %v717_v0, %v713_v58  ;;  %v732_v5 = vsel %vm731_vm2, %v3822_v40, %v728_v6  ;;  %v746_v16 = vsub.f32 1.0, %v745_v10  ;;  %6824 = vst [vmem:[#allocation42_spill] sm:$0xff] %v4825_v3  ;;  %1077 = vmatpush.msrb.mxu1 %v4823_v23  ;;  %1097 = vmatpush.msrb.mxu2 %v4825_v3  ;;  %v4833_v0 = vld [vmem:[#allocation4 + $0x1c0] sm:$0xff]  ;;  %v4835_v6 = vld [vmem:[#allocation4 + $0x1c8] sm:$0xff]  ;;  %v4837_v10 = vld [vmem:[#allocation4 + $0x1d0] sm:$0xff] }
 0x1a1   :  { %v737_v9 = vsel %vm734_vm4, %v736_v24, %v732_v5  ;;  %v760_v41 = vmul.f32 %v3826_v1, %v718_v12  ;;  %vm754_vm8 = vcmp.eq.f32.partialorder %v753_v4, 8.507059e+37  ;;  %6826 = vst [vmem:[#allocation44_spill] sm:$0xff] %v4833_v0  ;;  %v4841_v24 = vld [vmem:[#allocation4 + $0x1d8] sm:$0xff]  ;;  %v4845_v58 = vld [vmem:[#allocation4 + $0x1a0] sm:$0xff]  ;;  %v4847_v1 = vld [vmem:[#allocation4 + $0x1a8] sm:$0xff] }
 0x1a2   :  { %v759_v42 = vmul.f32 %v737_v9, %v4769_v44  ;;  %v747_v19 = vmul.f32 %v3824_v62, %v746_v16  ;;  %v4821_v44 = vld [vmem:[#allocation4 + $0x1e0] sm:$0xff]  ;;  %6827 = vst [vmem:[#allocation45_spill] sm:$0xff] %v4835_v6  ;;  %1078 = vmatpush.msrb.mxu1 %v4835_v6  ;;  %1098 = vmatpush.msrb.mxu2 %v4837_v10  ;;  %v4849_v12 = vld [vmem:[#allocation4 + $0x1b0] sm:$0xff]  ;;  %v4853_v5 = vld [vmem:[#allocation4 + $0x1b8] sm:$0xff] }
 0x1a3   :  { %6823 = vst [vmem:[#allocation41_spill] sm:$0xff] %v4821_v44  ;;  %1057 = vmatpush.msra.mxu0 %v4821_v44  ;;  %v4857_v16 = vld [vmem:[#allocation4 + $0x180] sm:$0xff]  ;;  %v4859_v9 = vld [vmem:[#allocation4 + $0x188] sm:$0xff]  ;;  %v4877_v4 = vld [vmem:[#allocation4 + $0x178] sm:$0xff] }
 0x1a4   :  { %v4812_v18 = vadd.f32 %v760_v41, %v759_v42  ;;  %v748_v55 = vadd.f32 %v3824_v62, %v747_v19  ;;  %1079 = vmatpush.msrb.mxu1 %v4847_v1  ;;  %1099 = vmatpush.msrb.mxu2 %v4849_v12  ;;  %6828 = vst [vmem:[#allocation46_spill] sm:$0xff] %v4859_v9  ;;  %v4861_v41 = vld [vmem:[#allocation4 + $0x190] sm:$0xff]  ;;  %v4865_v42 = vld [vmem:[#allocation4 + $0x198] sm:$0xff]  ;;  %v4869_v19 = vld [vmem:[#allocation4 + $0x160] sm:$0xff] }
 0x1a5   :  { %1058 = vmatpush.msra.mxu0 %v4833_v0  ;;  %6829 = vst [vmem:[#allocation47_spill] sm:$0xff] %v4861_v41 }
 0x1a6   :  { %3827 = vtanh.f32 %v4812_v18  ;;  %v752_v53 = vsel %vm751_vm7, %v3824_v62, %v748_v55  ;;  %v4829_v62 = vld [vmem:[#allocation4 + $0x1f8] sm:$0xff]  ;;  %1080 = vmatpush.msrb.mxu1 %v4859_v9  ;;  %1100 = vmatpush.msrb.mxu2 %v4861_v41  ;;  %v4871_v55 = vld [vmem:[#allocation4 + $0x168] sm:$0xff]  ;;  %6830 = vst [vmem:[#allocation48_spill] sm:$0xff] %v4877_v4 }
 0x1a7   :  { %v757_v60 = vsel %vm754_vm8, %v756_v59, %v752_v53  ;;  %6825 = vst [vmem:[#allocation43_spill] sm:$0xff] %v4829_v62  ;;  %1117 = vmatpush.msrb.mxu3 %v4829_v62  ;;  %1059 = vmatpush.msra.mxu0 %v4845_v58  ;;  %v4881_v53 = vld [vmem:[#allocation4 + $0x140] sm:$0xff]  ;;  %v4883_v59 = vld [vmem:[#allocation4 + $0x148] sm:$0xff] }
 0x1a8   :  { %1081 = vmatpush.msrb.mxu1 %v4871_v55  ;;  %1101 = vmatpush.msrb.mxu2 %v4873_v43 }
 0x1a9   :  { %1118 = vmatpush.msrb.mxu3 %v4841_v24  ;;  %1060 = vmatpush.msra.mxu0 %v4857_v16 }
 0x1aa   :  { %1082 = vmatpush.msrb.mxu1 %v4883_v59 }
 0x1ab   :  { %1119 = vmatpush.msrb.mxu3 %v4853_v5  ;;  %1061 = vmatpush.msra.mxu0 %v4869_v19 }
 0x1ac   :  { %v3828_v40 = vpop.eup %3827  ;;  %1083 = vmatpush.msrb.mxu1 %v4895_v63 }
 0x1ad   :  { %v4815_v45 = vmul.f32 %v3828_v40, %v757_v60  ;;  %1120 = vmatpush.msrb.mxu3 %v4865_v42  ;;  %v4885_v40 = vld [vmem:[#allocation4 + $0x150] sm:$0xff]  ;;  %1062 = vmatpush.msra.mxu0 %v4881_v53  ;;  %v4889_v60 = vld [vmem:[#allocation4 + $0x158] sm:$0xff] }
 0x1ae   :  { %6831 = vst [vmem:[#allocation49_spill] sm:$0xff] %v4885_v40  ;;  %1102 = vmatpush.msrb.mxu2 %v4885_v40  ;;  %1084 = vmatpush.msrb.mxu1 %v4905_v15 }
 0x1af   :  { %6822 = vst [vmem:[#allocation40_spill] sm:$0xff] %v4815_v45  ;;  %853 = vmatmul.f32.vlgmr.msrb.gmra.mxu0 %v4815_v45  ;;  %873 = vmatmul.f32.vlgmr.msra.gmra.mxu1 %v4815_v45 }
 0x1b0   :  { %893 = vmatmul.f32.vlgmr.msra.gmra.mxu2 %v4815_v45  ;;  %913 = vmatmul.f32.vlgmr.msra.gmra.mxu3 %v4815_v45  ;;  %v4907_v45 = vld [vmem:[#allocation4 + $0x110] sm:$0xff] }
 0x1b1   :  { %1121 = vmatpush.msrb.mxu3 %v4877_v4  ;;  %1063 = vmatpush.msra.mxu0 %v4893_v31 }
 0x1b2   :  { %1103 = vmatpush.msrb.mxu2 %v4897_v57  ;;  %1085 = vmatpush.msrb.mxu1 %v4917_v50 }
 0x1b3   :  { %1122 = vmatpush.msrb.mxu3 %v4889_v60  ;;  %1064 = vmatpush.msra.mxu0 %v4778_v35 }
 0x1b4   :  { %1104 = vmatpush.msrb.mxu2 %v4907_v45  ;;  %1086 = vmatpush.msrb.mxu1 %v4931_v36 }
 0x1b5   :  { %1123 = vmatpush.msrb.mxu3 %v4901_v51  ;;  %1065 = vmatpush.msra.mxu0 %v4915_v52 }
 0x1b6   :  { %1105 = vmatpush.msrb.mxu2 %v4919_v48  ;;  %1087 = vmatpush.msrb.mxu1 %v4941_v30 }
 0x1b7   :  { %1124 = vmatpush.msrb.mxu3 %v4909_v20  ;;  %1066 = vmatpush.msra.mxu0 %v4786_v49 }
 0x1b8   :  { %1106 = vmatpush.msrb.mxu2 %v4933_v37 }
 0x1b9   :  { %1125 = vmatpush.msrb.mxu3 %v4927_v47  ;;  %1067 = vmatpush.msra.mxu0 %v4789_v56 }
 0x1ba   :  { %1107 = vmatpush.msrb.mxu2 %v4943_v32 }
 0x1bb   :  { %1126 = vmatpush.msrb.mxu3 %v4935_v22  ;;  %1068 = vmatpush.msra.mxu0 %v4792_v17 }
 0x1bd   :  { %1127 = vmatpush.msrb.mxu3 %v4945_v33  ;;  %1069 = vmatpush.msra.mxu0 %v4797_v21 }
 0x1bf   :  { %1070 = vmatpush.msra.mxu0 %v4800_v2  ;;  %v4993_v2 = vld [vmem:[#allocation4 + $0x10] sm:$0xff] }
 0x1c1   :  { %1071 = vmatpush.msra.mxu0 %v4803_v7 }
 0x1c3   :  { %1072 = vmatpush.msra.mxu0 %v4806_v11 }
 0x1c5   :  { %1277 = vmatpush.msrb.mxu0 %v4821_v44 }
 0x1c7   :  { %1278 = vmatpush.msrb.mxu0 %v4833_v0 }
 0x1c9   :  { %1279 = vmatpush.msrb.mxu0 %v4845_v58 }
 0x1cb   :  { %1280 = vmatpush.msrb.mxu0 %v4857_v16 }
 0x1cd   :  { %1281 = vmatpush.msrb.mxu0 %v4869_v19 }
 0x1cf   :  { %1282 = vmatpush.msrb.mxu0 %v4881_v53 }
 0x1d1   :  { %1283 = vmatpush.msrb.mxu0 %v4893_v31 }
 0x1d3   :  { %1284 = vmatpush.msrb.mxu0 %v4778_v35 }
 0x1d5   :  { %1285 = vmatpush.msrb.mxu0 %v4915_v52 }
 0x1d7   :  { %1286 = vmatpush.msrb.mxu0 %v4786_v49 }
 0x1d9   :  { %1287 = vmatpush.msrb.mxu0 %v4789_v56 }
 0x1db   :  { %1288 = vmatpush.msrb.mxu0 %v4792_v17  ;;  %v6846_v17 = vld [vmem:[#allocation39_spill] sm:$0xff] }
 0x1dd   :  { %1289 = vmatpush.msrb.mxu0 %v4797_v21  ;;  %v6851_v21 = vld [vmem:[#allocation41_spill] sm:$0xff] }
 0x1df   :  { %1290 = vmatpush.msrb.mxu0 %v6846_v17 }
 0x1e1   :  { %1291 = vmatpush.msrb.mxu0 %v4803_v7  ;;  %v6852_v7 = vld [vmem:[#allocation42_spill] sm:$0xff] }
 0x1e3   :  { %1292 = vmatpush.msrb.mxu0 %v4806_v11  ;;  %v6856_v11 = vld [vmem:[#allocation46_spill] sm:$0xff] }
 0x22c   :  { %v854_v38 = vpop.f32.mrf.mxu0  ;;  %v874_v13 = vpop.f32.mrf.mxu1 }
 0x22d   :  { %v917_v34 = vadd.f32 %v854_v38, %v155_v14  ;;  %v918_v25 = vadd.f32 %v874_v13, %v196_v46  ;;  %v4951_v13 = vld [vmem:[#allocation4 + $0x88] sm:$0xff]  ;;  %v4953_v14 = vld [vmem:[#allocation4 + $0x90] sm:$0xff]  ;;  %v4955_v38 = vld [vmem:[#allocation4 + $0x98] sm:$0xff] }
 0x22e   :  { %6835 = vst [vmem:[#allocation53_spill] sm:$0xff] %v4955_v38  ;;  %1088 = vmatpush.msrb.mxu1 %v4951_v13  ;;  %1108 = vmatpush.msrb.mxu2 %v4953_v14  ;;  %v4963_v46 = vld [vmem:[#allocation4 + $0x68] sm:$0xff] }
 0x22f   :  { %v3741_v29 = vmul.f32 -1.442695, %v917_v34  ;;  %v3742_v54 = vmul.f32 -1.442695, %v918_v25  ;;  %v278_v34 = vadd.f32 %v4720_v28, %v4761_v61  ;;  %1128 = vmatpush.msrb.mxu3 %v4955_v38  ;;  %6836 = vst [vmem:[#allocation54_spill] sm:$0xff] %v4963_v46  ;;  %v4965_v25 = vld [vmem:[#allocation4 + $0x70] sm:$0xff] }
 0x230   :  { %6837 = vst [vmem:[#allocation55_spill] sm:$0xff] %v4965_v25  ;;  %1089 = vmatpush.msrb.mxu1 %v4963_v46  ;;  %1109 = vmatpush.msrb.mxu2 %v4965_v25  ;;  %v4973_v28 = vld [vmem:[#allocation4 + $0x48] sm:$0xff]  ;;  %v4977_v61 = vld [vmem:[#allocation4 + $0x58] sm:$0xff] }
 0x231   :  { %3829 = vpow2.f32 %v3741_v29  ;;  %1129 = vmatpush.msrb.mxu3 %v4967_v26  ;;  %6839 = vst [vmem:[#allocation57_spill] sm:$0xff] %v4973_v28  ;;  %v4987_v26 = vld [vmem:[#allocation4 + $0x38] sm:$0xff]  ;;  %v4991_v46 = vld [vmem:[#allocation4 + $0x8] sm:$0xff] }
 0x232   :  { %3831 = vpow2.f32 %v3742_v54  ;;  %v4975_v54 = vld [vmem:[#allocation4 + $0x50] sm:$0xff]  ;;  %6841 = vst [vmem:[#allocation59_spill] sm:$0xff] %v4977_v61  ;;  %1090 = vmatpush.msrb.mxu1 %v4973_v28 }
 0x233   :  { %v914_v39 = vpop.f32.mrf.mxu3  ;;  %6840 = vst [vmem:[#allocation58_spill] sm:$0xff] %v4975_v54  ;;  %1110 = vmatpush.msrb.mxu2 %v4975_v54  ;;  %1130 = vmatpush.msrb.mxu3 %v4977_v61 }
 0x234   :  { %v920_v29 = vadd.f32 %v914_v39, %v278_v34  ;;  %v4983_v39 = vld [vmem:[#allocation4 + $0x28] sm:$0xff]  ;;  %v4985_v34 = vld [vmem:[#allocation4 + $0x30] sm:$0xff] }
 0x235   :  { %1091 = vmatpush.msrb.mxu1 %v4983_v39  ;;  %1111 = vmatpush.msrb.mxu2 %v4985_v34  ;;  %v6842_v49 = vld [vmem:[#allocation53_spill] sm:$0xff] }
 0x236   :  { %v3743_v38 = vmul.f32 -1.442695, %v920_v29  ;;  %v4995_v29 = vld [vmem:[#allocation4 + $0x18] sm:$0xff]  ;;  %1131 = vmatpush.msrb.mxu3 %v4987_v26 }
 0x237   :  { %v3830_v25 = vpop.eup %3829  ;;  %1092 = vmatpush.msrb.mxu1 %v4991_v46  ;;  %1112 = vmatpush.msrb.mxu2 %v4993_v2 }
 0x238   :  { %v3832_v54 = vpop.eup %3831  ;;  %v4997_v28 = vadd.f32 1.0, %v3830_v25  ;;  %3833 = vpow2.f32 %v3743_v38  ;;  %1132 = vmatpush.msrb.mxu3 %v4995_v29  ;;  %v894_v38 = vpop.f32.mrf.mxu2 }
 0x239   :  { %v5001_v61 = vadd.f32 1.0, %v3832_v54  ;;  %1297 = vmatpush.msra.mxu1 %v4823_v23  ;;  %1317 = vmatpush.msra.mxu2 %v4825_v3  ;;  %v237_v54 = vadd.f32 %v4718_v27, %v4766_v8 }
 0x23a   :  { %3835 = vrcp.f32 %v4997_v28  ;;  %1337 = vmatpush.msra.mxu3 %v4829_v62  ;;  %vm930_vm11 = vweird.f32 %v4997_v28 }
 0x23b   :  { %3837 = vrcp.f32 %v5001_v61  ;;  %1298 = vmatpush.msra.mxu1 %v4835_v6  ;;  %1318 = vmatpush.msra.mxu2 %v4837_v10  ;;  %v919_v3 = vadd.f32 %v894_v38, %v237_v54  ;;  %v936_v54 = vand.u32 2147483648, %v4997_v28  ;;  %v955_v8 = vand.u32 2147483648, %v5001_v61 }
 0x23c   :  { %1338 = vmatpush.msra.mxu3 %v4841_v24  ;;  %vm949_vm12 = vweird.f32 %v5001_v61 }
 0x23d   :  { %1299 = vmatpush.msra.mxu1 %v4847_v1  ;;  %1319 = vmatpush.msra.mxu2 %v4849_v12 }
 0x23e   :  { %v3834_v25 = vpop.eup %3833  ;;  %1339 = vmatpush.msra.mxu3 %v4853_v5 }
 0x23f   :  { %v5019_v44 = vadd.f32 1.0, %v3834_v25  ;;  %1300 = vmatpush.msra.mxu1 %v4859_v9  ;;  %1320 = vmatpush.msra.mxu2 %v4861_v41  ;;  %v934_v41 = vand.u32 2147483647, %v4997_v28 }
 0x240   :  { %v3836_v62 = vpop.eup %3835  ;;  %1340 = vmatpush.msra.mxu3 %v4865_v42 }
 0x241   :  { %v3838_v6 = vpop.eup %3837  ;;  %v926_v0 = vmul.f32 %v3836_v62, %v4997_v28  ;;  %3839 = vrcp.f32 %v5019_v44  ;;  %1301 = vmatpush.msra.mxu1 %v4871_v55  ;;  %1321 = vmatpush.msra.mxu2 %v4873_v43  ;;  %vm931_vm9 = vweird.f32 %v3836_v62  ;;  %vm935_vm15 = vcmp.eq.f32.partialorder %v934_v41, 8.507059e+37  ;;  %v6844_v41 = vld [vmem:[#allocation55_spill] sm:$0xff] }
 0x242   :  { %v945_v27 = vmul.f32 %v3838_v6, %v5001_v61  ;;  %3841 = vtanh.f32 %v919_v3  ;;  %1341 = vmatpush.msra.mxu3 %v4877_v4  ;;  %vm950_vm10 = vweird.f32 %v3838_v6  ;;  %vm932_vm13 = vmor %vm930_vm11, %vm931_vm9  ;;  %vm969_vm2 = vweird.f32 %v5019_v44 }
 0x243   :  { %v927_v38 = vsub.f32 1.0, %v926_v0  ;;  %1302 = vmatpush.msra.mxu1 %v4883_v59  ;;  %1322 = vmatpush.msra.mxu2 %v4885_v40  ;;  %vm951_vm14 = vmor %vm949_vm12, %vm950_vm10 }
 0x244   :  { %v946_v25 = vsub.f32 1.0, %v945_v27  ;;  %v953_v27 = vand.u32 2147483647, %v5001_v61  ;;  %1342 = vmatpush.msra.mxu3 %v4889_v60 }
 0x245   :  { %v928_v9 = vmul.f32 %v3836_v62, %v927_v38  ;;  %1303 = vmatpush.msra.mxu1 %v4895_v63  ;;  %v937_v38 = vor.u32 1.1754944e-38, %v936_v54  ;;  %1323 = vmatpush.msra.mxu2 %v4897_v57 }
 0x246   :  { %v947_v0 = vmul.f32 %v3838_v6, %v946_v25  ;;  %1343 = vmatpush.msra.mxu3 %v4901_v51  ;;  %vm954_vm0 = vcmp.eq.f32.partialorder %v953_v27, 8.507059e+37 }
 0x247   :  { %v5044_v3 = vpop.eup %3839  ;;  %v929_v4 = vadd.f32 %v3836_v62, %v928_v9  ;;  %v956_v9 = vor.u32 1.1754944e-38, %v955_v8  ;;  %1304 = vmatpush.msra.mxu1 %v4905_v15  ;;  %1324 = vmatpush.msra.mxu2 %v4907_v45 }
 0x248   :  { %v948_v25 = vadd.f32 %v3838_v6, %v947_v0  ;;  %v965_v40 = vmul.f32 %v5044_v3, %v5019_v44  ;;  %v3842_v61 = vpop.eup %3841  ;;  %1344 = vmatpush.msra.mxu3 %v4909_v20  ;;  %vm970_vm1 = vweird.f32 %v5044_v3 }
 0x249   :  { %v933_v28 = vsel %vm932_vm13, %v3836_v62, %v929_v4  ;;  %1305 = vmatpush.msra.mxu1 %v4917_v50  ;;  %1325 = vmatpush.msra.mxu2 %v4919_v48  ;;  %vm971_vm3 = vmor %vm969_vm2, %vm970_vm1  ;;  %v6845_v4 = vld [vmem:[#allocation56_spill] sm:$0xff] }
 0x24a   :  { %v938_v63 = vsel %vm935_vm15, %v937_v38, %v933_v28  ;;  %v952_v54 = vsel %vm951_vm14, %v3838_v6, %v948_v25  ;;  %v966_v0 = vsub.f32 1.0, %v965_v40  ;;  %1345 = vmatpush.msra.mxu3 %v4927_v47  ;;  %v6848_v38 = vld [vmem:[#allocation58_spill] sm:$0xff]  ;;  %v6849_v25 = vld [vmem:[#allocation59_spill] sm:$0xff]  ;;  %v6854_v28 = vld [vmem:[#allocation44_spill] sm:$0xff] }
 0x24b   :  { %v957_v57 = vsel %vm954_vm0, %v956_v9, %v952_v54  ;;  %v980_v51 = vmul.f32 %v3842_v61, %v938_v63  ;;  %1306 = vmatpush.msra.mxu1 %v4931_v36  ;;  %1326 = vmatpush.msra.mxu2 %v4933_v37  ;;  %v6853_v9 = vld [vmem:[#allocation43_spill] sm:$0xff]  ;;  %v6855_v61 = vld [vmem:[#allocation45_spill] sm:$0xff] }
 0x24c   :  { %v979_v8 = vmul.f32 %v957_v57, %v4812_v18  ;;  %v967_v35 = vmul.f32 %v5044_v3, %v966_v0  ;;  %1346 = vmatpush.msra.mxu3 %v4935_v22  ;;  %v975_v57 = vand.u32 2147483648, %v5019_v44  ;;  %v6843_v18 = vld [vmem:[#allocation54_spill] sm:$0xff] }
 0x24d   :  { %1307 = vmatpush.msra.mxu1 %v4941_v30  ;;  %1327 = vmatpush.msra.mxu2 %v4943_v32 }
 0x24e   :  { %v5068_v62 = vadd.f32 %v980_v51, %v979_v8  ;;  %v968_v63 = vadd.f32 %v5044_v3, %v967_v35  ;;  %1347 = vmatpush.msra.mxu3 %v4945_v33  ;;  %v973_v51 = vand.u32 2147483647, %v5019_v44  ;;  %v976_v6 = vor.u32 1.1754944e-38, %v975_v57  ;;  %v6847_v44 = vld [vmem:[#allocation57_spill] sm:$0xff] }
 0x24f   :  { %1308 = vmatpush.msra.mxu1 %v4951_v13  ;;  %1328 = vmatpush.msra.mxu2 %v4953_v14 }
 0x250   :  { %3843 = vtanh.f32 %v5068_v62  ;;  %1348 = vmatpush.msra.mxu3 %v6842_v49  ;;  %v972_v56 = vsel %vm971_vm3, %v5044_v3, %v968_v63  ;;  %vm974_vm4 = vcmp.eq.f32.partialorder %v973_v51, 8.507059e+37 }
 0x251   :  { %1309 = vmatpush.msra.mxu1 %v6843_v18  ;;  %1329 = vmatpush.msra.mxu2 %v6844_v41  ;;  %v977_v27 = vsel %vm974_vm4, %v976_v6, %v972_v56 }
 0x252   :  { %1349 = vmatpush.msra.mxu3 %v6845_v4 }
 0x253   :  { %1310 = vmatpush.msra.mxu1 %v6847_v44  ;;  %1330 = vmatpush.msra.mxu2 %v6848_v38 }
 0x254   :  { %1350 = vmatpush.msra.mxu3 %v6849_v25 }
 0x255   :  { %1311 = vmatpush.msra.mxu1 %v4983_v39  ;;  %1331 = vmatpush.msra.mxu2 %v4985_v34 }
 0x256   :  { %v3844_v40 = vpop.eup %3843  ;;  %1351 = vmatpush.msra.mxu3 %v4987_v26 }
 0x257   :  { %v5095_v3 = vmul.f32 %v3844_v40, %v977_v27  ;;  %1312 = vmatpush.msra.mxu1 %v4991_v46  ;;  %1332 = vmatpush.msra.mxu2 %v4993_v2 }
 0x258   :  { %1352 = vmatpush.msra.mxu3 %v4995_v29 }
 0x259   :  { %6850 = vst [vmem:[#allocation53_spill] sm:$0xff] %v5095_v3  ;;  %1073 = vmatmul.f32.vlgmr.msra.gmra.mxu0 %v5095_v3  ;;  %1093 = vmatmul.f32.vlgmr.msrb.gmra.mxu1 %v5095_v3 }
 0x25a   :  { %1113 = vmatmul.f32.vlgmr.msrb.gmra.mxu2 %v5095_v3  ;;  %1133 = vmatmul.f32.vlgmr.msrb.gmra.mxu3 %v5095_v3  ;;  %v5371_v3 = vld [vmem:[#allocation4 + $0x78] sm:$0xff] }
 0x25b   :  { %1497 = vmatpush.msra.mxu0 %v6851_v21  ;;  %1517 = vmatpush.msrb.mxu1 %v4823_v23  ;;  %v6857_v23 = vld [vmem:[#allocation47_spill] sm:$0xff]  ;;  %6883 = vst [vmem:[#allocation58_spill] sm:$0xff] %v5371_v3 }
 0x25c   :  { %1537 = vmatpush.msrb.mxu2 %v6852_v7  ;;  %1557 = vmatpush.msrb.mxu3 %v6853_v9 }
 0x25d   :  { %1498 = vmatpush.msra.mxu0 %v6854_v28  ;;  %1518 = vmatpush.msrb.mxu1 %v6855_v61 }
 0x25e   :  { %1538 = vmatpush.msrb.mxu2 %v4837_v10  ;;  %1558 = vmatpush.msrb.mxu3 %v4841_v24  ;;  %v6858_v10 = vld [vmem:[#allocation48_spill] sm:$0xff]  ;;  %v6859_v24 = vld [vmem:[#allocation49_spill] sm:$0xff] }
 0x25f   :  { %1499 = vmatpush.msra.mxu0 %v4845_v58  ;;  %1519 = vmatpush.msrb.mxu1 %v4847_v1  ;;  %v6860_v58 = vld [vmem:[#allocation50_spill] sm:$0xff]  ;;  %v6861_v1 = vld [vmem:[#allocation51_spill] sm:$0xff] }
 0x260   :  { %1539 = vmatpush.msrb.mxu2 %v4849_v12  ;;  %1559 = vmatpush.msrb.mxu3 %v4853_v5  ;;  %v6862_v12 = vld [vmem:[#allocation52_spill] sm:$0xff]  ;;  %v6868_v5 = vld [vmem:[#allocation21_spill] sm:$0xff] }
 0x261   :  { %1500 = vmatpush.msra.mxu0 %v4857_v16  ;;  %1520 = vmatpush.msrb.mxu1 %v6856_v11 }
 0x262   :  { %1540 = vmatpush.msrb.mxu2 %v6857_v23  ;;  %1560 = vmatpush.msrb.mxu3 %v4865_v42 }
 0x263   :  { %1501 = vmatpush.msra.mxu0 %v4869_v19  ;;  %1521 = vmatpush.msrb.mxu1 %v4871_v55 }
 0x264   :  { %1541 = vmatpush.msrb.mxu2 %v4873_v43  ;;  %1561 = vmatpush.msrb.mxu3 %v6858_v10 }
 0x265   :  { %1502 = vmatpush.msra.mxu0 %v4881_v53  ;;  %1522 = vmatpush.msrb.mxu1 %v4883_v59 }
 0x266   :  { %1542 = vmatpush.msrb.mxu2 %v6859_v24  ;;  %1562 = vmatpush.msrb.mxu3 %v4889_v60 }
 0x267   :  { %1503 = vmatpush.msra.mxu0 %v4893_v31  ;;  %1523 = vmatpush.msrb.mxu1 %v6860_v58  ;;  %v6863_v31 = vld [vmem:[#allocation26_spill] sm:$0xff] }
 0x268   :  { %1543 = vmatpush.msrb.mxu2 %v6861_v1  ;;  %1563 = vmatpush.msrb.mxu3 %v6862_v12 }
 0x269   :  { %1524 = vmatpush.msrb.mxu1 %v4905_v15  ;;  %v6864_v15 = vld [vmem:[#allocation17_spill] sm:$0xff] }
 0x26a   :  { %1544 = vmatpush.msrb.mxu2 %v4907_v45  ;;  %1564 = vmatpush.msrb.mxu3 %v4909_v20 }
 0x26b   :  { %1525 = vmatpush.msrb.mxu1 %v4917_v50 }
 0x26c   :  { %1545 = vmatpush.msrb.mxu2 %v4919_v48  ;;  %1565 = vmatpush.msrb.mxu3 %v4927_v47 }
 0x26d   :  { %1526 = vmatpush.msrb.mxu1 %v4931_v36 }
 0x26e   :  { %1546 = vmatpush.msrb.mxu2 %v4933_v37  ;;  %1566 = vmatpush.msrb.mxu3 %v4935_v22 }
 0x26f   :  { %1527 = vmatpush.msrb.mxu1 %v4941_v30  ;;  %v158_v30 = vadd.f32 %v6864_v15, %v6863_v31 }
 0x270   :  { %1547 = vmatpush.msrb.mxu2 %v4943_v32  ;;  %1567 = vmatpush.msrb.mxu3 %v4945_v33  ;;  %v6865_v32 = vld [vmem:[#allocation33_spill] sm:$0xff]  ;;  %v6866_v33 = vld [vmem:[#allocation18_spill] sm:$0xff] }
 0x271   :  { %1528 = vmatpush.msrb.mxu1 %v4951_v13  ;;  %v199_v36 = vadd.f32 %v6866_v33, %v6865_v32  ;;  %v6869_v13 = vld [vmem:[#allocation37_spill] sm:$0xff] }
 0x272   :  { %1548 = vmatpush.msrb.mxu2 %v4953_v14  ;;  %1568 = vmatpush.msrb.mxu3 %v6842_v49  ;;  %v6870_v14 = vld [vmem:[#allocation20_spill] sm:$0xff] }
 0x273   :  { %1529 = vmatpush.msrb.mxu1 %v6843_v18 }
 0x274   :  { %1549 = vmatpush.msrb.mxu2 %v6844_v41  ;;  %1569 = vmatpush.msrb.mxu3 %v6845_v4 }
 0x275   :  { %1530 = vmatpush.msrb.mxu1 %v6847_v44 }
 0x276   :  { %1550 = vmatpush.msrb.mxu2 %v6848_v38  ;;  %1570 = vmatpush.msrb.mxu3 %v6849_v25 }
 0x277   :  { %1531 = vmatpush.msrb.mxu1 %v4983_v39 }
 0x278   :  { %1551 = vmatpush.msrb.mxu2 %v4985_v34  ;;  %1571 = vmatpush.msrb.mxu3 %v4987_v26  ;;  %v6867_v26 = vld [vmem:[#allocation35_spill] sm:$0xff] }
 0x279   :  { %1532 = vmatpush.msrb.mxu1 %v4991_v46  ;;  %v281_v16 = vadd.f32 %v6868_v5, %v6867_v26  ;;  %v240_v46 = vadd.f32 %v6870_v14, %v6869_v13  ;;  %v5190_v5 = vld [vmem:[#allocation4 + $0xc0] sm:$0xff] }
 0x27a   :  { %1552 = vmatpush.msrb.mxu2 %v4993_v2  ;;  %1572 = vmatpush.msrb.mxu3 %v4995_v29  ;;  %v5204_v14 = vld [vmem:[#allocation4 + $0x40] sm:$0xff] }
 0x27b   :  { %6875 = vst [vmem:[#allocation55_spill] sm:$0xff] %v5204_v14 }
 0x2d6   :  { %v1074_v37 = vpop.f32.mrf.mxu0  ;;  %v1094_v47 = vpop.f32.mrf.mxu1 }
 0x2d7   :  { %v1137_v48 = vadd.f32 %v1074_v37, %v158_v30  ;;  %v1138_v50 = vadd.f32 %v1094_v47, %v199_v36  ;;  %v6872_v37 = vld [vmem:[#allocation19_spill] sm:$0xff] }
 0x2d8   :  { %v161_v47 = vadd.f32 %v6872_v37, %v6863_v31 }
 0x2d9   :  { %v3744_v20 = vmul.f32 -1.442695, %v1137_v48  ;;  %v3745_v45 = vmul.f32 -1.442695, %v1138_v50  ;;  %v6873_v48 = vld [vmem:[#allocation22_spill] sm:$0xff] }
 0x2da   :  { %v202_v50 = vadd.f32 %v6873_v48, %v6865_v32 }
 0x2db   :  { %3845 = vpow2.f32 %v3744_v20 }
 0x2dc   :  { %3847 = vpow2.f32 %v3745_v45 }
 0x2dd   :  { %v1134_v2 = vpop.f32.mrf.mxu3  ;;  %v1114_v60 = vpop.f32.mrf.mxu2 }
 0x2de   :  { %v1140_v42 = vadd.f32 %v1134_v2, %v281_v16  ;;  %v1139_v29 = vadd.f32 %v1114_v60, %v240_v46 }
 0x2e0   :  { %v3746_v19 = vmul.f32 -1.442695, %v1140_v42  ;;  %v5193_v42 = vld [vmem:[#allocation4 + $0xa0] sm:$0xff] }
 0x2e1   :  { %v3846_v55 = vpop.eup %3845 }
 0x2e2   :  { %v3848_v43 = vpop.eup %3847  ;;  %v1144_v53 = vadd.f32 1.0, %v3846_v55  ;;  %3849 = vpow2.f32 %v3746_v19 }
 0x2e3   :  { %v1163_v59 = vadd.f32 1.0, %v3848_v43  ;;  %v5196_v43 = vld [vmem:[#allocation4 + $0x80] sm:$0xff] }
 0x2e4   :  { %3851 = vrcp.f32 %v1144_v53  ;;  %v1156_v57 = vand.u32 2147483648, %v1144_v53  ;;  %v1154_v56 = vand.u32 2147483647, %v1144_v53  ;;  %vm1150_vm7 = vweird.f32 %v1144_v53 }
 0x2e5   :  { %3853 = vrcp.f32 %v1163_v59  ;;  %v1175_v51 = vand.u32 2147483648, %v1163_v59  ;;  %v1173_v6 = vand.u32 2147483647, %v1163_v59  ;;  %vm1169_vm8 = vweird.f32 %v1163_v59 }
 0x2e6   :  { %v1157_v17 = vor.u32 1.1754944e-38, %v1156_v57  ;;  %vm1155_vm11 = vcmp.eq.f32.partialorder %v1154_v56, 8.507059e+37  ;;  %v6876_v57 = vld [vmem:[#allocation23_spill] sm:$0xff] }
 0x2e7   :  { %v1176_v27 = vor.u32 1.1754944e-38, %v1175_v51  ;;  %vm1174_vm12 = vcmp.eq.f32.partialorder %v1173_v6, 8.507059e+37  ;;  %v243_v51 = vadd.f32 %v6876_v57, %v6869_v13  ;;  %v5253_v57 = vld [vmem:[#allocation4 + $0x1b0] sm:$0xff] }
 0x2e8   :  { %v3850_v22 = vpop.eup %3849 }
 0x2e9   :  { %v1183_v39 = vadd.f32 1.0, %v3850_v22 }
 0x2ea   :  { %v3852_v34 = vpop.eup %3851 }
 0x2eb   :  { %v3854_v54 = vpop.eup %3853  ;;  %v1146_v0 = vmul.f32 %v3852_v34, %v1144_v53  ;;  %3855 = vrcp.f32 %v1183_v39  ;;  %vm1151_vm5 = vweird.f32 %v3852_v34  ;;  %v1195_v58 = vand.u32 2147483648, %v1183_v39 }
 0x2ec   :  { %v1165_v8 = vmul.f32 %v3854_v54, %v1163_v59  ;;  %3857 = vtanh.f32 %v1139_v29  ;;  %vm1170_vm6 = vweird.f32 %v3854_v54  ;;  %vm1152_vm9 = vmor %vm1150_vm7, %vm1151_vm5  ;;  %vm1189_vm14 = vweird.f32 %v1183_v39  ;;  %v5201_v59 = vld [vmem:[#allocation4 + $0x60] sm:$0xff] }
 0x2ed   :  { %v1147_v35 = vsub.f32 1.0, %v1146_v0  ;;  %vm1171_vm10 = vmor %vm1169_vm8, %vm1170_vm6  ;;  %v1193_v1 = vand.u32 2147483647, %v1183_v39  ;;  %v1196_v15 = vor.u32 1.1754944e-38, %v1195_v58  ;;  %v5210_v29 = vld [vmem:[#allocation4] sm:$0xff] }
 0x2ee   :  { %v1166_v63 = vsub.f32 1.0, %v1165_v8 }
 0x2ef   :  { %v1148_v49 = vmul.f32 %v3852_v34, %v1147_v35  ;;  %vm1194_vm0 = vcmp.eq.f32.partialorder %v1193_v1, 8.507059e+37 }
 0x2f0   :  { %v1167_v18 = vmul.f32 %v3854_v54, %v1166_v63 }
 0x2f1   :  { %v3856_v41 = vpop.eup %3855  ;;  %v1149_v4 = vadd.f32 %v3852_v34, %v1148_v49 }
 0x2f2   :  { %v1168_v44 = vadd.f32 %v3854_v54, %v1167_v18  ;;  %v1185_v40 = vmul.f32 %v3856_v41, %v1183_v39  ;;  %v3858_v25 = vpop.eup %3857  ;;  %vm1190_vm13 = vweird.f32 %v3856_v41  ;;  %v5207_v39 = vld [vmem:[#allocation4 + $0x20] sm:$0xff] }
 0x2f3   :  { %v1153_v38 = vsel %vm1152_vm9, %v3852_v34, %v1149_v4  ;;  %vm1191_vm15 = vmor %vm1189_vm14, %vm1190_vm13 }
 0x2f4   :  { %v1158_v21 = vsel %vm1155_vm11, %v1157_v17, %v1153_v38  ;;  %v1172_v7 = vsel %vm1171_vm10, %v3854_v54, %v1168_v44  ;;  %v1186_v9 = vsub.f32 1.0, %v1185_v40 }
 0x2f5   :  { %v1177_v28 = vsel %vm1174_vm12, %v1176_v27, %v1172_v7  ;;  %v1200_v61 = vmul.f32 %v3858_v25, %v1158_v21 }
 0x2f6   :  { %v1199_v11 = vmul.f32 %v1177_v28, %v5068_v62  ;;  %v1187_v23 = vmul.f32 %v3856_v41, %v1186_v9  ;;  %v5182_v62 = vld [vmem:[#allocation4 + $0x100] sm:$0xff] }
 0x2f7   :  { %1504 = vmatpush.msra.mxu0 %v5182_v62 }
 0x2f8   :  { %v5173_v10 = vadd.f32 %v1200_v61, %v1199_v11  ;;  %v1188_v24 = vadd.f32 %v3856_v41, %v1187_v23 }
 0x2f9   :  { %1505 = vmatpush.msra.mxu0 %v4915_v52  ;;  %v6874_v52 = vld [vmem:[#allocation24_spill] sm:$0xff] }
 0x2fa   :  { %3859 = vtanh.f32 %v5173_v10  ;;  %v1192_v12 = vsel %vm1191_vm15, %v3856_v41, %v1188_v24  ;;  %v284_v53 = vadd.f32 %v6874_v52, %v6867_v26 }
 0x2fb   :  { %v1197_v33 = vsel %vm1194_vm0, %v1196_v15, %v1192_v12  ;;  %1506 = vmatpush.msra.mxu0 %v5190_v5 }
 0x2fd   :  { %1507 = vmatpush.msra.mxu0 %v5193_v42 }
 0x2ff   :  { %1508 = vmatpush.msra.mxu0 %v5196_v43 }
 0x300   :  { %v3860_v30 = vpop.eup %3859 }
 0x301   :  { %v5176_v36 = vmul.f32 %v3860_v30, %v1197_v33  ;;  %1509 = vmatpush.msra.mxu0 %v5201_v59 }
 0x303   :  { %6871 = vst [vmem:[#allocation54_spill] sm:$0xff] %v5176_v36  ;;  %1293 = vmatmul.f32.vlgmr.msrb.gmra.mxu0 %v5176_v36  ;;  %1313 = vmatmul.f32.vlgmr.msra.gmra.mxu1 %v5176_v36 }
 0x304   :  { %1333 = vmatmul.f32.vlgmr.msra.gmra.mxu2 %v5176_v36  ;;  %1353 = vmatmul.f32.vlgmr.msra.gmra.mxu3 %v5176_v36  ;;  %v5369_v36 = vld [vmem:[#allocation4 + $0x70] sm:$0xff] }
 0x305   :  { %1510 = vmatpush.msra.mxu0 %v5204_v14  ;;  %6882 = vst [vmem:[#allocation57_spill] sm:$0xff] %v5369_v36 }
 0x307   :  { %1511 = vmatpush.msra.mxu0 %v5207_v39 }
 0x309   :  { %1512 = vmatpush.msra.mxu0 %v5210_v29 }
 0x380   :  { %v1294_v20 = vpop.f32.mrf.mxu0  ;;  %v1314_v45 = vpop.f32.mrf.mxu1 }
 0x381   :  { %v1357_v16 = vadd.f32 %v1294_v20, %v161_v47  ;;  %v1358_v2 = vadd.f32 %v1314_v45, %v202_v50 }
 0x383   :  { %v3747_v19 = vmul.f32 -1.442695, %v1357_v16  ;;  %v3748_v55 = vmul.f32 -1.442695, %v1358_v2 }
 0x385   :  { %3861 = vpow2.f32 %v3747_v19 }
 0x386   :  { %3863 = vpow2.f32 %v3748_v55 }
 0x387   :  { %v1354_v60 = vpop.f32.mrf.mxu3  ;;  %v1334_v35 = vpop.f32.mrf.mxu2 }
 0x388   :  { %v1360_v22 = vadd.f32 %v1354_v60, %v284_v53  ;;  %v1359_v18 = vadd.f32 %v1334_v35, %v243_v51  ;;  %v5227_v60 = vld [vmem:[#allocation4 + $0x1e8] sm:$0xff]  ;;  %v5249_v35 = vld [vmem:[#allocation4 + $0x1a0] sm:$0xff]  ;;  %v5257_v51 = vld [vmem:[#allocation4 + $0x1b8] sm:$0xff] }
 0x389   :  { %1737 = vmatpush.msra.mxu1 %v5227_v60 }
 0x38a   :  { %v3749_v46 = vmul.f32 -1.442695, %v1360_v22  ;;  %v5229_v22 = vld [vmem:[#allocation4 + $0x1f0] sm:$0xff] }
 0x38b   :  { %v3862_v34 = vpop.eup %3861  ;;  %1757 = vmatpush.msra.mxu2 %v5229_v22 }
 0x38c   :  { %v3864_v54 = vpop.eup %3863  ;;  %v1364_v0 = vadd.f32 1.0, %v3862_v34  ;;  %3865 = vpow2.f32 %v3749_v46  ;;  %v5233_v46 = vld [vmem:[#allocation4 + $0x1f8] sm:$0xff]  ;;  %v5237_v34 = vld [vmem:[#allocation4 + $0x1c0] sm:$0xff] }
 0x38d   :  { %v1383_v8 = vadd.f32 1.0, %v3864_v54  ;;  %1777 = vmatpush.msra.mxu3 %v5233_v46  ;;  %v5239_v54 = vld [vmem:[#allocation4 + $0x1c8] sm:$0xff] }
 0x38e   :  { %3867 = vrcp.f32 %v1364_v0  ;;  %v1376_v40 = vand.u32 2147483648, %v1364_v0  ;;  %v1374_v25 = vand.u32 2147483647, %v1364_v0  ;;  %vm1370_vm3 = vweird.f32 %v1364_v0  ;;  %1738 = vmatpush.msra.mxu1 %v5239_v54 }
 0x38f   :  { %3869 = vrcp.f32 %v1383_v8  ;;  %v1395_v27 = vand.u32 2147483648, %v1383_v8  ;;  %v1393_v7 = vand.u32 2147483647, %v1383_v8  ;;  %vm1389_vm4 = vweird.f32 %v1383_v8 }
 0x390   :  { %v1377_v61 = vor.u32 1.1754944e-38, %v1376_v40  ;;  %vm1375_vm7 = vcmp.eq.f32.partialorder %v1374_v25, 8.507059e+37  ;;  %v5285_v40 = vld [vmem:[#allocation4 + $0x140] sm:$0xff]  ;;  %v5293_v25 = vld [vmem:[#allocation4 + $0x158] sm:$0xff] }
 0x391   :  { %v1396_v24 = vor.u32 1.1754944e-38, %v1395_v27  ;;  %vm1394_vm8 = vcmp.eq.f32.partialorder %v1393_v7, 8.507059e+37  ;;  %v5287_v27 = vld [vmem:[#allocation4 + $0x148] sm:$0xff] }
 0x392   :  { %v3866_v63 = vpop.eup %3865  ;;  %v5299_v7 = vld [vmem:[#allocation4 + $0x128] sm:$0xff] }
 0x393   :  { %v1403_v49 = vadd.f32 1.0, %v3866_v63  ;;  %v5251_v63 = vld [vmem:[#allocation4 + $0x1a8] sm:$0xff] }
 0x394   :  { %v3868_v56 = vpop.eup %3867  ;;  %1739 = vmatpush.msra.mxu1 %v5251_v63 }
 0x395   :  { %v3870_v6 = vpop.eup %3869  ;;  %v1366_v41 = vmul.f32 %v3868_v56, %v1364_v0  ;;  %3871 = vrcp.f32 %v1403_v49  ;;  %vm1371_vm1 = vweird.f32 %v3868_v56  ;;  %v1415_v45 = vand.u32 2147483648, %v1403_v49  ;;  %v5241_v0 = vld [vmem:[#allocation4 + $0x1d0] sm:$0xff] }
 0x396   :  { %v1385_v4 = vmul.f32 %v3870_v6, %v1383_v8  ;;  %3873 = vtanh.f32 %v1359_v18  ;;  %vm1390_vm2 = vweird.f32 %v3870_v6  ;;  %vm1372_vm5 = vmor %vm1370_vm3, %vm1371_vm1  ;;  %vm1409_vm10 = vweird.f32 %v1403_v49  ;;  %v5245_v8 = vld [vmem:[#allocation4 + $0x1d8] sm:$0xff]  ;;  %1758 = vmatpush.msra.mxu2 %v5241_v0  ;;  %v5265_v18 = vld [vmem:[#allocation4 + $0x190] sm:$0xff] }
 0x397   :  { %v1367_v17 = vsub.f32 1.0, %v1366_v41  ;;  %vm1391_vm6 = vmor %vm1389_vm4, %vm1390_vm2  ;;  %v1413_v16 = vand.u32 2147483647, %v1403_v49  ;;  %v1416_v19 = vor.u32 1.1754944e-38, %v1415_v45  ;;  %1778 = vmatpush.msra.mxu3 %v5245_v8  ;;  %v5273_v41 = vld [vmem:[#allocation4 + $0x160] sm:$0xff]  ;;  %v5337_v45 = vld [vmem:[#allocation4 + $0xd0] sm:$0xff] }
 0x398   :  { %v1386_v44 = vsub.f32 1.0, %v1385_v4  ;;  %1759 = vmatpush.msra.mxu2 %v5253_v57  ;;  %v5275_v4 = vld [vmem:[#allocation4 + $0x168] sm:$0xff] }
 0x399   :  { %v1368_v38 = vmul.f32 %v3868_v56, %v1367_v17  ;;  %vm1414_vm12 = vcmp.eq.f32.partialorder %v1413_v16, 8.507059e+37  ;;  %1779 = vmatpush.msra.mxu3 %v5257_v51  ;;  %v5277_v17 = vld [vmem:[#allocation4 + $0x170] sm:$0xff]  ;;  %v5339_v16 = vld [vmem:[#allocation4 + $0xd8] sm:$0xff] }
 0x39a   :  { %v1387_v21 = vmul.f32 %v3870_v6, %v1386_v44  ;;  %1760 = vmatpush.msra.mxu2 %v5265_v18  ;;  %v5281_v44 = vld [vmem:[#allocation4 + $0x178] sm:$0xff] }
 0x39b   :  { %v3872_v9 = vpop.eup %3871  ;;  %v1369_v28 = vadd.f32 %v3868_v56, %v1368_v38  ;;  %v5289_v38 = vld [vmem:[#allocation4 + $0x150] sm:$0xff] }
 0x39c   :  { %v1388_v11 = vadd.f32 %v3870_v6, %v1387_v21  ;;  %v1405_v23 = vmul.f32 %v3872_v9, %v1403_v49  ;;  %v3874_v1 = vpop.eup %3873  ;;  %vm1410_vm9 = vweird.f32 %v3872_v9  ;;  %v5261_v49 = vld [vmem:[#allocation4 + $0x180] sm:$0xff]  ;;  %1761 = vmatpush.msra.mxu2 %v5277_v17 }
 0x39d   :  { %v1373_v58 = vsel %vm1372_vm5, %v3868_v56, %v1369_v28  ;;  %vm1411_vm11 = vmor %vm1409_vm10, %vm1410_vm9  ;;  %v5263_v56 = vld [vmem:[#allocation4 + $0x188] sm:$0xff]  ;;  %v5297_v21 = vld [vmem:[#allocation4 + $0x120] sm:$0xff] }
 0x39e   :  { %v1378_v12 = vsel %vm1375_vm7, %v1377_v61, %v1373_v58  ;;  %v1392_v15 = vsel %vm1391_vm6, %v3870_v6, %v1388_v11  ;;  %v1406_v30 = vsub.f32 1.0, %v1405_v23  ;;  %1740 = vmatpush.msra.mxu1 %v5263_v56  ;;  %v5269_v6 = vld [vmem:[#allocation4 + $0x198] sm:$0xff]  ;;  %1762 = vmatpush.msra.mxu2 %v5289_v38  ;;  %v5309_v61 = vld [vmem:[#allocation4 + $0x108] sm:$0xff]  ;;  %v5311_v11 = vld [vmem:[#allocation4 + $0x110] sm:$0xff] }
 0x39f   :  { %v1397_v33 = vsel %vm1394_vm8, %v1396_v24, %v1392_v15  ;;  %v1420_v37 = vmul.f32 %v3874_v1, %v1378_v12  ;;  %1780 = vmatpush.msra.mxu3 %v5269_v6  ;;  %v5305_v28 = vld [vmem:[#allocation4 + $0x138] sm:$0xff]  ;;  %v5319_v24 = vld [vmem:[#allocation4 + $0xe0] sm:$0xff]  ;;  %v5321_v58 = vld [vmem:[#allocation4 + $0xe8] sm:$0xff] }
 0x3a0   :  { %v1419_v47 = vmul.f32 %v1397_v33, %v5173_v10  ;;  %v1407_v48 = vmul.f32 %v3872_v9, %v1406_v30  ;;  %v5225_v10 = vld [vmem:[#allocation4 + $0x1e0] sm:$0xff]  ;;  %1741 = vmatpush.msra.mxu1 %v5275_v4  ;;  %v5313_v23 = vld [vmem:[#allocation4 + $0x118] sm:$0xff]  ;;  %v5323_v1 = vld [vmem:[#allocation4 + $0xf0] sm:$0xff] }
 0x3a1   :  { %1717 = vmatpush.msrb.mxu0 %v5225_v10  ;;  %1781 = vmatpush.msra.mxu3 %v5281_v44  ;;  %v6878_v12 = vld [vmem:[#allocation16_spill] sm:$0xff]  ;;  %v6879_v30 = vld [vmem:[#allocation25_spill] sm:$0xff] }
 0x3a2   :  { %v5216_v50 = vadd.f32 %v1420_v37, %v1419_v47  ;;  %v1408_v20 = vadd.f32 %v3872_v9, %v1407_v48  ;;  %1742 = vmatpush.msra.mxu1 %v5287_v27  ;;  %v164_v15 = vadd.f32 %v6878_v12, %v6863_v31  ;;  %v205_v33 = vadd.f32 %v6879_v30, %v6865_v32  ;;  %v5331_v37 = vld [vmem:[#allocation4 + $0xf8] sm:$0xff] }
 0x3a3   :  { %1718 = vmatpush.msrb.mxu0 %v5237_v34  ;;  %1782 = vmatpush.msra.mxu3 %v5293_v25  ;;  %v5349_v12 = vld [vmem:[#allocation4 + $0xb8] sm:$0xff] }
 0x3a4   :  { %3875 = vtanh.f32 %v5216_v50  ;;  %v1412_v2 = vsel %vm1411_vm11, %v3872_v9, %v1408_v20  ;;  %v5301_v9 = vld [vmem:[#allocation4 + $0x130] sm:$0xff]  ;;  %1743 = vmatpush.msra.mxu1 %v5299_v7  ;;  %v5335_v20 = vld [vmem:[#allocation4 + $0xc8] sm:$0xff] }
 0x3a5   :  { %v1417_v52 = vsel %vm1414_vm12, %v1416_v19, %v1412_v2  ;;  %1719 = vmatpush.msrb.mxu0 %v5249_v35  ;;  %1763 = vmatpush.msra.mxu2 %v5301_v9 }
 0x3a6   :  { %1783 = vmatpush.msra.mxu3 %v5305_v28  ;;  %1744 = vmatpush.msra.mxu1 %v5309_v61 }
 0x3a7   :  { %1720 = vmatpush.msrb.mxu0 %v5261_v49  ;;  %1764 = vmatpush.msra.mxu2 %v5311_v11 }
 0x3a8   :  { %1784 = vmatpush.msra.mxu3 %v5313_v23  ;;  %1745 = vmatpush.msra.mxu1 %v5321_v58 }
 0x3a9   :  { %1721 = vmatpush.msrb.mxu0 %v5273_v41  ;;  %1765 = vmatpush.msra.mxu2 %v5323_v1 }
 0x3aa   :  { %v3876_v55 = vpop.eup %3875  ;;  %1785 = vmatpush.msra.mxu3 %v5331_v37  ;;  %1746 = vmatpush.msra.mxu1 %v5335_v20 }
 0x3ab   :  { %v5219_v53 = vmul.f32 %v3876_v55, %v1417_v52  ;;  %1722 = vmatpush.msrb.mxu0 %v5285_v40  ;;  %1766 = vmatpush.msra.mxu2 %v5337_v45  ;;  %v5345_v55 = vld [vmem:[#allocation4 + $0xa8] sm:$0xff]  ;;  %v5347_v52 = vld [vmem:[#allocation4 + $0xb0] sm:$0xff] }
 0x3ac   :  { %1786 = vmatpush.msra.mxu3 %v5339_v16  ;;  %1747 = vmatpush.msra.mxu1 %v5345_v55 }
 0x3ad   :  { %6877 = vst [vmem:[#allocation56_spill] sm:$0xff] %v5219_v53  ;;  %1513 = vmatmul.f32.vlgmr.msra.gmra.mxu0 %v5219_v53  ;;  %1533 = vmatmul.f32.vlgmr.msrb.gmra.mxu1 %v5219_v53 }
 0x3ae   :  { %1553 = vmatmul.f32.vlgmr.msrb.gmra.mxu2 %v5219_v53  ;;  %1573 = vmatmul.f32.vlgmr.msrb.gmra.mxu3 %v5219_v53 }
 0x3af   :  { %1723 = vmatpush.msrb.mxu0 %v5297_v21  ;;  %1767 = vmatpush.msra.mxu2 %v5347_v52 }
 0x3b0   :  { %1787 = vmatpush.msra.mxu3 %v5349_v12 }
 0x3b1   :  { %1724 = vmatpush.msrb.mxu0 %v5182_v62 }
 0x3b3   :  { %1725 = vmatpush.msrb.mxu0 %v5319_v24 }
 0x3b5   :  { %1726 = vmatpush.msrb.mxu0 %v5190_v5 }
 0x3b7   :  { %1727 = vmatpush.msrb.mxu0 %v5193_v42 }
 0x3b9   :  { %1728 = vmatpush.msrb.mxu0 %v5196_v43 }
 0x3bb   :  { %1729 = vmatpush.msrb.mxu0 %v5201_v59 }
 0x3bd   :  { %1730 = vmatpush.msrb.mxu0 %v5204_v14  ;;  %v5397_v14 = vld [vmem:[#allocation4 + $0x10] sm:$0xff] }
 0x3be   :  { %6887 = vst [vmem:[#allocation43_spill] sm:$0xff] %v5397_v14 }
 0x3bf   :  { %1731 = vmatpush.msrb.mxu0 %v5207_v39 }
 0x3c1   :  { %1732 = vmatpush.msrb.mxu0 %v5210_v29 }
 0x3c3   :  { %1937 = vmatpush.msra.mxu0 %v5225_v10 }
 0x3c5   :  { %1938 = vmatpush.msra.mxu0 %v5237_v34 }
 0x3c7   :  { %1939 = vmatpush.msra.mxu0 %v5249_v35 }
 0x3c9   :  { %1940 = vmatpush.msra.mxu0 %v5261_v49 }
 0x3cb   :  { %1941 = vmatpush.msra.mxu0 %v5273_v41 }
 0x3cd   :  { %1942 = vmatpush.msra.mxu0 %v5285_v40 }
 0x3cf   :  { %1943 = vmatpush.msra.mxu0 %v5297_v21 }
 0x3d1   :  { %1944 = vmatpush.msra.mxu0 %v5182_v62 }
 0x3d3   :  { %1945 = vmatpush.msra.mxu0 %v5319_v24  ;;  %v6891_v24 = vld [vmem:[#allocation58_spill] sm:$0xff] }
 0x3d5   :  { %1946 = vmatpush.msra.mxu0 %v5190_v5 }
 0x3d7   :  { %1947 = vmatpush.msra.mxu0 %v5193_v42 }
 0x3d9   :  { %1948 = vmatpush.msra.mxu0 %v5196_v43  ;;  %v6892_v43 = vld [vmem:[#allocation55_spill] sm:$0xff] }
 0x3db   :  { %1949 = vmatpush.msra.mxu0 %v5201_v59  ;;  %v6896_v59 = vld [vmem:[#allocation43_spill] sm:$0xff] }
 0x3dd   :  { %1950 = vmatpush.msra.mxu0 %v6892_v43  ;;  %v2119_v43 = vld [vmem:[#allocation7 + $0xc8] sm:$0xff] }
 0x3df   :  { %1951 = vmatpush.msra.mxu0 %v5207_v39  ;;  %v2154_v39 = vld [vmem:[#allocation7 + $0x1e0] sm:$0xff] }
 0x3e1   :  { %1952 = vmatpush.msra.mxu0 %v5210_v29  ;;  %v2153_v29 = vld [vmem:[#allocation7 + $0x1d8] sm:$0xff] }
 0x42a   :  { %v1514_v47 = vpop.f32.mrf.mxu0  ;;  %v1534_v48 = vpop.f32.mrf.mxu1 }
 0x42b   :  { %v1577_v2 = vadd.f32 %v1514_v47, %v164_v15  ;;  %v1578_v19 = vadd.f32 %v1534_v48, %v205_v33  ;;  %v5355_v15 = vld [vmem:[#allocation4 + $0x88] sm:$0xff]  ;;  %v5357_v33 = vld [vmem:[#allocation4 + $0x90] sm:$0xff]  ;;  %v5359_v47 = vld [vmem:[#allocation4 + $0x98] sm:$0xff] }
 0x42c   :  { %1748 = vmatpush.msra.mxu1 %v5355_v15  ;;  %v6880_v48 = vld [vmem:[#allocation28_spill] sm:$0xff]  ;;  %1768 = vmatpush.msra.mxu2 %v5357_v33 }
 0x42d   :  { %v3750_v30 = vmul.f32 -1.442695, %v1577_v2  ;;  %v3751_v53 = vmul.f32 -1.442695, %v1578_v19  ;;  %v287_v2 = vadd.f32 %v6880_v48, %v6867_v26  ;;  %1788 = vmatpush.msra.mxu3 %v5359_v47  ;;  %v5367_v19 = vld [vmem:[#allocation4 + $0x68] sm:$0xff]  ;;  %v5379_v48 = vld [vmem:[#allocation4 + $0x50] sm:$0xff] }
 0x42e   :  { %6881 = vst [vmem:[#allocation39_spill] sm:$0xff] %v5367_v19  ;;  %1749 = vmatpush.msra.mxu1 %v5367_v19  ;;  %1769 = vmatpush.msra.mxu2 %v5369_v36  ;;  %v5381_v26 = vld [vmem:[#allocation4 + $0x58] sm:$0xff]  ;;  %v5395_v19 = vld [vmem:[#allocation4 + $0x8] sm:$0xff] }
 0x42f   :  { %3877 = vpow2.f32 %v3750_v30  ;;  %1789 = vmatpush.msra.mxu3 %v5371_v3  ;;  %6885 = vst [vmem:[#allocation41_spill] sm:$0xff] %v5379_v48  ;;  %v5391_v3 = vld [vmem:[#allocation4 + $0x38] sm:$0xff] }
 0x430   :  { %3879 = vpow2.f32 %v3751_v53  ;;  %v5377_v53 = vld [vmem:[#allocation4 + $0x48] sm:$0xff]  ;;  %6886 = vst [vmem:[#allocation42_spill] sm:$0xff] %v5381_v26  ;;  %1770 = vmatpush.msra.mxu2 %v5379_v48 }
 0x431   :  { %v1574_v32 = vpop.f32.mrf.mxu3  ;;  %6884 = vst [vmem:[#allocation59_spill] sm:$0xff] %v5377_v53  ;;  %1750 = vmatpush.msra.mxu1 %v5377_v53  ;;  %1790 = vmatpush.msra.mxu3 %v5381_v26 }
 0x432   :  { %v1580_v30 = vadd.f32 %v1574_v32, %v287_v2  ;;  %v5387_v32 = vld [vmem:[#allocation4 + $0x28] sm:$0xff]  ;;  %v5389_v2 = vld [vmem:[#allocation4 + $0x30] sm:$0xff] }
 0x433   :  { %1751 = vmatpush.msra.mxu1 %v5387_v32  ;;  %1771 = vmatpush.msra.mxu2 %v5389_v2 }
 0x434   :  { %v3752_v31 = vmul.f32 -1.442695, %v1580_v30  ;;  %v5399_v30 = vld [vmem:[#allocation4 + $0x18] sm:$0xff]  ;;  %1791 = vmatpush.msra.mxu3 %v5391_v3 }
 0x435   :  { %v3878_v36 = vpop.eup %3877  ;;  %1752 = vmatpush.msra.mxu1 %v5395_v19  ;;  %1772 = vmatpush.msra.mxu2 %v5397_v14 }
 0x436   :  { %v3880_v48 = vpop.eup %3879  ;;  %v5401_v53 = vadd.f32 1.0, %v3878_v36  ;;  %3881 = vpow2.f32 %v3752_v31  ;;  %1792 = vmatpush.msra.mxu3 %v5399_v30  ;;  %v1554_v31 = vpop.f32.mrf.mxu2 }
 0x437   :  { %v5405_v26 = vadd.f32 1.0, %v3880_v48  ;;  %1957 = vmatpush.msrb.mxu1 %v5227_v60  ;;  %1977 = vmatpush.msrb.mxu2 %v5229_v22  ;;  %v6888_v48 = vld [vmem:[#allocation27_spill] sm:$0xff] }
 0x438   :  { %3883 = vrcp.f32 %v5401_v53  ;;  %1997 = vmatpush.msrb.mxu3 %v5233_v46  ;;  %v246_v14 = vadd.f32 %v6888_v48, %v6869_v13  ;;  %vm1590_vm15 = vweird.f32 %v5401_v53  ;;  %v2138_v48 = vld [vmem:[#allocation7 + $0x160] sm:$0xff] }
 0x439   :  { %3885 = vrcp.f32 %v5405_v26  ;;  %1958 = vmatpush.msrb.mxu1 %v5239_v54  ;;  %1978 = vmatpush.msrb.mxu2 %v5241_v0  ;;  %v1615_v35 = vand.u32 2147483648, %v5405_v26  ;;  %v1613_v49 = vand.u32 2147483647, %v5405_v26  ;;  %vm1609_vm0 = vweird.f32 %v5405_v26 }
 0x43a   :  { %1998 = vmatpush.msrb.mxu3 %v5245_v8  ;;  %v1579_v22 = vadd.f32 %v1554_v31, %v246_v14  ;;  %v1596_v8 = vand.u32 2147483648, %v5401_v53  ;;  %v2144_v31 = vld [vmem:[#allocation7 + $0x190] sm:$0xff] }
 0x43b   :  { %1959 = vmatpush.msrb.mxu1 %v5251_v63  ;;  %1979 = vmatpush.msrb.mxu2 %v5253_v57  ;;  %v1594_v57 = vand.u32 2147483647, %v5401_v53  ;;  %vm1614_vm4 = vcmp.eq.f32.partialorder %v1613_v49, 8.507059e+37  ;;  %v2136_v49 = vld [vmem:[#allocation7 + $0x150] sm:$0xff] }
 0x43c   :  { %v3882_v36 = vpop.eup %3881  ;;  %1999 = vmatpush.msrb.mxu3 %v5257_v51 }
 0x43d   :  { %v5423_v10 = vadd.f32 1.0, %v3882_v36  ;;  %1960 = vmatpush.msrb.mxu1 %v5263_v56  ;;  %1980 = vmatpush.msrb.mxu2 %v5265_v18  ;;  %vm1595_vm3 = vcmp.eq.f32.partialorder %v1594_v57, 8.507059e+37  ;;  %v2145_v36 = vld [vmem:[#allocation7 + $0x198] sm:$0xff]  ;;  %v2134_v57 = vld [vmem:[#allocation7 + $0x140] sm:$0xff] }
 0x43e   :  { %v3884_v60 = vpop.eup %3883  ;;  %2000 = vmatpush.msrb.mxu3 %v5269_v6  ;;  %v1597_v6 = vor.u32 1.1754944e-38, %v1596_v8  ;;  %v2141_v8 = vld [vmem:[#allocation7 + $0x178] sm:$0xff] }
 0x43f   :  { %v3886_v46 = vpop.eup %3885  ;;  %v1586_v34 = vmul.f32 %v3884_v60, %v5401_v53  ;;  %3887 = vrcp.f32 %v5423_v10  ;;  %1961 = vmatpush.msrb.mxu1 %v5275_v4  ;;  %1981 = vmatpush.msrb.mxu2 %v5277_v17  ;;  %vm1591_vm13 = vweird.f32 %v3884_v60  ;;  %v1616_v17 = vor.u32 1.1754944e-38, %v1615_v35  ;;  %v2148_v53 = vld [vmem:[#allocation7 + $0x1b0] sm:$0xff] }
 0x440   :  { %v1605_v54 = vmul.f32 %v3886_v46, %v5405_v26  ;;  %3889 = vtanh.f32 %v1579_v22  ;;  %2001 = vmatpush.msrb.mxu3 %v5281_v44  ;;  %vm1610_vm14 = vweird.f32 %v3886_v46  ;;  %vm1592_vm1 = vmor %vm1590_vm15, %vm1591_vm13  ;;  %v1635_v5 = vand.u32 2147483648, %v5423_v10  ;;  %v6897_v22 = vld [vmem:[#allocation26_spill] sm:$0xff] }
 0x441   :  { %v1587_v14 = vsub.f32 1.0, %v1586_v34  ;;  %1962 = vmatpush.msrb.mxu1 %v5287_v27  ;;  %1982 = vmatpush.msrb.mxu2 %v5289_v38  ;;  %vm1611_vm2 = vmor %vm1609_vm0, %vm1610_vm14  ;;  %vm1629_vm6 = vweird.f32 %v5423_v10 }
 0x442   :  { %v1606_v0 = vsub.f32 1.0, %v1605_v54  ;;  %2002 = vmatpush.msrb.mxu3 %v5293_v25  ;;  %v6899_v54 = vld [vmem:[#allocation33_spill] sm:$0xff] }
 0x443   :  { %v1588_v63 = vmul.f32 %v3884_v60, %v1587_v14  ;;  %1963 = vmatpush.msrb.mxu1 %v5299_v7  ;;  %1983 = vmatpush.msrb.mxu2 %v5301_v9  ;;  %v6900_v14 = vld [vmem:[#allocation29_spill] sm:$0xff] }
 0x444   :  { %v1607_v51 = vmul.f32 %v3886_v46, %v1606_v0  ;;  %2003 = vmatpush.msrb.mxu3 %v5305_v28  ;;  %v208_v0 = vadd.f32 %v6900_v14, %v6899_v54  ;;  %v2101_v14 = vld [vmem:[#allocation7 + $0x38] sm:$0xff] }
 0x445   :  { %v5448_v56 = vpop.eup %3887  ;;  %v1589_v18 = vadd.f32 %v3884_v60, %v1588_v63  ;;  %1964 = vmatpush.msrb.mxu1 %v5309_v61  ;;  %1984 = vmatpush.msrb.mxu2 %v5311_v11  ;;  %v6889_v61 = vld [vmem:[#allocation39_spill] sm:$0xff]  ;;  %v1636_v11 = vor.u32 1.1754944e-38, %v1635_v5  ;;  %v2122_v5 = vld [vmem:[#allocation7 + $0xe0] sm:$0xff] }
 0x446   :  { %v1608_v41 = vadd.f32 %v3886_v46, %v1607_v51  ;;  %v1625_v4 = vmul.f32 %v5448_v56, %v5423_v10  ;;  %v3890_v26 = vpop.eup %3889  ;;  %2004 = vmatpush.msrb.mxu3 %v5313_v23  ;;  %vm1630_vm5 = vweird.f32 %v5448_v56  ;;  %v6890_v23 = vld [vmem:[#allocation57_spill] sm:$0xff]  ;;  %v2135_v51 = vld [vmem:[#allocation7 + $0x148] sm:$0xff] }
 0x447   :  { %v1593_v44 = vsel %vm1592_vm1, %v3884_v60, %v1589_v18  ;;  %1965 = vmatpush.msrb.mxu1 %v5321_v58  ;;  %1985 = vmatpush.msrb.mxu2 %v5323_v1  ;;  %vm1631_vm7 = vmor %vm1629_vm6, %vm1630_vm5  ;;  %v6893_v58 = vld [vmem:[#allocation59_spill] sm:$0xff] }
 0x448   :  { %v1598_v40 = vsel %vm1595_vm3, %v1597_v6, %v1593_v44  ;;  %v1612_v27 = vsel %vm1611_vm2, %v3886_v46, %v1608_v41  ;;  %v1626_v38 = vsub.f32 1.0, %v1625_v4  ;;  %2005 = vmatpush.msrb.mxu3 %v5331_v37  ;;  %v2140_v60 = vld [vmem:[#allocation7 + $0x170] sm:$0xff]  ;;  %v2137_v6 = vld [vmem:[#allocation7 + $0x158] sm:$0xff]  ;;  %v2130_v41 = vld [vmem:[#allocation7 + $0x120] sm:$0xff] }
 0x449   :  { %v1617_v25 = vsel %vm1614_vm4, %v1616_v17, %v1612_v27  ;;  %v1640_v21 = vmul.f32 %v3890_v26, %v1598_v40  ;;  %1966 = vmatpush.msrb.mxu1 %v5335_v20  ;;  %1986 = vmatpush.msrb.mxu2 %v5337_v45  ;;  %v6894_v20 = vld [vmem:[#allocation41_spill] sm:$0xff]  ;;  %v6895_v45 = vld [vmem:[#allocation42_spill] sm:$0xff]  ;;  %v6898_v46 = vld [vmem:[#allocation15_spill] sm:$0xff] }
 0x44a   :  { %v1639_v7 = vmul.f32 %v1617_v25, %v5216_v50  ;;  %v1627_v62 = vmul.f32 %v5448_v56, %v1626_v38  ;;  %2006 = vmatpush.msrb.mxu3 %v5339_v16  ;;  %v1633_v50 = vand.u32 2147483647, %v5423_v10  ;;  %v2139_v10 = vld [vmem:[#allocation7 + $0x168] sm:$0xff]  ;;  %v167_v34 = vadd.f32 %v6898_v46, %v6897_v22  ;;  %v2132_v17 = vld [vmem:[#allocation7 + $0x130] sm:$0xff]  ;;  %v2133_v40 = vld [vmem:[#allocation7 + $0x138] sm:$0xff] }
 0x44b   :  { %1967 = vmatpush.msrb.mxu1 %v5345_v55  ;;  %1987 = vmatpush.msrb.mxu2 %v5347_v52  ;;  %v2155_v55 = vld [vmem:[#allocation7 + $0x1e8] sm:$0xff]  ;;  %v2156_v52 = vld [vmem:[#allocation7 + $0x1f0] sm:$0xff]  ;;  %v2126_v27 = vld [vmem:[#allocation7 + $0x100] sm:$0xff] }
 0x44c   :  { %v5472_v9 = vadd.f32 %v1640_v21, %v1639_v7  ;;  %v1628_v28 = vadd.f32 %v5448_v56, %v1627_v62  ;;  %2007 = vmatpush.msrb.mxu3 %v5349_v12  ;;  %vm1634_vm8 = vcmp.eq.f32.partialorder %v1633_v50, 8.507059e+37  ;;  %v2150_v12 = vld [vmem:[#allocation7 + $0x1c0] sm:$0xff]  ;;  %v2131_v4 = vld [vmem:[#allocation7 + $0x128] sm:$0xff]  ;;  %v2128_v25 = vld [vmem:[#allocation7 + $0x110] sm:$0xff] }
 0x44d   :  { %1968 = vmatpush.msrb.mxu1 %v5355_v15  ;;  %1988 = vmatpush.msrb.mxu2 %v5357_v33  ;;  %v2151_v15 = vld [vmem:[#allocation7 + $0x1c8] sm:$0xff]  ;;  %v2152_v33 = vld [vmem:[#allocation7 + $0x1d0] sm:$0xff]  ;;  %v2129_v21 = vld [vmem:[#allocation7 + $0x118] sm:$0xff] }
 0x44e   :  { %3891 = vtanh.f32 %v5472_v9  ;;  %2008 = vmatpush.msrb.mxu3 %v5359_v47  ;;  %v1632_v42 = vsel %vm1631_vm7, %v5448_v56, %v1628_v28  ;;  %v2146_v47 = vld [vmem:[#allocation7 + $0x1a0] sm:$0xff]  ;;  %v2127_v38 = vld [vmem:[#allocation7 + $0x108] sm:$0xff] }
 0x44f   :  { %1969 = vmatpush.msrb.mxu1 %v6889_v61  ;;  %1989 = vmatpush.msrb.mxu2 %v6890_v23  ;;  %v1637_v37 = vsel %vm1634_vm8, %v1636_v11, %v1632_v42  ;;  %v6901_v7 = vld [vmem:[#allocation35_spill] sm:$0xff]  ;;  %v6902_v62 = vld [vmem:[#allocation30_spill] sm:$0xff]  ;;  %v2125_v11 = vld [vmem:[#allocation7 + $0xf8] sm:$0xff] }
 0x450   :  { %2009 = vmatpush.msrb.mxu3 %v6891_v24  ;;  %v290_v28 = vadd.f32 %v6902_v62, %v6901_v7  ;;  %v2123_v50 = vld [vmem:[#allocation7 + $0xe8] sm:$0xff]  ;;  %v2124_v42 = vld [vmem:[#allocation7 + $0xf0] sm:$0xff]  ;;  %v2118_v24 = vld [vmem:[#allocation7 + $0xc0] sm:$0xff] }
 0x451   :  { %1970 = vmatpush.msrb.mxu1 %v6893_v58  ;;  %1990 = vmatpush.msrb.mxu2 %v6894_v20  ;;  %v2120_v58 = vld [vmem:[#allocation7 + $0xd0] sm:$0xff]  ;;  %v2114_v20 = vld [vmem:[#allocation7 + $0xa0] sm:$0xff]  ;;  %v2099_v46 = vld [vmem:[#allocation7 + $0x28] sm:$0xff] }
 0x452   :  { %2010 = vmatpush.msrb.mxu3 %v6895_v45  ;;  %v2115_v45 = vld [vmem:[#allocation7 + $0xa8] sm:$0xff] }
 0x453   :  { %1971 = vmatpush.msrb.mxu1 %v5387_v32  ;;  %1991 = vmatpush.msrb.mxu2 %v5389_v2  ;;  %v2149_v32 = vld [vmem:[#allocation7 + $0x1b8] sm:$0xff]  ;;  %v2142_v2 = vld [vmem:[#allocation7 + $0x180] sm:$0xff] }
 0x454   :  { %v3892_v1 = vpop.eup %3891  ;;  %2011 = vmatpush.msrb.mxu3 %v5391_v3  ;;  %v2157_v3 = vld [vmem:[#allocation7 + $0x1f8] sm:$0xff] }
 0x455   :  { %v5499_v16 = vmul.f32 %v3892_v1, %v1637_v37  ;;  %1972 = vmatpush.msrb.mxu1 %v5395_v19  ;;  %1992 = vmatpush.msrb.mxu2 %v6896_v59  ;;  %v2147_v19 = vld [vmem:[#allocation7 + $0x1a8] sm:$0xff]  ;;  %v2121_v1 = vld [vmem:[#allocation7 + $0xd8] sm:$0xff]  ;;  %v2116_v59 = vld [vmem:[#allocation7 + $0xb0] sm:$0xff] }
 0x456   :  { %2012 = vmatpush.msrb.mxu3 %v5399_v30  ;;  %v2143_v30 = vld [vmem:[#allocation7 + $0x188] sm:$0xff] }
 0x457   :  { %1733 = vmatmul.f32.vlgmr.msrb.gmra.mxu0 %v5499_v16  ;;  %1753 = vmatmul.f32.vlgmr.msra.gmra.mxu1 %v5499_v16 }
 0x458   :  { %1773 = vmatmul.f32.vlgmr.msra.gmra.mxu2 %v5499_v16  ;;  %1793 = vmatmul.f32.vlgmr.msra.gmra.mxu3 %v5499_v16 }
 0x459   :  { %2168 = vmatpush.msrb.mxu0 %v2154_v39  ;;  %2209 = vmatpush.msra.mxu1 %v2155_v55  ;;  %v2117_v55 = vld [vmem:[#allocation7 + $0xb8] sm:$0xff] }
 0x45a   :  { %2250 = vmatpush.msra.mxu2 %v2156_v52  ;;  %2291 = vmatpush.msra.mxu3 %v2157_v3  ;;  %v2110_v52 = vld [vmem:[#allocation7 + $0x80] sm:$0xff]  ;;  %v2111_v3 = vld [vmem:[#allocation7 + $0x88] sm:$0xff] }
 0x45b   :  { %2169 = vmatpush.msrb.mxu0 %v2150_v12  ;;  %2210 = vmatpush.msra.mxu1 %v2151_v15 }
 0x45c   :  { %2251 = vmatpush.msra.mxu2 %v2152_v33  ;;  %2292 = vmatpush.msra.mxu3 %v2153_v29  ;;  %v2112_v33 = vld [vmem:[#allocation7 + $0x90] sm:$0xff]  ;;  %v2113_v29 = vld [vmem:[#allocation7 + $0x98] sm:$0xff] }
 0x45d   :  { %2170 = vmatpush.msrb.mxu0 %v2146_v47  ;;  %2211 = vmatpush.msra.mxu1 %v2147_v19  ;;  %v2106_v19 = vld [vmem:[#allocation7 + $0x60] sm:$0xff] }
 0x45e   :  { %2252 = vmatpush.msra.mxu2 %v2148_v53  ;;  %2293 = vmatpush.msra.mxu3 %v2149_v32  ;;  %v2107_v53 = vld [vmem:[#allocation7 + $0x68] sm:$0xff]  ;;  %v2108_v32 = vld [vmem:[#allocation7 + $0x70] sm:$0xff] }
 0x45f   :  { %2171 = vmatpush.msrb.mxu0 %v2142_v2  ;;  %2212 = vmatpush.msra.mxu1 %v2143_v30  ;;  %v2109_v2 = vld [vmem:[#allocation7 + $0x78] sm:$0xff]  ;;  %v2102_v30 = vld [vmem:[#allocation7 + $0x40] sm:$0xff] }
 0x460   :  { %2253 = vmatpush.msra.mxu2 %v2144_v31  ;;  %2294 = vmatpush.msra.mxu3 %v2145_v36  ;;  %v2103_v31 = vld [vmem:[#allocation7 + $0x48] sm:$0xff]  ;;  %v2104_v36 = vld [vmem:[#allocation7 + $0x50] sm:$0xff] }
 0x461   :  { %2172 = vmatpush.msrb.mxu0 %v2138_v48  ;;  %2213 = vmatpush.msra.mxu1 %v2139_v10  ;;  %v2105_v48 = vld [vmem:[#allocation7 + $0x58] sm:$0xff]  ;;  %v2098_v10 = vld [vmem:[#allocation7 + $0x20] sm:$0xff] }
 0x462   :  { %2254 = vmatpush.msra.mxu2 %v2140_v60  ;;  %2295 = vmatpush.msra.mxu3 %v2141_v8  ;;  %v6903_v8 = vld [vmem:[#allocation32_spill] sm:$0xff] }
 0x463   :  { %2173 = vmatpush.msrb.mxu0 %v2134_v57  ;;  %2214 = vmatpush.msra.mxu1 %v2135_v51  ;;  %v2095_v57 = vld [vmem:[#allocation7 + $0x8] sm:$0xff] }
 0x464   :  { %2255 = vmatpush.msra.mxu2 %v2136_v49  ;;  %2296 = vmatpush.msra.mxu3 %v2137_v6  ;;  %v2096_v49 = vld [vmem:[#allocation7 + $0x10] sm:$0xff] }
 0x465   :  { %2174 = vmatpush.msrb.mxu0 %v2130_v41  ;;  %2215 = vmatpush.msra.mxu1 %v2131_v4 }
 0x466   :  { %2256 = vmatpush.msra.mxu2 %v2132_v17  ;;  %2297 = vmatpush.msra.mxu3 %v2133_v40 }
 0x467   :  { %2175 = vmatpush.msrb.mxu0 %v2126_v27  ;;  %2216 = vmatpush.msra.mxu1 %v2127_v38 }
 0x468   :  { %2257 = vmatpush.msra.mxu2 %v2128_v25  ;;  %2298 = vmatpush.msra.mxu3 %v2129_v21 }
 0x469   :  { %2176 = vmatpush.msrb.mxu0 %v2122_v5  ;;  %2217 = vmatpush.msra.mxu1 %v2123_v50 }
 0x46a   :  { %2258 = vmatpush.msra.mxu2 %v2124_v42  ;;  %2299 = vmatpush.msra.mxu3 %v2125_v11 }
 0x46b   :  { %2177 = vmatpush.msrb.mxu0 %v2118_v24  ;;  %2218 = vmatpush.msra.mxu1 %v2119_v43 }
 0x46c   :  { %2259 = vmatpush.msra.mxu2 %v2120_v58  ;;  %2300 = vmatpush.msra.mxu3 %v2121_v1 }
 0x46d   :  { %2178 = vmatpush.msrb.mxu0 %v2114_v20  ;;  %2219 = vmatpush.msra.mxu1 %v2115_v45 }
 0x46e   :  { %2260 = vmatpush.msra.mxu2 %v2116_v59  ;;  %2301 = vmatpush.msra.mxu3 %v2117_v55 }
 0x46f   :  { %2179 = vmatpush.msrb.mxu0 %v2110_v52  ;;  %2220 = vmatpush.msra.mxu1 %v2111_v3 }
 0x470   :  { %2261 = vmatpush.msra.mxu2 %v2112_v33  ;;  %2302 = vmatpush.msra.mxu3 %v2113_v29 }
 0x471   :  { %2180 = vmatpush.msrb.mxu0 %v2106_v19  ;;  %2221 = vmatpush.msra.mxu1 %v2107_v53  ;;  %v6905_v19 = vld [vmem:[#allocation40_spill] sm:$0xff]  ;;  %v6906_v53 = vld [vmem:[#allocation53_spill] sm:$0xff] }
 0x472   :  { %2262 = vmatpush.msra.mxu2 %v2108_v32  ;;  %2303 = vmatpush.msra.mxu3 %v2109_v2  ;;  %v5551_v32 = vld [vmem:[#allocation9 + $0x1e0] sm:$0xff]  ;;  %v5553_v2 = vld [vmem:[#allocation9 + $0x1e8] sm:$0xff] }
 0x473   :  { %2181 = vmatpush.msrb.mxu0 %v2102_v30  ;;  %2222 = vmatpush.msra.mxu1 %v2103_v31  ;;  %6907 = vst [vmem:[#allocation44_spill] sm:$0xff] %v5551_v32  ;;  %v5555_v30 = vld [vmem:[#allocation9 + $0x1c0] sm:$0xff]  ;;  %v5559_v31 = vld [vmem:[#allocation9 + $0x1c8] sm:$0xff] }
 0x474   :  { %2263 = vmatpush.msra.mxu2 %v2104_v36  ;;  %2304 = vmatpush.msra.mxu3 %v2105_v48  ;;  %6908 = vst [vmem:[#allocation45_spill] sm:$0xff] %v5559_v31  ;;  %v5561_v36 = vld [vmem:[#allocation9 + $0x1f8] sm:$0xff]  ;;  %v5564_v48 = vld [vmem:[#allocation9 + $0x1a0] sm:$0xff] }
 0x475   :  { %2182 = vmatpush.msrb.mxu0 %v2098_v10  ;;  %2223 = vmatpush.msra.mxu1 %v2099_v46  ;;  %v5566_v10 = vld [vmem:[#allocation9 + $0x1a8] sm:$0xff] }
 0x476   :  { %2305 = vmatpush.msra.mxu3 %v2101_v14  ;;  %6909 = vst [vmem:[#allocation46_spill] sm:$0xff] %v5566_v10  ;;  %v6911_v46 = vld [vmem:[#allocation54_spill] sm:$0xff]  ;;  %v5587_v14 = vld [vmem:[#allocation9 + $0x1f0] sm:$0xff] }
 0x477   :  { %2224 = vmatpush.msra.mxu1 %v2095_v57  ;;  %v5599_v57 = vld [vmem:[#allocation9 + $0x188] sm:$0xff] }
 0x4d4   :  { %v1734_v35 = vpop.f32.mrf.mxu0  ;;  %v1754_v63 = vpop.f32.mrf.mxu1 }
 0x4d5   :  { %v1797_v56 = vadd.f32 %v1734_v35, %v167_v34  ;;  %v1798_v18 = vadd.f32 %v1754_v63, %v208_v0  ;;  %v2100_v34 = vld [vmem:[#allocation7 + $0x30] sm:$0xff]  ;;  %v249_v35 = vadd.f32 %v6903_v8, %v6869_v13  ;;  %v2094_v63 = vld [vmem:[#allocation7] sm:$0xff]  ;;  %v5593_v8 = vld [vmem:[#allocation9 + $0x1b8] sm:$0xff] }
 0x4d6   :  { %2264 = vmatpush.msra.mxu2 %v2100_v34  ;;  %2183 = vmatpush.msrb.mxu0 %v2094_v63  ;;  %v6912_v34 = vld [vmem:[#allocation56_spill] sm:$0xff]  ;;  %6913 = vst [vmem:[#allocation48_spill] sm:$0xff] %v5593_v8  ;;  %v5597_v63 = vld [vmem:[#allocation9 + $0x180] sm:$0xff] }
 0x4d7   :  { %v3753_v44 = vmul.f32 -1.442695, %v1797_v56  ;;  %v3754_v26 = vmul.f32 -1.442695, %v1798_v18  ;;  %v2097_v56 = vld [vmem:[#allocation7 + $0x18] sm:$0xff]  ;;  %6914 = vst [vmem:[#allocation49_spill] sm:$0xff] %v5597_v63 }
 0x4d8   :  { %2265 = vmatpush.msra.mxu2 %v2096_v49  ;;  %2306 = vmatpush.msra.mxu3 %v2097_v56  ;;  %v5609_v49 = vld [vmem:[#allocation9 + $0x198] sm:$0xff]  ;;  %v5611_v56 = vld [vmem:[#allocation9 + $0x190] sm:$0xff] }
 0x4d9   :  { %3893 = vpow2.f32 %v3753_v44 }
 0x4da   :  { %3895 = vpow2.f32 %v3754_v26 }
 0x4db   :  { %v1794_v61 = vpop.f32.mrf.mxu3  ;;  %v1774_v60 = vpop.f32.mrf.mxu2 }
 0x4dc   :  { %v1800_v23 = vadd.f32 %v1794_v61, %v290_v28  ;;  %v1799_v6 = vadd.f32 %v1774_v60, %v249_v35  ;;  %v5568_v60 = vld [vmem:[#allocation9 + $0x1d8] sm:$0xff]  ;;  %v5595_v35 = vld [vmem:[#allocation9 + $0x1b0] sm:$0xff] }
 0x4dd   :  { %6910 = vst [vmem:[#allocation47_spill] sm:$0xff] %v5568_v60 }
 0x4de   :  { %v3755_v37 = vmul.f32 -1.442695, %v1800_v23 }
 0x4df   :  { %v3894_v39 = vpop.eup %3893 }
 0x4e0   :  { %v3896_v12 = vpop.eup %3895  ;;  %v5519_v15 = vadd.f32 1.0, %v3894_v39  ;;  %3897 = vpow2.f32 %v3755_v37 }
 0x4e1   :  { %v5521_v47 = vadd.f32 1.0, %v3896_v12 }
 0x4e2   :  { %3899 = vrcp.f32 %v5519_v15  ;;  %v1816_v40 = vand.u32 2147483648, %v5519_v15  ;;  %v1814_v25 = vand.u32 2147483647, %v5519_v15  ;;  %vm1810_vm11 = vweird.f32 %v5519_v15 }
 0x4e3   :  { %3901 = vrcp.f32 %v5521_v47  ;;  %v1835_v27 = vand.u32 2147483648, %v5521_v47  ;;  %v1833_v62 = vand.u32 2147483647, %v5521_v47  ;;  %vm1829_vm12 = vweird.f32 %v5521_v47 }
 0x4e4   :  { %v1817_v50 = vor.u32 1.1754944e-38, %v1816_v40  ;;  %vm1815_vm15 = vcmp.eq.f32.partialorder %v1814_v25, 8.507059e+37  ;;  %v5629_v40 = vld [vmem:[#allocation9 + $0x148] sm:$0xff] }
 0x4e5   :  { %v1836_v11 = vor.u32 1.1754944e-38, %v1835_v27  ;;  %vm1834_vm0 = vcmp.eq.f32.partialorder %v1833_v62, 8.507059e+37  ;;  %v5631_v27 = vld [vmem:[#allocation9 + $0x158] sm:$0xff] }
 0x4e6   :  { %v3898_v0 = vpop.eup %3897 }
 0x4e7   :  { %v1843_v51 = vadd.f32 1.0, %v3898_v0  ;;  %v5590_v0 = vld [vmem:[#allocation9 + $0x1d0] sm:$0xff] }
 0x4e8   :  { %v3900_v18 = vpop.eup %3899 }
 0x4e9   :  { %v3902_v41 = vpop.eup %3901  ;;  %v1806_v4 = vmul.f32 %v3900_v18, %v5519_v15  ;;  %3903 = vrcp.f32 %v1843_v51  ;;  %vm1811_vm9 = vweird.f32 %v3900_v18  ;;  %v1855_v52 = vand.u32 2147483648, %v1843_v51 }
 0x4ea   :  { %v1825_v17 = vmul.f32 %v3902_v41, %v5521_v47  ;;  %3905 = vtanh.f32 %v1799_v6  ;;  %vm1830_vm10 = vweird.f32 %v3902_v41  ;;  %vm1812_vm13 = vmor %vm1810_vm11, %vm1811_vm9  ;;  %vm1849_vm2 = vweird.f32 %v1843_v51  ;;  %v5619_v6 = vld [vmem:[#allocation9 + $0x170] sm:$0xff] }
 0x4eb   :  { %v1807_v44 = vsub.f32 1.0, %v1806_v4  ;;  %vm1831_vm14 = vmor %vm1829_vm12, %vm1830_vm10  ;;  %v1853_v3 = vand.u32 2147483647, %v1843_v51  ;;  %v1856_v15 = vor.u32 1.1754944e-38, %v1855_v52 }
 0x4ec   :  { %v1826_v26 = vsub.f32 1.0, %v1825_v17  ;;  %v6916_v17 = vld [vmem:[#allocation31_spill] sm:$0xff] }
 0x4ed   :  { %v1808_v38 = vmul.f32 %v3900_v18, %v1807_v44  ;;  %vm1854_vm4 = vcmp.eq.f32.partialorder %v1853_v3, 8.507059e+37  ;;  %v211_v44 = vadd.f32 %v6916_v17, %v6899_v54  ;;  %v5642_v54 = vld [vmem:[#allocation9 + $0x138] sm:$0xff]  ;;  %v5677_v3 = vld [vmem:[#allocation9 + $0xa0] sm:$0xff] }
 0x4ee   :  { %v1827_v21 = vmul.f32 %v3902_v41, %v1826_v26  ;;  %v5627_v26 = vld [vmem:[#allocation9 + $0x140] sm:$0xff]  ;;  %6919 = vst [vmem:[#allocation51_spill] sm:$0xff] %v5677_v3 }
 0x4ef   :  { %v3904_v28 = vpop.eup %3903  ;;  %v1809_v5 = vadd.f32 %v3900_v18, %v1808_v38 }
 0x4f0   :  { %v1828_v42 = vadd.f32 %v3902_v41, %v1827_v21  ;;  %v1845_v61 = vmul.f32 %v3904_v28, %v1843_v51  ;;  %v3906_v24 = vpop.eup %3905  ;;  %vm1850_vm1 = vweird.f32 %v3904_v28  ;;  %v5607_v51 = vld [vmem:[#allocation9 + $0x168] sm:$0xff]  ;;  %v5635_v21 = vld [vmem:[#allocation9 + $0x150] sm:$0xff] }
 0x4f1   :  { %v1813_v23 = vsel %vm1812_vm13, %v3900_v18, %v1809_v5  ;;  %vm1851_vm3 = vmor %vm1849_vm2, %vm1850_vm1  ;;  %v5617_v18 = vld [vmem:[#allocation9 + $0x178] sm:$0xff]  ;;  %v5639_v5 = vld [vmem:[#allocation9 + $0x128] sm:$0xff] }
 0x4f2   :  { %v1818_v43 = vsel %vm1815_vm15, %v1817_v50, %v1813_v23  ;;  %v1832_v58 = vsel %vm1831_vm14, %v3902_v41, %v1828_v42  ;;  %v1846_v1 = vsub.f32 1.0, %v1845_v61  ;;  %v6915_v41 = vld [vmem:[#allocation14_spill] sm:$0xff]  ;;  %v5647_v50 = vld [vmem:[#allocation9 + $0x130] sm:$0xff] }
 0x4f3   :  { %v1837_v37 = vsel %vm1834_vm0, %v1836_v11, %v1832_v58  ;;  %v1860_v20 = vmul.f32 %v3906_v24, %v1818_v43  ;;  %v170_v4 = vadd.f32 %v6915_v41, %v6897_v22  ;;  %v5637_v22 = vld [vmem:[#allocation9 + $0x120] sm:$0xff]  ;;  %v5651_v23 = vld [vmem:[#allocation9 + $0x108] sm:$0xff]  ;;  %v5661_v58 = vld [vmem:[#allocation9 + $0x118] sm:$0xff] }
 0x4f4   :  { %v1859_v45 = vmul.f32 %v1837_v37, %v5472_v9  ;;  %v1847_v59 = vmul.f32 %v3904_v28, %v1846_v1  ;;  %v6904_v9 = vld [vmem:[#allocation38_spill] sm:$0xff] }
 0x4f5   :  { %v5649_v11 = vld [vmem:[#allocation9 + $0x100] sm:$0xff]  ;;  %v5659_v43 = vld [vmem:[#allocation9 + $0xe8] sm:$0xff] }
 0x4f6   :  { %v5536_v39 = vadd.f32 %v1860_v20, %v1859_v45  ;;  %v1848_v55 = vadd.f32 %v3904_v28, %v1847_v59  ;;  %v5657_v24 = vld [vmem:[#allocation9 + $0xe0] sm:$0xff]  ;;  %v5666_v37 = vld [vmem:[#allocation9 + $0xc8] sm:$0xff]  ;;  %v5668_v20 = vld [vmem:[#allocation9 + $0xf8] sm:$0xff] }
 0x4f7   :  { %v5664_v1 = vld [vmem:[#allocation9 + $0xc0] sm:$0xff] }
 0x4f8   :  { %3907 = vtanh.f32 %v5536_v39  ;;  %v1852_v12 = vsel %vm1851_vm3, %v3904_v28, %v1848_v55  ;;  %v6917_v45 = vld [vmem:[#allocation34_spill] sm:$0xff]  ;;  %v5674_v55 = vld [vmem:[#allocation9 + $0xd8] sm:$0xff] }
 0x4f9   :  { %v1857_v29 = vsel %vm1854_vm4, %v1856_v15, %v1852_v12  ;;  %v293_v59 = vadd.f32 %v6917_v45, %v6901_v7  ;;  %6918 = vst [vmem:[#allocation50_spill] sm:$0xff] %v5674_v55  ;;  %v5679_v12 = vld [vmem:[#allocation9 + $0xa8] sm:$0xff]  ;;  %v5681_v15 = vld [vmem:[#allocation9 + $0x110] sm:$0xff]  ;;  %v5685_v7 = vld [vmem:[#allocation9 + $0xb8] sm:$0xff] }
 0x4fa   :  { %6920 = vst [vmem:[#allocation52_spill] sm:$0xff] %v5679_v12  ;;  %v5703_v41 = vld [vmem:[#allocation9 + $0x60] sm:$0xff] }
 0x4fb   :  { %6921 = vst [vmem:[#allocation17_spill] sm:$0xff] %v5685_v7  ;;  %v5731_v45 = vld [vmem:[#allocation9 + $0x20] sm:$0xff] }
 0x4fc   :  { %6926 = vst [vmem:[#allocation19_spill] sm:$0xff] %v5703_v41 }
 0x4fd   :  { %6933 = vst [vmem:[#allocation27_spill] sm:$0xff] %v5731_v45 }
 0x4fe   :  { %v3908_v33 = vpop.eup %3907 }
 0x4ff   :  { %v1863_v47 = vmul.f32 %v3908_v33, %v1857_v29  ;;  %v5687_v29 = vld [vmem:[#allocation9 + $0xf0] sm:$0xff] }
 0x501   :  { %1953 = vmatmul.f32.vlgmr.msra.gmra.mxu0 %v1863_v47  ;;  %1973 = vmatmul.f32.vlgmr.msrb.gmra.mxu1 %v1863_v47 }
 0x502   :  { %1993 = vmatmul.f32.vlgmr.msrb.gmra.mxu2 %v1863_v47  ;;  %2013 = vmatmul.f32.vlgmr.msrb.gmra.mxu3 %v1863_v47 }
 0x503   :  { %2432 = vmatpush.msra.mxu0 %v5551_v32  ;;  %2452 = vmatpush.msrb.mxu1 %v5553_v2 }
 0x504   :  { %2492 = vmatpush.msrb.mxu3 %v5561_v36  ;;  %2472 = vmatpush.msrb.mxu2 %v5587_v14 }
 0x505   :  { %2433 = vmatpush.msra.mxu0 %v5555_v30  ;;  %2453 = vmatpush.msrb.mxu1 %v5559_v31 }
 0x506   :  { %2493 = vmatpush.msrb.mxu3 %v5568_v60  ;;  %2473 = vmatpush.msrb.mxu2 %v5590_v0 }
 0x507   :  { %2434 = vmatpush.msra.mxu0 %v5564_v48  ;;  %2454 = vmatpush.msrb.mxu1 %v5566_v10 }
 0x508   :  { %2494 = vmatpush.msrb.mxu3 %v5593_v8  ;;  %2474 = vmatpush.msrb.mxu2 %v5595_v35 }
 0x509   :  { %2184 = vmatmul.f32.vlgmr.msrb.gmra.mxu0 %v6904_v9  ;;  %2225 = vmatmul.f32.vlgmr.msra.gmra.mxu1 %v6904_v9 }
 0x50a   :  { %2266 = vmatmul.f32.vlgmr.msra.gmra.mxu2 %v6904_v9  ;;  %2307 = vmatmul.f32.vlgmr.msra.gmra.mxu3 %v6904_v9  ;;  %v5693_v9 = vld [vmem:[#allocation9 + $0x88] sm:$0xff] }
 0x50b   :  { %2435 = vmatpush.msra.mxu0 %v5597_v63  ;;  %2455 = vmatpush.msrb.mxu1 %v5599_v57  ;;  %6923 = vst [vmem:[#allocation21_spill] sm:$0xff] %v5693_v9 }
 0x50c   :  { %2495 = vmatpush.msrb.mxu3 %v5609_v49  ;;  %2475 = vmatpush.msrb.mxu2 %v5611_v56 }
 0x50d   :  { %2456 = vmatpush.msrb.mxu1 %v5607_v51 }
 0x50e   :  { %2496 = vmatpush.msrb.mxu3 %v5617_v18  ;;  %2476 = vmatpush.msrb.mxu2 %v5619_v6 }
 0x50f   :  { %2457 = vmatpush.msrb.mxu1 %v5629_v40 }
 0x510   :  { %2497 = vmatpush.msrb.mxu3 %v5631_v27  ;;  %2477 = vmatpush.msrb.mxu2 %v5635_v21 }
 0x511   :  { %2187 = vmatmul.f32.gmra.mxu0 %v6905_v19  ;;  %2228 = vmatmul.f32.gmra.mxu1 %v6905_v19 }
 0x512   :  { %2269 = vmatmul.f32.gmra.mxu2 %v6905_v19  ;;  %2310 = vmatmul.f32.gmra.mxu3 %v6905_v19 }
 0x513   :  { %2458 = vmatpush.msrb.mxu1 %v5639_v5  ;;  %2498 = vmatpush.msrb.mxu3 %v5642_v54 }
 0x514   :  { %2478 = vmatpush.msrb.mxu2 %v5647_v50 }
 0x515   :  { %2459 = vmatpush.msrb.mxu1 %v5651_v23  ;;  %2499 = vmatpush.msrb.mxu3 %v5661_v58 }
 0x516   :  { %2479 = vmatpush.msrb.mxu2 %v5681_v15 }
 0x517   :  { %2460 = vmatpush.msrb.mxu1 %v5659_v43  ;;  %2500 = vmatpush.msrb.mxu3 %v5668_v20 }
 0x518   :  { %2480 = vmatpush.msrb.mxu2 %v5687_v29 }
 0x519   :  { %2190 = vmatmul.f32.gmra.mxu0 %v6906_v53  ;;  %2231 = vmatmul.f32.gmra.mxu1 %v6906_v53 }
 0x51a   :  { %2272 = vmatmul.f32.gmra.mxu2 %v6906_v53  ;;  %2313 = vmatmul.f32.gmra.mxu3 %v6906_v53  ;;  %v5697_v53 = vld [vmem:[#allocation9 + $0x98] sm:$0xff] }
 0x51b   :  { %2461 = vmatpush.msrb.mxu1 %v5666_v37  ;;  %2501 = vmatpush.msrb.mxu3 %v5674_v55  ;;  %6924 = vst [vmem:[#allocation37_spill] sm:$0xff] %v5697_v53 }
 0x51d   :  { %2462 = vmatpush.msrb.mxu1 %v5679_v12  ;;  %2502 = vmatpush.msrb.mxu3 %v5685_v7 }
 0x51f   :  { %2463 = vmatpush.msrb.mxu1 %v5693_v9  ;;  %2503 = vmatpush.msrb.mxu3 %v5697_v53  ;;  %v5755_v53 = vld [vmem:[#allocation9 + $0x18] sm:$0xff] }
 0x520   :  { %6942 = vst [vmem:[#allocation43_spill] sm:$0xff] %v5755_v53 }
 0x521   :  { %2193 = vmatmul.f32.gmra.mxu0 %v6911_v46  ;;  %2234 = vmatmul.f32.gmra.mxu1 %v6911_v46 }
 0x522   :  { %2275 = vmatmul.f32.gmra.mxu2 %v6911_v46  ;;  %2316 = vmatmul.f32.gmra.mxu3 %v6911_v46  ;;  %v5699_v46 = vld [vmem:[#allocation9 + $0xd0] sm:$0xff] }
 0x523   :  { %6925 = vst [vmem:[#allocation20_spill] sm:$0xff] %v5699_v46  ;;  %2481 = vmatpush.msrb.mxu2 %v5699_v46 }
 0x529   :  { %2196 = vmatmul.f32.gmra.mxu0 %v6912_v34  ;;  %2237 = vmatmul.f32.gmra.mxu1 %v6912_v34 }
 0x52a   :  { %2278 = vmatmul.f32.gmra.mxu2 %v6912_v34  ;;  %2319 = vmatmul.f32.gmra.mxu3 %v6912_v34 }
 0x531   :  { %2199 = vmatmul.f32.gmra.mxu0 %v5499_v16  ;;  %2240 = vmatmul.f32.gmra.mxu1 %v5499_v16 }
 0x532   :  { %2281 = vmatmul.f32.gmra.mxu2 %v5499_v16  ;;  %2322 = vmatmul.f32.gmra.mxu3 %v5499_v16  ;;  %v5602_v16 = vld [vmem:[#allocation9 + $0x160] sm:$0xff] }
 0x533   :  { %2436 = vmatpush.msra.mxu0 %v5602_v16 }
 0x535   :  { %2437 = vmatpush.msra.mxu0 %v5627_v26 }
 0x537   :  { %2438 = vmatpush.msra.mxu0 %v5637_v22 }
 0x539   :  { %2202 = vmatmul.f32.gmra.mxu0 %v1863_v47  ;;  %2243 = vmatmul.f32.gmra.mxu1 %v1863_v47 }
 0x53a   :  { %2284 = vmatmul.f32.gmra.mxu2 %v1863_v47  ;;  %2325 = vmatmul.f32.gmra.mxu3 %v1863_v47  ;;  %v5691_v47 = vld [vmem:[#allocation9 + $0x80] sm:$0xff] }
 0x53b   :  { %2439 = vmatpush.msra.mxu0 %v5649_v11  ;;  %6922 = vst [vmem:[#allocation18_spill] sm:$0xff] %v5691_v47 }
 0x53d   :  { %2440 = vmatpush.msra.mxu0 %v5657_v24 }
 0x53f   :  { %2441 = vmatpush.msra.mxu0 %v5664_v1 }
 0x541   :  { %2442 = vmatpush.msra.mxu0 %v5677_v3 }
 0x543   :  { %2443 = vmatpush.msra.mxu0 %v5691_v47 }
 0x545   :  { %2444 = vmatpush.msra.mxu0 %v5703_v41 }
 0x57e   :  { %v1954_v38 = vpop.f32.mrf.mxu0  ;;  %v1974_v25 = vpop.f32.mrf.mxu1 }
 0x57f   :  { %v2017_v62 = vadd.f32 %v1954_v38, %v170_v4  ;;  %v2018_v28 = vadd.f32 %v1974_v25, %v211_v44  ;;  %v5705_v4 = vld [vmem:[#allocation9 + $0x68] sm:$0xff]  ;;  %v5711_v38 = vld [vmem:[#allocation9 + $0xb0] sm:$0xff]  ;;  %v5713_v25 = vld [vmem:[#allocation9 + $0x78] sm:$0xff] }
 0x580   :  { %6927 = vst [vmem:[#allocation22_spill] sm:$0xff] %v5705_v4  ;;  %2464 = vmatpush.msrb.mxu1 %v5705_v4  ;;  %2482 = vmatpush.msrb.mxu2 %v5711_v38  ;;  %v6939_v4 = vld [vmem:[#allocation36_spill] sm:$0xff] }
 0x581   :  { %v3756_v42 = vmul.f32 -1.442695, %v2017_v62  ;;  %v3757_v61 = vmul.f32 -1.442695, %v2018_v28  ;;  %6928 = vst [vmem:[#allocation24_spill] sm:$0xff] %v5711_v38  ;;  %v5719_v28 = vld [vmem:[#allocation9 + $0x40] sm:$0xff]  ;;  %2504 = vmatpush.msrb.mxu3 %v5713_v25  ;;  %v252_v41 = vadd.f32 %v6939_v4, %v6869_v13 }
 0x582   :  { %6929 = vst [vmem:[#allocation23_spill] sm:$0xff] %v5713_v25  ;;  %2445 = vmatpush.msra.mxu0 %v5719_v28  ;;  %v5763_v13 = vld [vmem:[#allocation9 + $0x30] sm:$0xff] }
 0x583   :  { %3909 = vpow2.f32 %v3756_v42  ;;  %6930 = vst [vmem:[#allocation16_spill] sm:$0xff] %v5719_v28  ;;  %v5721_v42 = vld [vmem:[#allocation9 + $0x48] sm:$0xff]  ;;  %v5753_v28 = vld [vmem:[#allocation9 + $0x38] sm:$0xff] }
 0x584   :  { %3911 = vpow2.f32 %v3757_v61  ;;  %6931 = vst [vmem:[#allocation25_spill] sm:$0xff] %v5721_v42  ;;  %v5726_v61 = vld [vmem:[#allocation9 + $0x90] sm:$0xff]  ;;  %2465 = vmatpush.msrb.mxu1 %v5721_v42  ;;  %2446 = vmatpush.msra.mxu0 %v5731_v45 }
 0x585   :  { %v2014_v52 = vpop.f32.mrf.mxu3  ;;  %6932 = vst [vmem:[#allocation28_spill] sm:$0xff] %v5726_v61  ;;  %2483 = vmatpush.msrb.mxu2 %v5726_v61  ;;  %v5751_v42 = vld [vmem:[#allocation9 + $0x50] sm:$0xff] }
 0x586   :  { %v2020_v33 = vadd.f32 %v2014_v52, %v293_v59  ;;  %v5733_v59 = vld [vmem:[#allocation9 + $0x28] sm:$0xff]  ;;  %v5735_v52 = vld [vmem:[#allocation9 + $0x58] sm:$0xff]  ;;  %6940 = vst [vmem:[#allocation41_spill] sm:$0xff] %v5751_v42 }
 0x587   :  { %6934 = vst [vmem:[#allocation39_spill] sm:$0xff] %v5733_v59  ;;  %2505 = vmatpush.msrb.mxu3 %v5735_v52  ;;  %2466 = vmatpush.msrb.mxu1 %v5733_v59 }
 0x588   :  { %v3758_v19 = vmul.f32 -1.442695, %v2020_v33  ;;  %6935 = vst [vmem:[#allocation57_spill] sm:$0xff] %v5735_v52  ;;  %v5739_v33 = vld [vmem:[#allocation9 + $0x70] sm:$0xff] }
 0x589   :  { %v3910_v34 = vpop.eup %3909  ;;  %6936 = vst [vmem:[#allocation58_spill] sm:$0xff] %v5739_v33  ;;  %2484 = vmatpush.msrb.mxu2 %v5739_v33  ;;  %2506 = vmatpush.msrb.mxu3 %v5753_v28 }
 0x58a   :  { %v3912_v17 = vpop.eup %3911  ;;  %v5707_v44 = vadd.f32 1.0, %v3910_v34  ;;  %3913 = vpow2.f32 %v3758_v19  ;;  %v1994_v19 = vpop.f32.mrf.mxu2  ;;  %v5743_v34 = vld [vmem:[#allocation9] sm:$0xff]  ;;  %6941 = vst [vmem:[#allocation42_spill] sm:$0xff] %v5753_v28  ;;  %v5770_v28 = vld [vmem:[#allocation9 + $0x10] sm:$0xff] }
 0x58b   :  { %v5715_v62 = vadd.f32 1.0, %v3912_v17  ;;  %6937 = vst [vmem:[#allocation55_spill] sm:$0xff] %v5743_v34  ;;  %v5745_v17 = vld [vmem:[#allocation9 + $0x8] sm:$0xff]  ;;  %v2019_v9 = vadd.f32 %v1994_v19, %v252_v41  ;;  %2447 = vmatpush.msra.mxu0 %v5743_v34  ;;  %2485 = vmatpush.msrb.mxu2 %v5751_v42 }
 0x58c   :  { %3915 = vrcp.f32 %v5707_v44  ;;  %6938 = vst [vmem:[#allocation59_spill] sm:$0xff] %v5745_v17  ;;  %2467 = vmatpush.msrb.mxu1 %v5745_v17  ;;  %2507 = vmatpush.msrb.mxu3 %v5755_v53  ;;  %v2036_v17 = vand.u32 2147483648, %v5707_v44  ;;  %vm2030_vm7 = vweird.f32 %v5707_v44 }
 0x58d   :  { %3917 = vrcp.f32 %v5715_v62  ;;  %6943 = vst [vmem:[#allocation26_spill] sm:$0xff] %v5763_v13  ;;  %2583 = vmatpush.msrb.mxu0 %v5551_v32  ;;  %2486 = vmatpush.msrb.mxu2 %v5763_v13  ;;  %v2055_v53 = vand.u32 2147483648, %v5715_v62  ;;  %v2034_v32 = vand.u32 2147483647, %v5707_v44  ;;  %vm2049_vm8 = vweird.f32 %v5715_v62 }
 0x58e   :  { %6944 = vst [vmem:[#allocation15_spill] sm:$0xff] %v5770_v28  ;;  %2603 = vmatpush.msra.mxu1 %v5553_v2  ;;  %2643 = vmatpush.msra.mxu3 %v5561_v36 }
 0x58f   :  { %2584 = vmatpush.msrb.mxu0 %v5555_v30  ;;  %2487 = vmatpush.msrb.mxu2 %v5770_v28  ;;  %vm2035_vm11 = vcmp.eq.f32.partialorder %v2034_v32, 8.507059e+37 }
 0x590   :  { %v3914_v25 = vpop.eup %3913  ;;  %2604 = vmatpush.msra.mxu1 %v5559_v31  ;;  %2644 = vmatpush.msra.mxu3 %v5568_v60 }
 0x591   :  { %v5757_v61 = vadd.f32 1.0, %v3914_v25  ;;  %2623 = vmatpush.msra.mxu2 %v5587_v14  ;;  %2585 = vmatpush.msrb.mxu0 %v5564_v48 }
 0x592   :  { %v3916_v52 = vpop.eup %3915  ;;  %2605 = vmatpush.msra.mxu1 %v5566_v10  ;;  %2645 = vmatpush.msra.mxu3 %v5593_v8 }
 0x593   :  { %v3918_v4 = vpop.eup %3917  ;;  %v2026_v59 = vmul.f32 %v3916_v52, %v5707_v44  ;;  %3919 = vrcp.f32 %v5757_v61  ;;  %vm2031_vm5 = vweird.f32 %v3916_v52  ;;  %2624 = vmatpush.msra.mxu2 %v5590_v0  ;;  %2586 = vmatpush.msrb.mxu0 %v5597_v63  ;;  %v2056_v44 = vor.u32 1.1754944e-38, %v2055_v53 }
 0x594   :  { %v2045_v25 = vmul.f32 %v3918_v4, %v5715_v62  ;;  %3921 = vtanh.f32 %v2019_v9  ;;  %vm2050_vm6 = vweird.f32 %v3918_v4  ;;  %vm2032_vm9 = vmor %vm2030_vm7, %vm2031_vm5  ;;  %2606 = vmatpush.msra.mxu1 %v5599_v57  ;;  %2646 = vmatpush.msra.mxu3 %v5609_v49  ;;  %vm2069_vm14 = vweird.f32 %v5757_v61 }
 0x595   :  { %v2027_v41 = vsub.f32 1.0, %v2026_v59  ;;  %vm2051_vm10 = vmor %vm2049_vm8, %vm2050_vm6  ;;  %2625 = vmatpush.msra.mxu2 %v5595_v35  ;;  %2587 = vmatpush.msrb.mxu0 %v5602_v16 }
 0x596   :  { %v2046_v19 = vsub.f32 1.0, %v2045_v25  ;;  %v2053_v25 = vand.u32 2147483647, %v5715_v62  ;;  %2607 = vmatpush.msra.mxu1 %v5607_v51  ;;  %2647 = vmatpush.msra.mxu3 %v5617_v18 }
 0x597   :  { %v2028_v34 = vmul.f32 %v3916_v52, %v2027_v41  ;;  %v2037_v41 = vor.u32 1.1754944e-38, %v2036_v17  ;;  %2626 = vmatpush.msra.mxu2 %v5611_v56  ;;  %2588 = vmatpush.msrb.mxu0 %v5627_v26 }
 0x598   :  { %v2047_v59 = vmul.f32 %v3918_v4, %v2046_v19  ;;  %vm2054_vm12 = vcmp.eq.f32.partialorder %v2053_v25, 8.507059e+37  ;;  %2608 = vmatpush.msra.mxu1 %v5629_v40  ;;  %2648 = vmatpush.msra.mxu3 %v5631_v27  ;;  %v6945_v25 = vld [vmem:[#allocation21_spill] sm:$0xff] }
 0x599   :  { %v5786_v9 = vpop.eup %3919  ;;  %v2029_v31 = vadd.f32 %v3916_v52, %v2028_v34  ;;  %2627 = vmatpush.msra.mxu2 %v5619_v6  ;;  %2589 = vmatpush.msrb.mxu0 %v5637_v22 }
 0x59a   :  { %v2048_v19 = vadd.f32 %v3918_v4, %v2047_v59  ;;  %v2065_v60 = vmul.f32 %v5786_v9, %v5757_v61  ;;  %v3922_v62 = vpop.eup %3921  ;;  %vm2070_vm13 = vweird.f32 %v5786_v9  ;;  %2609 = vmatpush.msra.mxu1 %v5639_v5  ;;  %2649 = vmatpush.msra.mxu3 %v5642_v54 }
 0x59b   :  { %v2033_v34 = vsel %vm2032_vm9, %v3916_v52, %v2029_v31  ;;  %2628 = vmatpush.msra.mxu2 %v5635_v21  ;;  %2590 = vmatpush.msrb.mxu0 %v5649_v11  ;;  %vm2071_vm15 = vmor %vm2069_vm14, %vm2070_vm13 }
 0x59c   :  { %v2038_v8 = vsel %vm2035_vm11, %v2037_v41, %v2033_v34  ;;  %v2052_v17 = vsel %vm2051_vm10, %v3918_v4, %v2048_v19  ;;  %v2066_v59 = vsub.f32 1.0, %v2065_v60  ;;  %2610 = vmatpush.msra.mxu1 %v5651_v23  ;;  %2650 = vmatpush.msra.mxu3 %v5661_v58  ;;  %v6947_v41 = vld [vmem:[#allocation28_spill] sm:$0xff]  ;;  %v6948_v19 = vld [vmem:[#allocation19_spill] sm:$0xff] }
 0x59d   :  { %v2057_v10 = vsel %vm2054_vm12, %v2056_v44, %v2052_v17  ;;  %v2080_v63 = vmul.f32 %v3922_v62, %v2038_v8  ;;  %2629 = vmatpush.msra.mxu2 %v5647_v50  ;;  %2591 = vmatpush.msrb.mxu0 %v5657_v24  ;;  %v6949_v44 = vld [vmem:[#allocation22_spill] sm:$0xff]  ;;  %v6950_v34 = vld [vmem:[#allocation23_spill] sm:$0xff]  ;;  %v6951_v62 = vld [vmem:[#allocation16_spill] sm:$0xff] }
 0x59e   :  { %v2079_v32 = vmul.f32 %v2057_v10, %v5536_v39  ;;  %v2067_v31 = vmul.f32 %v5786_v9, %v2066_v59  ;;  %v2075_v39 = vand.u32 2147483648, %v5757_v61  ;;  %v2073_v10 = vand.u32 2147483647, %v5757_v61  ;;  %2611 = vmatpush.msra.mxu1 %v5659_v43  ;;  %2651 = vmatpush.msra.mxu3 %v5668_v20  ;;  %v6952_v17 = vld [vmem:[#allocation25_spill] sm:$0xff] }
 0x59f   :  { %2630 = vmatpush.msra.mxu2 %v5681_v15  ;;  %2592 = vmatpush.msrb.mxu0 %v5664_v1  ;;  %v6953_v59 = vld [vmem:[#allocation57_spill] sm:$0xff] }
 0x5a0   :  { %v2081_v60 = vadd.f32 %v2080_v63, %v2079_v32  ;;  %v2068_v8 = vadd.f32 %v5786_v9, %v2067_v31  ;;  %v2076_v53 = vor.u32 1.1754944e-38, %v2075_v39  ;;  %vm2074_vm0 = vcmp.eq.f32.partialorder %v2073_v10, 8.507059e+37  ;;  %2612 = vmatpush.msra.mxu1 %v5666_v37  ;;  %2652 = vmatpush.msra.mxu3 %v5674_v55  ;;  %v6955_v31 = vld [vmem:[#allocation39_spill] sm:$0xff] }
 0x5a1   :  { %2631 = vmatpush.msra.mxu2 %v5687_v29  ;;  %2593 = vmatpush.msrb.mxu0 %v5677_v3  ;;  %v6954_v32 = vmov 0.0   ;;  %v6958_v39 = vld [vmem:[#allocation59_spill] sm:$0xff] }
 0x5a2   :  { %3923 = vtanh.f32 %v2081_v60  ;;  %v2072_v63 = vsel %vm2071_vm15, %v5786_v9, %v2068_v8  ;;  %2613 = vmatpush.msra.mxu1 %v5679_v12  ;;  %2653 = vmatpush.msra.mxu3 %v5685_v7  ;;  %v6946_v9 = vld [vmem:[#allocation37_spill] sm:$0xff]  ;;  %v6956_v60 = vld [vmem:[#allocation42_spill] sm:$0xff]  ;;  %v6957_v8 = vld [vmem:[#allocation55_spill] sm:$0xff] }
 0x5a3   :  { %v2077_v52 = vsel %vm2074_vm0, %v2076_v53, %v2072_v63  ;;  %2632 = vmatpush.msra.mxu2 %v5699_v46  ;;  %2594 = vmatpush.msrb.mxu0 %v5691_v47  ;;  %v6959_v10 = vld [vmem:[#allocation43_spill] sm:$0xff]  ;;  %v6960_v63 = vld [vmem:[#allocation44_spill] sm:$0xff]  ;;  %v6961_v53 = vld [vmem:[#allocation45_spill] sm:$0xff] }
 0x5a4   :  { %2614 = vmatpush.msra.mxu1 %v6945_v25  ;;  %2654 = vmatpush.msra.mxu3 %v6946_v9 }
 0x5a5   :  { %2633 = vmatpush.msra.mxu2 %v5711_v38  ;;  %2595 = vmatpush.msrb.mxu0 %v6948_v19 }
 0x5a6   :  { %2615 = vmatpush.msra.mxu1 %v6949_v44  ;;  %2655 = vmatpush.msra.mxu3 %v6950_v34 }
 0x5a7   :  { %2634 = vmatpush.msra.mxu2 %v6947_v41  ;;  %2596 = vmatpush.msrb.mxu0 %v6951_v62 }
 0x5a8   :  { %v3924_v61 = vpop.eup %3923  ;;  %2616 = vmatpush.msra.mxu1 %v6952_v17  ;;  %2656 = vmatpush.msra.mxu3 %v6953_v59 }
 0x5a9   :  { %v2083_v4 = vmul.f32 %v3924_v61, %v2077_v52  ;;  %2635 = vmatpush.msra.mxu2 %v5739_v33  ;;  %2597 = vmatpush.msrb.mxu0 %v5731_v45  ;;  %v6962_v61 = vld [vmem:[#allocation47_spill] sm:$0xff]  ;;  %v6963_v52 = vld [vmem:[#allocation46_spill] sm:$0xff] }
 0x5aa   :  { %2617 = vmatpush.msra.mxu1 %v6955_v31  ;;  %2657 = vmatpush.msra.mxu3 %v6956_v60 }
 0x5ab   :  { %2205 = vmatmul.f32.gmra.mxu0 %v2083_v4  ;;  %2246 = vmatmul.f32.gmra.mxu1 %v2083_v4 }
 0x5ac   :  { %2287 = vmatmul.f32.gmra.mxu2 %v2083_v4  ;;  %2328 = vmatmul.f32.gmra.mxu3 %v2083_v4  ;;  %v6964_v4 = vld [vmem:[#allocation48_spill] sm:$0xff] }
 0x5ad   :  { %2636 = vmatpush.msra.mxu2 %v5751_v42  ;;  %2598 = vmatpush.msrb.mxu0 %v6957_v8 }
 0x5ae   :  { %2618 = vmatpush.msra.mxu1 %v6958_v39  ;;  %2658 = vmatpush.msra.mxu3 %v6959_v10 }
 0x5af   :  { %2637 = vmatpush.msra.mxu2 %v5763_v13 }
 0x5b1   :  { %2638 = vmatpush.msra.mxu2 %v5770_v28 }
 0x5b3   :  { %2448 = vmatmul.f32.vlgmr.msra.gmra.mxu0 %v6954_v32  ;;  %2468 = vmatmul.f32.vlgmr.msrb.gmra.mxu1 %v6954_v32 }
 0x5b4   :  { %2488 = vmatmul.f32.vlgmr.msrb.gmra.mxu2 %v6954_v32  ;;  %2508 = vmatmul.f32.vlgmr.msrb.gmra.mxu3 %v6954_v32  ;;  %v6965_v32 = vld [vmem:[#allocation49_spill] sm:$0xff] }
 0x5b5   :  { %2734 = vmatpush.msra.mxu0 %v6960_v63  ;;  %2754 = vmatpush.msrb.mxu1 %v5553_v2 }
 0x5b6   :  { %2774 = vmatpush.msrb.mxu2 %v5587_v14  ;;  %2794 = vmatpush.msrb.mxu3 %v5561_v36 }
 0x5b7   :  { %2735 = vmatpush.msra.mxu0 %v5555_v30  ;;  %2755 = vmatpush.msrb.mxu1 %v6961_v53 }
 0x5b8   :  { %2775 = vmatpush.msrb.mxu2 %v5590_v0  ;;  %2795 = vmatpush.msrb.mxu3 %v6962_v61 }
 0x5b9   :  { %2736 = vmatpush.msra.mxu0 %v5564_v48  ;;  %2756 = vmatpush.msrb.mxu1 %v6963_v52 }
 0x5ba   :  { %2776 = vmatpush.msrb.mxu2 %v5595_v35  ;;  %2796 = vmatpush.msrb.mxu3 %v6964_v4 }
 0x5bb   :  { %2737 = vmatpush.msra.mxu0 %v6965_v32  ;;  %2757 = vmatpush.msrb.mxu1 %v5599_v57 }
 0x5bc   :  { %2777 = vmatpush.msrb.mxu2 %v5611_v56  ;;  %2797 = vmatpush.msrb.mxu3 %v5609_v49 }
 0x5bd   :  { %2738 = vmatpush.msra.mxu0 %v5602_v16  ;;  %2758 = vmatpush.msrb.mxu1 %v5607_v51 }
 0x5be   :  { %2778 = vmatpush.msrb.mxu2 %v5619_v6  ;;  %2798 = vmatpush.msrb.mxu3 %v5617_v18 }
 0x5bf   :  { %2739 = vmatpush.msra.mxu0 %v5627_v26  ;;  %2759 = vmatpush.msrb.mxu1 %v5629_v40 }
 0x5c0   :  { %2779 = vmatpush.msrb.mxu2 %v5635_v21  ;;  %2799 = vmatpush.msrb.mxu3 %v5631_v27 }
 0x5c1   :  { %2740 = vmatpush.msra.mxu0 %v5637_v22  ;;  %2760 = vmatpush.msrb.mxu1 %v5639_v5 }
 0x5c2   :  { %2780 = vmatpush.msrb.mxu2 %v5647_v50  ;;  %2800 = vmatpush.msrb.mxu3 %v5642_v54 }
 0x5c3   :  { %2741 = vmatpush.msra.mxu0 %v5649_v11  ;;  %2761 = vmatpush.msrb.mxu1 %v5651_v23 }
 0x5c4   :  { %2781 = vmatpush.msrb.mxu2 %v5681_v15  ;;  %2801 = vmatpush.msrb.mxu3 %v5661_v58 }
 0x5c5   :  { %2742 = vmatpush.msra.mxu0 %v5657_v24  ;;  %2762 = vmatpush.msrb.mxu1 %v5659_v43 }
 0x5c6   :  { %2782 = vmatpush.msrb.mxu2 %v5687_v29  ;;  %2802 = vmatpush.msrb.mxu3 %v5668_v20 }
 0x5c7   :  { %2743 = vmatpush.msra.mxu0 %v5664_v1  ;;  %2763 = vmatpush.msrb.mxu1 %v5666_v37 }
 0x5c8   :  { %2783 = vmatpush.msrb.mxu2 %v5699_v46  ;;  %2803 = vmatpush.msrb.mxu3 %v5674_v55 }
 0x5c9   :  { %2744 = vmatpush.msra.mxu0 %v5677_v3  ;;  %2764 = vmatpush.msrb.mxu1 %v5679_v12 }
 0x5ca   :  { %2784 = vmatpush.msrb.mxu2 %v5711_v38  ;;  %2804 = vmatpush.msrb.mxu3 %v5685_v7 }
 0x5cb   :  { %2745 = vmatpush.msra.mxu0 %v5691_v47  ;;  %2765 = vmatpush.msrb.mxu1 %v6945_v25 }
 0x5cc   :  { %2785 = vmatpush.msrb.mxu2 %v6947_v41  ;;  %2805 = vmatpush.msrb.mxu3 %v6946_v9 }
 0x5cd   :  { %2746 = vmatpush.msra.mxu0 %v6948_v19  ;;  %2766 = vmatpush.msrb.mxu1 %v6949_v44 }
 0x5ce   :  { %2786 = vmatpush.msrb.mxu2 %v5739_v33  ;;  %2806 = vmatpush.msrb.mxu3 %v6950_v34 }
 0x5cf   :  { %2747 = vmatpush.msra.mxu0 %v6951_v62  ;;  %2767 = vmatpush.msrb.mxu1 %v6952_v17  ;;  %v2185_v17 = vpop.f32.mrf.mxu0  ;;  %v2308_v62 = vpop.f32.mrf.mxu3 }
 0x5d0   :  { %2787 = vmatpush.msrb.mxu2 %v5751_v42  ;;  %2807 = vmatpush.msrb.mxu3 %v6953_v59  ;;  %v2226_v42 = vpop.f32.mrf.mxu1 }
 0x5d1   :  { %2748 = vmatpush.msra.mxu0 %v5731_v45  ;;  %2768 = vmatpush.msrb.mxu1 %v6955_v31  ;;  %v2267_v31 = vpop.f32.mrf.mxu2 }
 0x5d2   :  { %2788 = vmatpush.msrb.mxu2 %v5763_v13  ;;  %2808 = vmatpush.msrb.mxu3 %v6956_v60 }
 0x5d3   :  { %2749 = vmatpush.msra.mxu0 %v6957_v8  ;;  %2769 = vmatpush.msrb.mxu1 %v6958_v39 }
 0x5d4   :  { %2789 = vmatpush.msrb.mxu2 %v5770_v28  ;;  %2809 = vmatpush.msrb.mxu3 %v6959_v10 }
 0x5d7   :  { %v5926_v59 = vpop.f32.mrf.mxu0  ;;  %v5930_v34 = vpop.f32.mrf.mxu3 }
 0x5d8   :  { %6966 = vst [vmem:[#allocation33_spill] sm:$0xff] %v5926_v59  ;;  %v5928_v45 = vpop.f32.mrf.mxu1 }
 0x5d9   :  { %6967 = vst [vmem:[#allocation29_spill] sm:$0xff] %v5928_v45  ;;  %v5936_v8 = vpop.f32.mrf.mxu2 }
 0x5da   :  { %6968 = vst [vmem:[#allocation35_spill] sm:$0xff] %v5930_v34 }
 0x5db   :  { %6971 = vst [vmem:[#allocation38_spill] sm:$0xff] %v5936_v8 }
 0x5df   :  { %v5932_v13 = vpop.f32.mrf.mxu0  ;;  %v5938_v39 = vpop.f32.mrf.mxu3 }
 0x5e0   :  { %6969 = vst [vmem:[#allocation30_spill] sm:$0xff] %v5932_v13  ;;  %v5934_v60 = vpop.f32.mrf.mxu1 }
 0x5e1   :  { %6970 = vst [vmem:[#allocation32_spill] sm:$0xff] %v5934_v60  ;;  %v5944_v33 = vpop.f32.mrf.mxu2 }
 0x5e2   :  { %6972 = vst [vmem:[#allocation40_spill] sm:$0xff] %v5938_v39 }
 0x5e3   :  { %6975 = vst [vmem:[#allocation56_spill] sm:$0xff] %v5944_v33 }
 0x5e7   :  { %v5940_v28 = vpop.f32.mrf.mxu0  ;;  %v5946_v59 = vpop.f32.mrf.mxu3 }
 0x5e8   :  { %6973 = vst [vmem:[#allocation53_spill] sm:$0xff] %v5940_v28  ;;  %v5942_v10 = vpop.f32.mrf.mxu1 }
 0x5e9   :  { %6974 = vst [vmem:[#allocation54_spill] sm:$0xff] %v5942_v10  ;;  %v5952_v34 = vpop.f32.mrf.mxu2 }
 0x5ea   :  { %6976 = vst [vmem:[#allocation14_spill] sm:$0xff] %v5946_v59 }
 0x5eb   :  { %6979 = vst [vmem:[#allocation36_spill] sm:$0xff] %v5952_v34 }
 0x5ef   :  { %v5948_v45 = vpop.f32.mrf.mxu0  ;;  %v5954_v13 = vpop.f32.mrf.mxu3 }
 0x5f0   :  { %6977 = vst [vmem:[#allocation31_spill] sm:$0xff] %v5948_v45  ;;  %v5950_v44 = vpop.f32.mrf.mxu1 }
 0x5f1   :  { %6978 = vst [vmem:[#allocation34_spill] sm:$0xff] %v5950_v44  ;;  %v5960_v39 = vpop.f32.mrf.mxu2 }
 0x5f2   :  { %6980 = vst [vmem:[#allocation44_spill] sm:$0xff] %v5954_v13  ;;  %v2158_v13 = vld [vmem:[%s6589_s6] sm:$0xf] }
 0x5f3   :  { %6983 = vst [vmem:[#allocation46_spill] sm:$0xff] %v5960_v39  ;;  %v5981_v39 = vperm.slane %v2158_v13, 1  ;;  %v5989_v41 = vperm.slane %v2158_v13, 3 }
 0x5f5   :  { %6992 = vst [vmem:[#allocation66_spill] sm:$0xff] %v5981_v39  ;;  %v2309_v25 = vadd.f32 %v2308_v62, %v5989_v41 }
 0x5f6   :  { %6995 = vst [vmem:[#allocation69_spill] sm:$0xff] %v5989_v41 }
 0x5f7   :  { %v5956_v60 = vpop.f32.mrf.mxu0  ;;  %v5962_v28 = vpop.f32.mrf.mxu3 }
 0x5f8   :  { %6981 = vst [vmem:[#allocation45_spill] sm:$0xff] %v5956_v60  ;;  %v5958_v8 = vpop.f32.mrf.mxu1 }
 0x5f9   :  { %6982 = vst [vmem:[#allocation47_spill] sm:$0xff] %v5958_v8  ;;  %v5968_v59 = vpop.f32.mrf.mxu2  ;;  %v5979_v8 = vperm.slane %v2158_v13, 0 }
 0x5fa   :  { %6984 = vst [vmem:[#allocation48_spill] sm:$0xff] %v5962_v28 }
 0x5fb   :  { %6987 = vst [vmem:[#allocation61_spill] sm:$0xff] %v5968_v59 }
 0x5fc   :  { %6991 = vst [vmem:[#allocation65_spill] sm:$0xff] %v5979_v8 }
 0x5ff   :  { %v5964_v10 = vpop.f32.mrf.mxu0  ;;  %v5970_v45 = vpop.f32.mrf.mxu3 }
 0x600   :  { %6985 = vst [vmem:[#allocation49_spill] sm:$0xff] %v5964_v10  ;;  %v5966_v33 = vpop.f32.mrf.mxu1  ;;  %v2186_v10 = vadd.f32 %v2185_v17, %v5979_v8 }
 0x601   :  { %6986 = vst [vmem:[#allocation60_spill] sm:$0xff] %v5966_v33  ;;  %v2227_v33 = vadd.f32 %v2226_v42, %v5981_v39  ;;  %v5985_v28 = vpop.f32.mrf.mxu2 }
 0x602   :  { %6988 = vst [vmem:[#allocation62_spill] sm:$0xff] %v5970_v45 }
 0x603   :  { %6993 = vst [vmem:[#allocation67_spill] sm:$0xff] %v5985_v28 }
 0x628   :  { %v5975_v44 = vpop.f32.mrf.mxu0  ;;  %v5977_v60 = vpop.f32.mrf.mxu1 }
 0x629   :  { %6989 = vst [vmem:[#allocation63_spill] sm:$0xff] %v5975_v44 }
 0x62a   :  { %6990 = vst [vmem:[#allocation64_spill] sm:$0xff] %v5977_v60 }
 0x62f   :  { %v5987_v59 = vpop.f32.mrf.mxu3  ;;  %v5992_v47 = vpop.f32.mrf.mxu2 }
 0x630   :  { %6994 = vst [vmem:[#allocation68_spill] sm:$0xff] %v5987_v59  ;;  %v2449_v45 = vpop.f32.mrf.mxu0  ;;  %v2469_v34 = vpop.f32.mrf.mxu1 }
 0x631   :  { %v2512_v19 = vadd.f32 %v2449_v45, %v2186_v10  ;;  %v2513_v9 = vadd.f32 %v2469_v34, %v2227_v33  ;;  %6996 = vst [vmem:[#allocation70_spill] sm:$0xff] %v5992_v47  ;;  %v5994_v45 = vperm.slane %v2158_v13, 2 }
 0x633   :  { %v3759_v44 = vmul.f32 -1.442695, %v2512_v19  ;;  %v3760_v60 = vmul.f32 -1.442695, %v2513_v9  ;;  %6997 = vst [vmem:[#allocation71_spill] sm:$0xff] %v5994_v45  ;;  %v2268_v19 = vadd.f32 %v2267_v31, %v5994_v45 }
 0x635   :  { %3925 = vpow2.f32 %v3759_v44 }
 0x636   :  { %3927 = vpow2.f32 %v3760_v60 }
 0x637   :  { %v2509_v17 = vpop.f32.mrf.mxu3  ;;  %v2489_v33 = vpop.f32.mrf.mxu2 }
 0x638   :  { %v2515_v42 = vadd.f32 %v2509_v17, %v2309_v25  ;;  %v2514_v62 = vadd.f32 %v2489_v33, %v2268_v19 }
 0x63a   :  { %v3761_v39 = vmul.f32 -1.442695, %v2515_v42 }
 0x63b   :  { %v3926_v28 = vpop.eup %3925 }
 0x63c   :  { %v3928_v8 = vpop.eup %3927  ;;  %v2519_v59 = vadd.f32 1.0, %v3926_v28  ;;  %3929 = vpow2.f32 %v3761_v39 }
 0x63d   :  { %v2538_v7 = vadd.f32 1.0, %v3928_v8 }
 0x63e   :  { %3931 = vrcp.f32 %v2519_v59  ;;  %v2531_v28 = vand.u32 2147483648, %v2519_v59  ;;  %v2529_v39 = vand.u32 2147483647, %v2519_v59  ;;  %vm2525_vm3 = vweird.f32 %v2519_v59 }
 0x63f   :  { %3933 = vrcp.f32 %v2538_v7  ;;  %v2550_v8 = vand.u32 2147483648, %v2538_v7  ;;  %v2548_v41 = vand.u32 2147483647, %v2538_v7  ;;  %vm2544_vm4 = vweird.f32 %v2538_v7 }
 0x640   :  { %v2532_v33 = vor.u32 1.1754944e-38, %v2531_v28  ;;  %vm2530_vm6 = vcmp.eq.f32.partialorder %v2529_v39, 8.507059e+37 }
 0x641   :  { %v2551_v45 = vor.u32 1.1754944e-38, %v2550_v8  ;;  %vm2549_vm8 = vcmp.eq.f32.partialorder %v2548_v41, 8.507059e+37 }
 0x642   :  { %v3930_v9 = vpop.eup %3929 }
 0x643   :  { %v2558_v44 = vadd.f32 1.0, %v3930_v9 }
 0x644   :  { %v3932_v34 = vpop.eup %3931 }
 0x645   :  { %v3934_v60 = vpop.eup %3933  ;;  %v2521_v10 = vmul.f32 %v3932_v34, %v2519_v59  ;;  %3935 = vrcp.f32 %v2558_v44  ;;  %vm2526_vm1 = vweird.f32 %v3932_v34  ;;  %vm2564_vm10 = vweird.f32 %v2558_v44 }
 0x646   :  { %v2540_v25 = vmul.f32 %v3934_v60, %v2538_v7  ;;  %3937 = vtanh.f32 %v2514_v62  ;;  %vm2545_vm2 = vweird.f32 %v3934_v60  ;;  %vm2527_vm5 = vmor %vm2525_vm3, %vm2526_vm1  ;;  %v2568_v59 = vand.u32 2147483647, %v2558_v44 }
 0x647   :  { %v2522_v17 = vsub.f32 1.0, %v2521_v10  ;;  %vm2546_vm7 = vmor %vm2544_vm4, %vm2545_vm2 }
 0x648   :  { %v2541_v42 = vsub.f32 1.0, %v2540_v25  ;;  %vm2569_vm12 = vcmp.eq.f32.partialorder %v2568_v59, 8.507059e+37 }
 0x649   :  { %v2523_v13 = vmul.f32 %v3932_v34, %v2522_v17 }
 0x64a   :  { %v2542_v47 = vmul.f32 %v3934_v60, %v2541_v42 }
 0x64b   :  { %v3936_v38 = vpop.eup %3935  ;;  %v2524_v31 = vadd.f32 %v3932_v34, %v2523_v13 }
 0x64c   :  { %v2543_v9 = vadd.f32 %v3934_v60, %v2542_v47  ;;  %v2560_v19 = vmul.f32 %v3936_v38, %v2558_v44  ;;  %v3938_v62 = vpop.eup %3937  ;;  %vm2565_vm9 = vweird.f32 %v3936_v38  ;;  %v2570_v47 = vand.u32 2147483648, %v2558_v44 }
 0x64d   :  { %v2528_v10 = vsel %vm2527_vm5, %v3932_v34, %v2524_v31  ;;  %vm2566_vm11 = vmor %vm2564_vm10, %vm2565_vm9 }
 0x64e   :  { %v2533_v25 = vsel %vm2530_vm6, %v2532_v33, %v2528_v10  ;;  %v2547_v17 = vsel %vm2546_vm7, %v3934_v60, %v2543_v9  ;;  %v2561_v12 = vsub.f32 1.0, %v2560_v19  ;;  %v2571_v28 = vor.u32 1.1754944e-38, %v2570_v47  ;;  %v7030_v10 = vld [vmem:[#allocation71_spill] sm:$0xff] }
 0x64f   :  { %v2552_v42 = vsel %vm2549_vm8, %v2551_v45, %v2547_v17  ;;  %v2575_v3 = vmul.f32 %v3938_v62, %v2533_v25  ;;  %v7031_v62 = vld [vmem:[#allocation38_spill] sm:$0xff] }
 0x650   :  { %v2574_v55 = vmul.f32 0.0, %v2552_v42  ;;  %v2562_v46 = vmul.f32 %v3936_v38, %v2561_v12  ;;  %v2271_v25 = vadd.f32 %v7031_v62, %v7030_v10  ;;  %v6133_v62 = vld [vmem:[#allocation9 + $0x178] sm:$0xff] }
 0x652   :  { %v5997_v13 = vadd.f32 %v2575_v3, %v2574_v55  ;;  %v2563_v7 = vadd.f32 %v3936_v38, %v2562_v46  ;;  %v7027_v55 = vld [vmem:[#allocation29_spill] sm:$0xff] }
 0x654   :  { %3939 = vtanh.f32 %v5997_v13  ;;  %v2567_v34 = vsel %vm2566_vm11, %v3936_v38, %v2563_v7 }
 0x655   :  { %v2572_v41 = vsel %vm2569_vm12, %v2571_v28, %v2567_v34 }
 0x65a   :  { %v3940_v60 = vpop.eup %3939 }
 0x65b   :  { %v2578_v8 = vmul.f32 %v3940_v60, %v2572_v41 }
 0x65d   :  { %2599 = vmatmul.f32.vlgmr.msrb.gmra.mxu0 %v2578_v8  ;;  %2619 = vmatmul.f32.vlgmr.msra.gmra.mxu1 %v2578_v8 }
 0x65e   :  { %2639 = vmatmul.f32.vlgmr.msra.gmra.mxu2 %v2578_v8  ;;  %2659 = vmatmul.f32.vlgmr.msra.gmra.mxu3 %v2578_v8 }
 0x65f   :  { %2885 = vmatpush.msrb.mxu0 %v6960_v63  ;;  %2905 = vmatpush.msra.mxu1 %v5553_v2  ;;  %v6998_v2 = vld [vmem:[#allocation20_spill] sm:$0xff] }
 0x660   :  { %2925 = vmatpush.msra.mxu2 %v5587_v14  ;;  %2945 = vmatpush.msra.mxu3 %v5561_v36  ;;  %v7000_v36 = vld [vmem:[#allocation51_spill] sm:$0xff]  ;;  %v7002_v14 = vld [vmem:[#allocation24_spill] sm:$0xff] }
 0x661   :  { %2886 = vmatpush.msrb.mxu0 %v5555_v30  ;;  %2906 = vmatpush.msra.mxu1 %v6961_v53  ;;  %v6999_v30 = vld [vmem:[#allocation50_spill] sm:$0xff]  ;;  %v7028_v53 = vld [vmem:[#allocation69_spill] sm:$0xff] }
 0x662   :  { %2926 = vmatpush.msra.mxu2 %v5590_v0  ;;  %2946 = vmatpush.msra.mxu3 %v6962_v61  ;;  %v7003_v0 = vld [vmem:[#allocation17_spill] sm:$0xff]  ;;  %v7029_v61 = vld [vmem:[#allocation35_spill] sm:$0xff] }
 0x663   :  { %2887 = vmatpush.msrb.mxu0 %v5564_v48  ;;  %2907 = vmatpush.msra.mxu1 %v6963_v52  ;;  %v7001_v48 = vld [vmem:[#allocation52_spill] sm:$0xff]  ;;  %v2312_v52 = vadd.f32 %v7029_v61, %v7028_v53  ;;  %v6100_v61 = vld [vmem:[#allocation9 + $0x1a0] sm:$0xff] }
 0x664   :  { %2927 = vmatpush.msra.mxu2 %v5595_v35  ;;  %2947 = vmatpush.msra.mxu3 %v6964_v4  ;;  %v7004_v35 = vld [vmem:[#allocation18_spill] sm:$0xff] }
 0x665   :  { %2888 = vmatpush.msrb.mxu0 %v6965_v32  ;;  %2908 = vmatpush.msra.mxu1 %v5599_v57  ;;  %v7005_v57 = vld [vmem:[#allocation21_spill] sm:$0xff] }
 0x666   :  { %2928 = vmatpush.msra.mxu2 %v5611_v56  ;;  %2948 = vmatpush.msra.mxu3 %v5609_v49  ;;  %v7008_v49 = vld [vmem:[#allocation19_spill] sm:$0xff]  ;;  %v7009_v56 = vld [vmem:[#allocation22_spill] sm:$0xff] }
 0x667   :  { %2889 = vmatpush.msrb.mxu0 %v5602_v16  ;;  %2909 = vmatpush.msra.mxu1 %v5607_v51  ;;  %v7006_v16 = vld [vmem:[#allocation28_spill] sm:$0xff]  ;;  %v7007_v51 = vld [vmem:[#allocation37_spill] sm:$0xff] }
 0x668   :  { %2929 = vmatpush.msra.mxu2 %v5619_v6  ;;  %2949 = vmatpush.msra.mxu3 %v5617_v18  ;;  %v7010_v18 = vld [vmem:[#allocation58_spill] sm:$0xff]  ;;  %v7011_v6 = vld [vmem:[#allocation23_spill] sm:$0xff] }
 0x669   :  { %2890 = vmatpush.msrb.mxu0 %v5627_v26  ;;  %2910 = vmatpush.msra.mxu1 %v5629_v40  ;;  %v7012_v26 = vld [vmem:[#allocation16_spill] sm:$0xff]  ;;  %v7013_v40 = vld [vmem:[#allocation25_spill] sm:$0xff] }
 0x66a   :  { %2930 = vmatpush.msra.mxu2 %v5635_v21  ;;  %2950 = vmatpush.msra.mxu3 %v5631_v27  ;;  %v7014_v27 = vld [vmem:[#allocation41_spill] sm:$0xff] }
 0x66b   :  { %2891 = vmatpush.msrb.mxu0 %v5637_v22  ;;  %2911 = vmatpush.msra.mxu1 %v5639_v5  ;;  %v7015_v21 = vld [vmem:[#allocation57_spill] sm:$0xff]  ;;  %v7016_v22 = vld [vmem:[#allocation27_spill] sm:$0xff] }
 0x66c   :  { %2931 = vmatpush.msra.mxu2 %v5647_v50  ;;  %2951 = vmatpush.msra.mxu3 %v5642_v54  ;;  %v7017_v5 = vld [vmem:[#allocation39_spill] sm:$0xff]  ;;  %v7018_v54 = vld [vmem:[#allocation26_spill] sm:$0xff] }
 0x66d   :  { %2892 = vmatpush.msrb.mxu0 %v5649_v11  ;;  %2912 = vmatpush.msra.mxu1 %v5651_v23  ;;  %v7019_v50 = vld [vmem:[#allocation42_spill] sm:$0xff]  ;;  %v7020_v11 = vld [vmem:[#allocation55_spill] sm:$0xff] }
 0x66e   :  { %2932 = vmatpush.msra.mxu2 %v5681_v15  ;;  %2952 = vmatpush.msra.mxu3 %v5661_v58  ;;  %v7021_v23 = vld [vmem:[#allocation59_spill] sm:$0xff]  ;;  %v7024_v58 = vld [vmem:[#allocation65_spill] sm:$0xff] }
 0x66f   :  { %2893 = vmatpush.msrb.mxu0 %v5657_v24  ;;  %2913 = vmatpush.msra.mxu1 %v5659_v43  ;;  %v7022_v24 = vld [vmem:[#allocation15_spill] sm:$0xff] }
 0x670   :  { %2933 = vmatpush.msra.mxu2 %v5687_v29  ;;  %2953 = vmatpush.msra.mxu3 %v5668_v20  ;;  %v7023_v43 = vld [vmem:[#allocation43_spill] sm:$0xff]  ;;  %v7026_v20 = vld [vmem:[#allocation66_spill] sm:$0xff] }
 0x671   :  { %2894 = vmatpush.msrb.mxu0 %v5664_v1  ;;  %2914 = vmatpush.msra.mxu1 %v5666_v37  ;;  %v7025_v1 = vld [vmem:[#allocation33_spill] sm:$0xff]  ;;  %v2230_v3 = vadd.f32 %v7027_v55, %v7026_v20 }
 0x672   :  { %2934 = vmatpush.msra.mxu2 %v6998_v2  ;;  %2954 = vmatpush.msra.mxu3 %v6999_v30  ;;  %v2189_v37 = vadd.f32 %v7025_v1, %v7024_v58 }
 0x673   :  { %2895 = vmatpush.msrb.mxu0 %v7000_v36  ;;  %2915 = vmatpush.msra.mxu1 %v7001_v48 }
 0x674   :  { %2935 = vmatpush.msra.mxu2 %v7002_v14  ;;  %2955 = vmatpush.msra.mxu3 %v7003_v0 }
 0x675   :  { %2896 = vmatpush.msrb.mxu0 %v7004_v35  ;;  %2916 = vmatpush.msra.mxu1 %v7005_v57 }
 0x676   :  { %2936 = vmatpush.msra.mxu2 %v7006_v16  ;;  %2956 = vmatpush.msra.mxu3 %v7007_v51 }
 0x677   :  { %2897 = vmatpush.msrb.mxu0 %v7008_v49  ;;  %2917 = vmatpush.msra.mxu1 %v7009_v56 }
 0x678   :  { %2937 = vmatpush.msra.mxu2 %v7010_v18  ;;  %2957 = vmatpush.msra.mxu3 %v7011_v6 }
 0x679   :  { %2898 = vmatpush.msrb.mxu0 %v7012_v26  ;;  %2918 = vmatpush.msra.mxu1 %v7013_v40 }
 0x67a   :  { %2938 = vmatpush.msra.mxu2 %v7014_v27  ;;  %2958 = vmatpush.msra.mxu3 %v7015_v21 }
 0x67b   :  { %2899 = vmatpush.msrb.mxu0 %v7016_v22  ;;  %2919 = vmatpush.msra.mxu1 %v7017_v5 }
 0x67c   :  { %2939 = vmatpush.msra.mxu2 %v7018_v54  ;;  %2959 = vmatpush.msra.mxu3 %v7019_v50 }
 0x67d   :  { %2900 = vmatpush.msrb.mxu0 %v7020_v11  ;;  %2920 = vmatpush.msra.mxu1 %v7021_v23 }
 0x67e   :  { %2940 = vmatpush.msra.mxu2 %v7022_v24  ;;  %2960 = vmatpush.msra.mxu3 %v7023_v43 }
 0x6da   :  { %v2600_v12 = vpop.f32.mrf.mxu0  ;;  %v2620_v15 = vpop.f32.mrf.mxu1 }
 0x6db   :  { %v2663_v29 = vadd.f32 %v2600_v12, %v2189_v37  ;;  %v2664_v46 = vadd.f32 %v2620_v15, %v2230_v3  ;;  %v6079_v3 = vld [vmem:[#allocation9 + $0x1e8] sm:$0xff]  ;;  %v6082_v12 = vld [vmem:[#allocation9 + $0x1f0] sm:$0xff]  ;;  %v6085_v15 = vld [vmem:[#allocation9 + $0x1f8] sm:$0xff] }
 0x6dd   :  { %v3762_v38 = vmul.f32 -1.442695, %v2663_v29  ;;  %v3763_v63 = vmul.f32 -1.442695, %v2664_v46  ;;  %v6088_v29 = vld [vmem:[#allocation9 + $0x1c0] sm:$0xff]  ;;  %v6091_v46 = vld [vmem:[#allocation9 + $0x1c8] sm:$0xff] }
 0x6df   :  { %3941 = vpow2.f32 %v3762_v38  ;;  %v6094_v38 = vld [vmem:[#allocation9 + $0x1d0] sm:$0xff] }
 0x6e0   :  { %3943 = vpow2.f32 %v3763_v63  ;;  %v6097_v63 = vld [vmem:[#allocation9 + $0x1d8] sm:$0xff] }
 0x6e1   :  { %v2660_v4 = vpop.f32.mrf.mxu3  ;;  %v2640_v9 = vpop.f32.mrf.mxu2 }
 0x6e2   :  { %v2666_v32 = vadd.f32 %v2660_v4, %v2312_v52  ;;  %v2665_v7 = vadd.f32 %v2640_v9, %v2271_v25  ;;  %v6103_v52 = vld [vmem:[#allocation9 + $0x1a8] sm:$0xff]  ;;  %v6106_v4 = vld [vmem:[#allocation9 + $0x1b0] sm:$0xff]  ;;  %v6136_v25 = vld [vmem:[#allocation9 + $0x140] sm:$0xff] }
 0x6e3   :  { %v6127_v9 = vld [vmem:[#allocation9 + $0x168] sm:$0xff] }
 0x6e4   :  { %v3764_v45 = vmul.f32 -1.442695, %v2666_v32  ;;  %v6109_v32 = vld [vmem:[#allocation9 + $0x1b8] sm:$0xff] }
 0x6e5   :  { %v3942_v44 = vpop.eup %3941 }
 0x6e6   :  { %v3944_v39 = vpop.eup %3943  ;;  %v2670_v31 = vadd.f32 1.0, %v3942_v44  ;;  %3945 = vpow2.f32 %v3764_v45  ;;  %v6112_v45 = vld [vmem:[#allocation9 + $0x180] sm:$0xff]  ;;  %v6115_v44 = vld [vmem:[#allocation9 + $0x188] sm:$0xff] }
 0x6e7   :  { %v2689_v33 = vadd.f32 1.0, %v3944_v39  ;;  %v6118_v39 = vld [vmem:[#allocation9 + $0x190] sm:$0xff] }
 0x6e8   :  { %3947 = vrcp.f32 %v2670_v31  ;;  %v2682_v41 = vand.u32 2147483648, %v2670_v31  ;;  %v2680_v30 = vand.u32 2147483647, %v2670_v31  ;;  %vm2676_vm15 = vweird.f32 %v2670_v31 }
 0x6e9   :  { %3949 = vrcp.f32 %v2689_v33  ;;  %v2701_v8 = vand.u32 2147483648, %v2689_v33  ;;  %v2699_v48 = vand.u32 2147483647, %v2689_v33  ;;  %vm2695_vm0 = vweird.f32 %v2689_v33 }
 0x6ea   :  { %v2683_v35 = vor.u32 1.1754944e-38, %v2682_v41  ;;  %vm2681_vm3 = vcmp.eq.f32.partialorder %v2680_v30, 8.507059e+37  ;;  %v6163_v41 = vld [vmem:[#allocation9 + $0x108] sm:$0xff]  ;;  %v6172_v30 = vld [vmem:[#allocation9 + $0xe0] sm:$0xff] }
 0x6eb   :  { %v2702_v51 = vor.u32 1.1754944e-38, %v2701_v8  ;;  %vm2700_vm4 = vcmp.eq.f32.partialorder %v2699_v48, 8.507059e+37  ;;  %v6166_v8 = vld [vmem:[#allocation9 + $0x110] sm:$0xff] }
 0x6ec   :  { %v3946_v19 = vpop.eup %3945  ;;  %v6178_v48 = vld [vmem:[#allocation9 + $0xf0] sm:$0xff] }
 0x6ed   :  { %v2709_v17 = vadd.f32 1.0, %v3946_v19  ;;  %v6130_v19 = vld [vmem:[#allocation9 + $0x170] sm:$0xff] }
 0x6ee   :  { %v3948_v42 = vpop.eup %3947 }
 0x6ef   :  { %v3950_v47 = vpop.eup %3949  ;;  %v2672_v59 = vmul.f32 %v3948_v42, %v2670_v31  ;;  %3951 = vrcp.f32 %v2709_v17  ;;  %vm2677_vm13 = vweird.f32 %v3948_v42  ;;  %v2721_v50 = vand.u32 2147483648, %v2709_v17  ;;  %v6121_v31 = vld [vmem:[#allocation9 + $0x198] sm:$0xff] }
 0x6f0   :  { %v2691_v34 = vmul.f32 %v3950_v47, %v2689_v33  ;;  %3953 = vtanh.f32 %v2665_v7  ;;  %vm2696_vm14 = vweird.f32 %v3950_v47  ;;  %vm2678_vm1 = vmor %vm2676_vm15, %vm2677_vm13  ;;  %vm2715_vm6 = vweird.f32 %v2709_v17  ;;  %v6124_v33 = vld [vmem:[#allocation9 + $0x160] sm:$0xff]  ;;  %v6145_v7 = vld [vmem:[#allocation9 + $0x158] sm:$0xff] }
 0x6f1   :  { %v2673_v28 = vsub.f32 1.0, %v2672_v59  ;;  %vm2697_vm2 = vmor %vm2695_vm0, %vm2696_vm14  ;;  %v2719_v11 = vand.u32 2147483647, %v2709_v17  ;;  %v2722_v43 = vor.u32 1.1754944e-38, %v2721_v50  ;;  %v6151_v59 = vld [vmem:[#allocation9 + $0x128] sm:$0xff]  ;;  %v6229_v50 = vld [vmem:[#allocation9 + $0x78] sm:$0xff] }
 0x6f2   :  { %v2692_v60 = vsub.f32 1.0, %v2691_v34  ;;  %v6154_v34 = vld [vmem:[#allocation9 + $0x130] sm:$0xff]  ;;  %7045 = vst [vmem:[#allocation23_spill] sm:$0xff] %v6229_v50 }
 0x6f3   :  { %v2674_v2 = vmul.f32 %v3948_v42, %v2673_v28  ;;  %vm2720_vm8 = vcmp.eq.f32.partialorder %v2719_v11, 8.507059e+37  ;;  %v6157_v28 = vld [vmem:[#allocation9 + $0x138] sm:$0xff]  ;;  %v6232_v11 = vld [vmem:[#allocation9 + $0x40] sm:$0xff] }
 0x6f4   :  { %v2693_v36 = vmul.f32 %v3950_v47, %v2692_v60  ;;  %v6160_v60 = vld [vmem:[#allocation9 + $0x100] sm:$0xff]  ;;  %7046 = vst [vmem:[#allocation16_spill] sm:$0xff] %v6232_v11 }
 0x6f5   :  { %v3952_v14 = vpop.eup %3951  ;;  %v2675_v0 = vadd.f32 %v3948_v42, %v2674_v2  ;;  %v6169_v2 = vld [vmem:[#allocation9 + $0x118] sm:$0xff] }
 0x6f6   :  { %v2694_v57 = vadd.f32 %v3950_v47, %v2693_v36  ;;  %v2711_v16 = vmul.f32 %v3952_v14, %v2709_v17  ;;  %v3954_v56 = vpop.eup %3953  ;;  %vm2716_vm5 = vweird.f32 %v3952_v14  ;;  %v6139_v17 = vld [vmem:[#allocation9 + $0x148] sm:$0xff] }
 0x6f7   :  { %v2679_v49 = vsel %vm2678_vm1, %v3948_v42, %v2675_v0  ;;  %vm2717_vm7 = vmor %vm2715_vm6, %vm2716_vm5  ;;  %v6142_v42 = vld [vmem:[#allocation9 + $0x150] sm:$0xff]  ;;  %v6175_v36 = vld [vmem:[#allocation9 + $0xe8] sm:$0xff] }
 0x6f8   :  { %v2684_v18 = vsel %vm2681_vm3, %v2683_v35, %v2679_v49  ;;  %v2698_v6 = vsel %vm2697_vm2, %v3950_v47, %v2694_v57  ;;  %v2712_v26 = vsub.f32 1.0, %v2711_v16  ;;  %v6148_v47 = vld [vmem:[#allocation9 + $0x120] sm:$0xff]  ;;  %v6187_v35 = vld [vmem:[#allocation9 + $0xc8] sm:$0xff]  ;;  %v6190_v57 = vld [vmem:[#allocation9 + $0xd0] sm:$0xff] }
 0x6f9   :  { %v2703_v40 = vsel %vm2700_vm4, %v2702_v51, %v2698_v6  ;;  %v2726_v27 = vmul.f32 %v3954_v56, %v2684_v18  ;;  %v6184_v0 = vld [vmem:[#allocation9 + $0xc0] sm:$0xff]  ;;  %7032 = vst [vmem:[#allocation20_spill] sm:$0xff] %v6190_v57  ;;  %v6193_v16 = vld [vmem:[#allocation9 + $0xd8] sm:$0xff]  ;;  %v6199_v49 = vld [vmem:[#allocation9 + $0xa8] sm:$0xff] }
 0x6fa   :  { %v2725_v21 = vmul.f32 %v2703_v40, %v5997_v13  ;;  %v2713_v22 = vmul.f32 %v3952_v14, %v2712_v26  ;;  %v6076_v13 = vld [vmem:[#allocation9 + $0x1e0] sm:$0xff]  ;;  %7033 = vst [vmem:[#allocation50_spill] sm:$0xff] %v6193_v16  ;;  %v6202_v56 = vld [vmem:[#allocation9 + $0xb0] sm:$0xff]  ;;  %v6205_v18 = vld [vmem:[#allocation9 + $0xb8] sm:$0xff] }
 0x6fb   :  { %v6196_v51 = vld [vmem:[#allocation9 + $0xa0] sm:$0xff]  ;;  %7035 = vst [vmem:[#allocation52_spill] sm:$0xff] %v6199_v49  ;;  %v6211_v26 = vld [vmem:[#allocation9 + $0x88] sm:$0xff]  ;;  %v6214_v40 = vld [vmem:[#allocation9 + $0x90] sm:$0xff] }
 0x6fc   :  { %v6073_v5 = vadd.f32 %v2726_v27, %v2725_v21  ;;  %v2714_v54 = vadd.f32 %v3952_v14, %v2713_v22  ;;  %7034 = vst [vmem:[#allocation51_spill] sm:$0xff] %v6196_v51  ;;  %v6208_v6 = vld [vmem:[#allocation9 + $0x80] sm:$0xff]  ;;  %v6217_v27 = vld [vmem:[#allocation9 + $0x98] sm:$0xff]  ;;  %v6223_v22 = vld [vmem:[#allocation9 + $0x68] sm:$0xff] }
 0x6fd   :  { %7036 = vst [vmem:[#allocation24_spill] sm:$0xff] %v6202_v56  ;;  %v6220_v21 = vld [vmem:[#allocation9 + $0x60] sm:$0xff] }
 0x6fe   :  { %3955 = vtanh.f32 %v6073_v5  ;;  %v2718_v23 = vsel %vm2717_vm7, %v3952_v14, %v2714_v54  ;;  %v6181_v14 = vld [vmem:[#allocation9 + $0xf8] sm:$0xff]  ;;  %7037 = vst [vmem:[#allocation17_spill] sm:$0xff] %v6205_v18  ;;  %v6226_v54 = vld [vmem:[#allocation9 + $0x70] sm:$0xff] }
 0x6ff   :  { %v2723_v37 = vsel %vm2720_vm8, %v2722_v43, %v2718_v23  ;;  %7038 = vst [vmem:[#allocation18_spill] sm:$0xff] %v6208_v6  ;;  %v6235_v23 = vld [vmem:[#allocation9 + $0x48] sm:$0xff]  ;;  %v6238_v43 = vld [vmem:[#allocation9 + $0x50] sm:$0xff] }
 0x700   :  { %7039 = vst [vmem:[#allocation21_spill] sm:$0xff] %v6211_v26 }
 0x701   :  { %7040 = vst [vmem:[#allocation28_spill] sm:$0xff] %v6214_v40 }
 0x702   :  { %7041 = vst [vmem:[#allocation37_spill] sm:$0xff] %v6217_v27 }
 0x703   :  { %7042 = vst [vmem:[#allocation19_spill] sm:$0xff] %v6220_v21 }
 0x704   :  { %v3956_v1 = vpop.eup %3955  ;;  %7043 = vst [vmem:[#allocation22_spill] sm:$0xff] %v6223_v22 }
 0x705   :  { %v2729_v55 = vmul.f32 %v3956_v1, %v2723_v37  ;;  %7044 = vst [vmem:[#allocation58_spill] sm:$0xff] %v6226_v54  ;;  %v6241_v1 = vld [vmem:[#allocation9 + $0x58] sm:$0xff]  ;;  %v6244_v37 = vld [vmem:[#allocation9 + $0x20] sm:$0xff] }
 0x706   :  { %7047 = vst [vmem:[#allocation25_spill] sm:$0xff] %v6235_v23 }
 0x707   :  { %2750 = vmatmul.f32.vlgmr.msra.gmra.mxu0 %v2729_v55  ;;  %2770 = vmatmul.f32.vlgmr.msrb.gmra.mxu1 %v2729_v55  ;;  %7048 = vst [vmem:[#allocation41_spill] sm:$0xff] %v6238_v43 }
 0x708   :  { %2790 = vmatmul.f32.vlgmr.msrb.gmra.mxu2 %v2729_v55  ;;  %2810 = vmatmul.f32.vlgmr.msrb.gmra.mxu3 %v2729_v55  ;;  %7049 = vst [vmem:[#allocation57_spill] sm:$0xff] %v6241_v1  ;;  %v6247_v55 = vld [vmem:[#allocation9 + $0x28] sm:$0xff] }
 0x709   :  { %3036 = vmatpush.msra.mxu0 %v6076_v13  ;;  %3056 = vmatpush.msrb.mxu1 %v6079_v3  ;;  %7050 = vst [vmem:[#allocation27_spill] sm:$0xff] %v6244_v37 }
 0x70a   :  { %3076 = vmatpush.msrb.mxu2 %v6082_v12  ;;  %3096 = vmatpush.msrb.mxu3 %v6085_v15  ;;  %7051 = vst [vmem:[#allocation39_spill] sm:$0xff] %v6247_v55 }
 0x70b   :  { %3037 = vmatpush.msra.mxu0 %v6088_v29  ;;  %3057 = vmatpush.msrb.mxu1 %v6091_v46 }
 0x70c   :  { %3077 = vmatpush.msrb.mxu2 %v6094_v38  ;;  %3097 = vmatpush.msrb.mxu3 %v6097_v63 }
 0x70d   :  { %3038 = vmatpush.msra.mxu0 %v6100_v61  ;;  %3058 = vmatpush.msrb.mxu1 %v6103_v52 }
 0x70e   :  { %3078 = vmatpush.msrb.mxu2 %v6106_v4  ;;  %3098 = vmatpush.msrb.mxu3 %v6109_v32 }
 0x70f   :  { %3039 = vmatpush.msra.mxu0 %v6112_v45  ;;  %3059 = vmatpush.msrb.mxu1 %v6115_v44 }
 0x710   :  { %3079 = vmatpush.msrb.mxu2 %v6118_v39  ;;  %3099 = vmatpush.msrb.mxu3 %v6121_v31 }
 0x711   :  { %3040 = vmatpush.msra.mxu0 %v6124_v33  ;;  %3060 = vmatpush.msrb.mxu1 %v6127_v9 }
 0x712   :  { %3080 = vmatpush.msrb.mxu2 %v6130_v19  ;;  %3100 = vmatpush.msrb.mxu3 %v6133_v62 }
 0x713   :  { %3041 = vmatpush.msra.mxu0 %v6136_v25  ;;  %3061 = vmatpush.msrb.mxu1 %v6139_v17 }
 0x714   :  { %3081 = vmatpush.msrb.mxu2 %v6142_v42  ;;  %3101 = vmatpush.msrb.mxu3 %v6145_v7 }
 0x715   :  { %3042 = vmatpush.msra.mxu0 %v6148_v47  ;;  %3062 = vmatpush.msrb.mxu1 %v6151_v59 }
 0x716   :  { %3082 = vmatpush.msrb.mxu2 %v6154_v34  ;;  %3102 = vmatpush.msrb.mxu3 %v6157_v28 }
 0x717   :  { %3043 = vmatpush.msra.mxu0 %v6160_v60  ;;  %3063 = vmatpush.msrb.mxu1 %v6163_v41 }
 0x718   :  { %3083 = vmatpush.msrb.mxu2 %v6166_v8  ;;  %3103 = vmatpush.msrb.mxu3 %v6169_v2 }
 0x719   :  { %3044 = vmatpush.msra.mxu0 %v6172_v30  ;;  %3064 = vmatpush.msrb.mxu1 %v6175_v36 }
 0x71a   :  { %3084 = vmatpush.msrb.mxu2 %v6178_v48  ;;  %3104 = vmatpush.msrb.mxu3 %v6181_v14 }
 0x71b   :  { %3045 = vmatpush.msra.mxu0 %v6184_v0  ;;  %3065 = vmatpush.msrb.mxu1 %v6187_v35 }
 0x71c   :  { %3085 = vmatpush.msrb.mxu2 %v6190_v57  ;;  %3105 = vmatpush.msrb.mxu3 %v6193_v16 }
 0x71d   :  { %3046 = vmatpush.msra.mxu0 %v6196_v51  ;;  %3066 = vmatpush.msrb.mxu1 %v6199_v49 }
 0x71e   :  { %3086 = vmatpush.msrb.mxu2 %v6202_v56  ;;  %3106 = vmatpush.msrb.mxu3 %v6205_v18 }
 0x71f   :  { %3047 = vmatpush.msra.mxu0 %v6208_v6  ;;  %3067 = vmatpush.msrb.mxu1 %v6211_v26 }
 0x720   :  { %3087 = vmatpush.msrb.mxu2 %v6214_v40  ;;  %3107 = vmatpush.msrb.mxu3 %v6217_v27 }
 0x721   :  { %3048 = vmatpush.msra.mxu0 %v6220_v21  ;;  %3068 = vmatpush.msrb.mxu1 %v6223_v22 }
 0x722   :  { %3088 = vmatpush.msrb.mxu2 %v6226_v54  ;;  %3108 = vmatpush.msrb.mxu3 %v6229_v50  ;;  %v7058_v50 = vld [vmem:[#allocation32_spill] sm:$0xff] }
 0x723   :  { %3049 = vmatpush.msra.mxu0 %v6232_v11  ;;  %3069 = vmatpush.msrb.mxu1 %v6235_v23  ;;  %v6250_v11 = vld [vmem:[#allocation9 + $0x30] sm:$0xff]  ;;  %v6253_v23 = vld [vmem:[#allocation9 + $0x38] sm:$0xff] }
 0x724   :  { %3089 = vmatpush.msrb.mxu2 %v6238_v43  ;;  %3109 = vmatpush.msrb.mxu3 %v6241_v1  ;;  %7052 = vst [vmem:[#allocation26_spill] sm:$0xff] %v6250_v11  ;;  %v6256_v43 = vld [vmem:[#allocation9] sm:$0xff]  ;;  %v6259_v1 = vld [vmem:[#allocation9 + $0x8] sm:$0xff] }
 0x725   :  { %3050 = vmatpush.msra.mxu0 %v6244_v37  ;;  %3070 = vmatpush.msrb.mxu1 %v6247_v55  ;;  %7053 = vst [vmem:[#allocation42_spill] sm:$0xff] %v6253_v23  ;;  %v6263_v37 = vld [vmem:[#allocation9 + $0x18] sm:$0xff] }
 0x726   :  { %3090 = vmatpush.msrb.mxu2 %v6250_v11  ;;  %3110 = vmatpush.msrb.mxu3 %v6253_v23  ;;  %7054 = vst [vmem:[#allocation55_spill] sm:$0xff] %v6256_v43  ;;  %v7057_v11 = vld [vmem:[#allocation30_spill] sm:$0xff]  ;;  %v2233_v23 = vadd.f32 %v7058_v50, %v7026_v20 }
 0x727   :  { %3051 = vmatpush.msra.mxu0 %v6256_v43  ;;  %7055 = vst [vmem:[#allocation59_spill] sm:$0xff] %v6259_v1  ;;  %3071 = vmatpush.msrb.mxu1 %v6259_v1  ;;  %v2192_v55 = vadd.f32 %v7057_v11, %v7024_v58  ;;  %v7059_v1 = vld [vmem:[#allocation40_spill] sm:$0xff] }
 0x728   :  { %3091 = vmatpush.msrb.mxu2 %v7022_v24  ;;  %7056 = vst [vmem:[#allocation15_spill] sm:$0xff] %v6263_v37  ;;  %3111 = vmatpush.msrb.mxu3 %v6263_v37  ;;  %v2315_v24 = vadd.f32 %v7059_v1, %v7028_v53 }
 0x784   :  { %v2751_v54 = vpop.f32.mrf.mxu0  ;;  %v2771_v22 = vpop.f32.mrf.mxu1 }
 0x785   :  { %v2814_v21 = vadd.f32 %v2751_v54, %v2192_v55  ;;  %v2815_v43 = vadd.f32 %v2771_v22, %v2233_v23 }
 0x787   :  { %v3765_v27 = vmul.f32 -1.442695, %v2814_v21  ;;  %v3766_v40 = vmul.f32 -1.442695, %v2815_v43  ;;  %v7060_v21 = vld [vmem:[#allocation56_spill] sm:$0xff] }
 0x788   :  { %v2274_v22 = vadd.f32 %v7060_v21, %v7030_v10 }
 0x789   :  { %3957 = vpow2.f32 %v3765_v27 }
 0x78a   :  { %3959 = vpow2.f32 %v3766_v40 }
 0x78b   :  { %v2811_v26 = vpop.f32.mrf.mxu3  ;;  %v2791_v50 = vpop.f32.mrf.mxu2 }
 0x78c   :  { %v2817_v6 = vadd.f32 %v2811_v26, %v2315_v24  ;;  %v2816_v43 = vadd.f32 %v2791_v50, %v2274_v22 }
 0x78e   :  { %v3767_v37 = vmul.f32 -1.442695, %v2817_v6 }
 0x78f   :  { %v3958_v18 = vpop.eup %3957 }
 0x790   :  { %v3960_v56 = vpop.eup %3959  ;;  %v2821_v11 = vadd.f32 1.0, %v3958_v18  ;;  %3961 = vpow2.f32 %v3767_v37 }
 0x791   :  { %v2840_v58 = vadd.f32 1.0, %v3960_v56 }
 0x792   :  { %3963 = vrcp.f32 %v2821_v11  ;;  %v2833_v24 = vand.u32 2147483648, %v2821_v11  ;;  %v2831_v37 = vand.u32 2147483647, %v2821_v11  ;;  %vm2827_vm11 = vweird.f32 %v2821_v11 }
 0x793   :  { %3965 = vrcp.f32 %v2840_v58  ;;  %v2852_v18 = vand.u32 2147483648, %v2840_v58  ;;  %v2850_v20 = vand.u32 2147483647, %v2840_v58  ;;  %vm2846_vm12 = vweird.f32 %v2840_v58 }
 0x794   :  { %v2834_v50 = vor.u32 1.1754944e-38, %v2833_v24  ;;  %vm2832_vm15 = vcmp.eq.f32.partialorder %v2831_v37, 8.507059e+37 }
 0x795   :  { %vm2851_vm0 = vcmp.eq.f32.partialorder %v2850_v20, 8.507059e+37 }
 0x796   :  { %v3962_v54 = vpop.eup %3961 }
 0x797   :  { %v2860_v27 = vadd.f32 1.0, %v3962_v54 }
 0x798   :  { %v3964_v23 = vpop.eup %3963 }
 0x799   :  { %v3966_v1 = vpop.eup %3965  ;;  %v2823_v40 = vmul.f32 %v3964_v23, %v2821_v11  ;;  %3967 = vrcp.f32 %v2860_v27  ;;  %vm2828_vm9 = vweird.f32 %v3964_v23  ;;  %vm2866_vm2 = vweird.f32 %v2860_v27 }
 0x79a   :  { %v2842_v26 = vmul.f32 %v3966_v1, %v2840_v58  ;;  %3969 = vtanh.f32 %v2816_v43  ;;  %vm2847_vm10 = vweird.f32 %v3966_v1  ;;  %vm2829_vm13 = vmor %vm2827_vm11, %vm2828_vm9 }
 0x79b   :  { %v2824_v6 = vsub.f32 1.0, %v2823_v40  ;;  %vm2848_vm14 = vmor %vm2846_vm12, %vm2847_vm10  ;;  %v2853_v40 = vor.u32 1.1754944e-38, %v2852_v18 }
 0x79c   :  { %v2843_v55 = vsub.f32 1.0, %v2842_v26 }
 0x79d   :  { %v2825_v56 = vmul.f32 %v3964_v23, %v2824_v6 }
 0x79e   :  { %v2844_v53 = vmul.f32 %v3966_v1, %v2843_v55 }
 0x79f   :  { %v3968_v49 = vpop.eup %3967  ;;  %v2826_v21 = vadd.f32 %v3964_v23, %v2825_v56 }
 0x7a0   :  { %v2845_v54 = vadd.f32 %v3966_v1, %v2844_v53  ;;  %v2862_v22 = vmul.f32 %v3968_v49, %v2860_v27  ;;  %v3970_v43 = vpop.eup %3969  ;;  %vm2867_vm1 = vweird.f32 %v3968_v49  ;;  %v2872_v53 = vand.u32 2147483648, %v2860_v27 }
 0x7a1   :  { %v2830_v26 = vsel %vm2829_vm13, %v3964_v23, %v2826_v21  ;;  %v2870_v23 = vand.u32 2147483647, %v2860_v27  ;;  %vm2868_vm3 = vmor %vm2866_vm2, %vm2867_vm1  ;;  %v7067_v27 = vld [vmem:[#allocation18_spill] sm:$0xff]  ;;  %v7068_v21 = vld [vmem:[#allocation21_spill] sm:$0xff] }
 0x7a2   :  { %v2835_v10 = vsel %vm2832_vm15, %v2834_v50, %v2830_v26  ;;  %v2849_v6 = vsel %vm2848_vm14, %v3966_v1, %v2845_v54  ;;  %v2863_v51 = vsub.f32 1.0, %v2862_v22  ;;  %v2873_v18 = vor.u32 1.1754944e-38, %v2872_v53  ;;  %v7069_v50 = vld [vmem:[#allocation28_spill] sm:$0xff]  ;;  %v7070_v54 = vld [vmem:[#allocation37_spill] sm:$0xff]  ;;  %v7071_v22 = vld [vmem:[#allocation19_spill] sm:$0xff] }
 0x7a3   :  { %v2854_v55 = vsel %vm2851_vm0, %v2853_v40, %v2849_v6  ;;  %v2877_v16 = vmul.f32 %v3970_v43, %v2835_v10  ;;  %vm2871_vm4 = vcmp.eq.f32.partialorder %v2870_v23, 8.507059e+37  ;;  %v7061_v10 = vld [vmem:[#allocation20_spill] sm:$0xff]  ;;  %v7072_v40 = vld [vmem:[#allocation22_spill] sm:$0xff]  ;;  %v7074_v43 = vld [vmem:[#allocation23_spill] sm:$0xff] }
 0x7a4   :  { %v2876_v57 = vmul.f32 %v2854_v55, %v6073_v5  ;;  %v2864_v56 = vmul.f32 %v3968_v49, %v2863_v51  ;;  %v7062_v5 = vld [vmem:[#allocation50_spill] sm:$0xff]  ;;  %v7065_v51 = vld [vmem:[#allocation24_spill] sm:$0xff]  ;;  %v7076_v55 = vld [vmem:[#allocation25_spill] sm:$0xff] }
 0x7a5   :  { %v7073_v26 = vld [vmem:[#allocation58_spill] sm:$0xff]  ;;  %v7075_v6 = vld [vmem:[#allocation16_spill] sm:$0xff]  ;;  %v7079_v53 = vld [vmem:[#allocation27_spill] sm:$0xff] }
 0x7a6   :  { %v6275_v11 = vadd.f32 %v2877_v16, %v2876_v57  ;;  %v2865_v58 = vadd.f32 %v3968_v49, %v2864_v56  ;;  %v7063_v57 = vld [vmem:[#allocation51_spill] sm:$0xff]  ;;  %v7064_v16 = vld [vmem:[#allocation52_spill] sm:$0xff]  ;;  %v7077_v56 = vld [vmem:[#allocation41_spill] sm:$0xff] }
 0x7a7   :  { %v7080_v23 = vld [vmem:[#allocation39_spill] sm:$0xff] }
 0x7a8   :  { %3971 = vtanh.f32 %v6275_v11  ;;  %v2869_v24 = vsel %vm2868_vm3, %v3968_v49, %v2865_v58  ;;  %v7066_v49 = vld [vmem:[#allocation17_spill] sm:$0xff] }
 0x7a9   :  { %v2874_v1 = vsel %vm2871_vm4, %v2873_v18, %v2869_v24  ;;  %v7078_v58 = vld [vmem:[#allocation57_spill] sm:$0xff]  ;;  %v7081_v24 = vld [vmem:[#allocation26_spill] sm:$0xff] }
 0x7aa   :  { %v7082_v18 = vld [vmem:[#allocation42_spill] sm:$0xff] }
 0x7ae   :  { %v3972_v20 = vpop.eup %3971 }
 0x7af   :  { %v2880_v37 = vmul.f32 %v3972_v20, %v2874_v1  ;;  %v7083_v20 = vld [vmem:[#allocation55_spill] sm:$0xff] }
 0x7b0   :  { %v7084_v1 = vld [vmem:[#allocation59_spill] sm:$0xff] }
 0x7b1   :  { %2901 = vmatmul.f32.vlgmr.msrb.gmra.mxu0 %v2880_v37  ;;  %2921 = vmatmul.f32.vlgmr.msra.gmra.mxu1 %v2880_v37 }
 0x7b2   :  { %2941 = vmatmul.f32.vlgmr.msra.gmra.mxu2 %v2880_v37  ;;  %2961 = vmatmul.f32.vlgmr.msra.gmra.mxu3 %v2880_v37  ;;  %v6340_v37 = vld [vmem:[#allocation9 + $0x10] sm:$0xff] }
 0x7b3   :  { %3187 = vmatpush.msrb.mxu0 %v6076_v13  ;;  %3207 = vmatpush.msra.mxu1 %v6079_v3  ;;  %7085 = vst [vmem:[#allocation43_spill] sm:$0xff] %v6340_v37 }
 0x7b4   :  { %3227 = vmatpush.msra.mxu2 %v6082_v12  ;;  %3247 = vmatpush.msra.mxu3 %v6085_v15 }
 0x7b5   :  { %3188 = vmatpush.msrb.mxu0 %v6088_v29  ;;  %3208 = vmatpush.msra.mxu1 %v6091_v46 }
 0x7b6   :  { %3228 = vmatpush.msra.mxu2 %v6094_v38  ;;  %3248 = vmatpush.msra.mxu3 %v6097_v63 }
 0x7b7   :  { %3189 = vmatpush.msrb.mxu0 %v6100_v61  ;;  %3209 = vmatpush.msra.mxu1 %v6103_v52 }
 0x7b8   :  { %3229 = vmatpush.msra.mxu2 %v6106_v4  ;;  %3249 = vmatpush.msra.mxu3 %v6109_v32 }
 0x7b9   :  { %3190 = vmatpush.msrb.mxu0 %v6112_v45  ;;  %3210 = vmatpush.msra.mxu1 %v6115_v44 }
 0x7ba   :  { %3230 = vmatpush.msra.mxu2 %v6118_v39  ;;  %3250 = vmatpush.msra.mxu3 %v6121_v31 }
 0x7bb   :  { %3191 = vmatpush.msrb.mxu0 %v6124_v33  ;;  %3211 = vmatpush.msra.mxu1 %v6127_v9 }
 0x7bc   :  { %3231 = vmatpush.msra.mxu2 %v6130_v19  ;;  %3251 = vmatpush.msra.mxu3 %v6133_v62 }
 0x7bd   :  { %3192 = vmatpush.msrb.mxu0 %v6136_v25  ;;  %3212 = vmatpush.msra.mxu1 %v6139_v17 }
 0x7be   :  { %3232 = vmatpush.msra.mxu2 %v6142_v42  ;;  %3252 = vmatpush.msra.mxu3 %v6145_v7 }
 0x7bf   :  { %3193 = vmatpush.msrb.mxu0 %v6148_v47  ;;  %3213 = vmatpush.msra.mxu1 %v6151_v59 }
 0x7c0   :  { %3233 = vmatpush.msra.mxu2 %v6154_v34  ;;  %3253 = vmatpush.msra.mxu3 %v6157_v28 }
 0x7c1   :  { %3194 = vmatpush.msrb.mxu0 %v6160_v60  ;;  %3214 = vmatpush.msra.mxu1 %v6163_v41 }
 0x7c2   :  { %3234 = vmatpush.msra.mxu2 %v6166_v8  ;;  %3254 = vmatpush.msra.mxu3 %v6169_v2 }
 0x7c3   :  { %3195 = vmatpush.msrb.mxu0 %v6172_v30  ;;  %3215 = vmatpush.msra.mxu1 %v6175_v36 }
 0x7c4   :  { %3235 = vmatpush.msra.mxu2 %v6178_v48  ;;  %3255 = vmatpush.msra.mxu3 %v6181_v14 }
 0x7c5   :  { %3196 = vmatpush.msrb.mxu0 %v6184_v0  ;;  %3216 = vmatpush.msra.mxu1 %v6187_v35 }
 0x7c6   :  { %3236 = vmatpush.msra.mxu2 %v7061_v10  ;;  %3256 = vmatpush.msra.mxu3 %v7062_v5 }
 0x7c7   :  { %3197 = vmatpush.msrb.mxu0 %v7063_v57  ;;  %3217 = vmatpush.msra.mxu1 %v7064_v16 }
 0x7c8   :  { %3237 = vmatpush.msra.mxu2 %v7065_v51  ;;  %3257 = vmatpush.msra.mxu3 %v7066_v49 }
 0x7c9   :  { %3198 = vmatpush.msrb.mxu0 %v7067_v27  ;;  %3218 = vmatpush.msra.mxu1 %v7068_v21 }
 0x7ca   :  { %3238 = vmatpush.msra.mxu2 %v7069_v50  ;;  %3258 = vmatpush.msra.mxu3 %v7070_v54  ;;  %v7092_v54 = vld [vmem:[#allocation14_spill] sm:$0xff] }
 0x7cb   :  { %3199 = vmatpush.msrb.mxu0 %v7071_v22  ;;  %3219 = vmatpush.msra.mxu1 %v7072_v40 }
 0x7cc   :  { %3239 = vmatpush.msra.mxu2 %v7073_v26  ;;  %3259 = vmatpush.msra.mxu3 %v7074_v43  ;;  %v7090_v43 = vld [vmem:[#allocation54_spill] sm:$0xff] }
 0x7cd   :  { %3200 = vmatpush.msrb.mxu0 %v7075_v6  ;;  %3220 = vmatpush.msra.mxu1 %v7076_v55  ;;  %v7086_v55 = vld [vmem:[#allocation15_spill] sm:$0xff] }
 0x7ce   :  { %3240 = vmatpush.msra.mxu2 %v7077_v56  ;;  %3260 = vmatpush.msra.mxu3 %v7078_v58  ;;  %v7087_v56 = vld [vmem:[#allocation65_spill] sm:$0xff] }
 0x7cf   :  { %3201 = vmatpush.msrb.mxu0 %v7079_v53  ;;  %3221 = vmatpush.msra.mxu1 %v7080_v23  ;;  %v7088_v58 = vld [vmem:[#allocation53_spill] sm:$0xff]  ;;  %v7089_v53 = vld [vmem:[#allocation66_spill] sm:$0xff] }
 0x7d0   :  { %3241 = vmatpush.msra.mxu2 %v7081_v24  ;;  %3261 = vmatpush.msra.mxu3 %v7082_v18  ;;  %v2195_v6 = vadd.f32 %v7088_v58, %v7087_v56  ;;  %v2236_v23 = vadd.f32 %v7090_v43, %v7089_v53 }
 0x7d1   :  { %3202 = vmatpush.msrb.mxu0 %v7083_v20  ;;  %3222 = vmatpush.msra.mxu1 %v7084_v1  ;;  %v7091_v1 = vld [vmem:[#allocation69_spill] sm:$0xff] }
 0x7d2   :  { %3242 = vmatpush.msra.mxu2 %v6340_v37  ;;  %3262 = vmatpush.msra.mxu3 %v7086_v55  ;;  %v2318_v50 = vadd.f32 %v7092_v54, %v7091_v1 }
 0x82e   :  { %v2902_v26 = vpop.f32.mrf.mxu0  ;;  %v2922_v24 = vpop.f32.mrf.mxu1 }
 0x82f   :  { %v2965_v40 = vadd.f32 %v2902_v26, %v2195_v6  ;;  %v2966_v18 = vadd.f32 %v2922_v24, %v2236_v23  ;;  %v7093_v6 = vld [vmem:[#allocation71_spill] sm:$0xff] }
 0x831   :  { %v3768_v22 = vmul.f32 -1.442695, %v2965_v40  ;;  %v3769_v20 = vmul.f32 -1.442695, %v2966_v18  ;;  %v7094_v40 = vld [vmem:[#allocation36_spill] sm:$0xff] }
 0x832   :  { %v2277_v23 = vadd.f32 %v7094_v40, %v7093_v6 }
 0x833   :  { %3973 = vpow2.f32 %v3768_v22 }
 0x834   :  { %3975 = vpow2.f32 %v3769_v20 }
 0x835   :  { %v2962_v37 = vpop.f32.mrf.mxu3  ;;  %v2942_v43 = vpop.f32.mrf.mxu2 }
 0x836   :  { %v2968_v21 = vadd.f32 %v2962_v37, %v2318_v50  ;;  %v2967_v18 = vadd.f32 %v2942_v43, %v2277_v23 }
 0x838   :  { %v3770_v55 = vmul.f32 -1.442695, %v2968_v21 }
 0x839   :  { %v3974_v27 = vpop.eup %3973 }
 0x83a   :  { %v3976_v49 = vpop.eup %3975  ;;  %v2972_v58 = vadd.f32 1.0, %v3974_v27  ;;  %3977 = vpow2.f32 %v3770_v55 }
 0x83b   :  { %v2991_v56 = vadd.f32 1.0, %v3976_v49 }
 0x83c   :  { %3979 = vrcp.f32 %v2972_v58  ;;  %v2984_v1 = vand.u32 2147483648, %v2972_v58  ;;  %v2982_v55 = vand.u32 2147483647, %v2972_v58  ;;  %vm2978_vm7 = vweird.f32 %v2972_v58 }
 0x83d   :  { %3981 = vrcp.f32 %v2991_v56  ;;  %v3003_v27 = vand.u32 2147483648, %v2991_v56  ;;  %v3001_v51 = vand.u32 2147483647, %v2991_v56  ;;  %vm2997_vm8 = vweird.f32 %v2991_v56 }
 0x83e   :  { %v2985_v43 = vor.u32 1.1754944e-38, %v2984_v1  ;;  %vm2983_vm11 = vcmp.eq.f32.partialorder %v2982_v55, 8.507059e+37 }
 0x83f   :  { %vm3002_vm12 = vcmp.eq.f32.partialorder %v3001_v51, 8.507059e+37 }
 0x840   :  { %v3978_v26 = vpop.eup %3977 }
 0x841   :  { %v3011_v22 = vadd.f32 1.0, %v3978_v26 }
 0x842   :  { %v3980_v24 = vpop.eup %3979 }
 0x843   :  { %v3982_v54 = vpop.eup %3981  ;;  %v2974_v20 = vmul.f32 %v3980_v24, %v2972_v58  ;;  %3983 = vrcp.f32 %v3011_v22  ;;  %vm2979_vm5 = vweird.f32 %v3980_v24  ;;  %vm3017_vm14 = vweird.f32 %v3011_v22 }
 0x844   :  { %v2993_v50 = vmul.f32 %v3982_v54, %v2991_v56  ;;  %3985 = vtanh.f32 %v2967_v18  ;;  %vm2998_vm6 = vweird.f32 %v3982_v54  ;;  %vm2980_vm9 = vmor %vm2978_vm7, %vm2979_vm5  ;;  %v3021_v1 = vand.u32 2147483647, %v3011_v22 }
 0x845   :  { %v2975_v21 = vsub.f32 1.0, %v2974_v20  ;;  %vm2999_vm10 = vmor %vm2997_vm8, %vm2998_vm6  ;;  %v3004_v20 = vor.u32 1.1754944e-38, %v3003_v27 }
 0x846   :  { %v2994_v37 = vsub.f32 1.0, %v2993_v50  ;;  %vm3022_vm0 = vcmp.eq.f32.partialorder %v3021_v1, 8.507059e+37  ;;  %v7114_v1 = vld [vmem:[#allocation39_spill] sm:$0xff] }
 0x847   :  { %v2976_v49 = vmul.f32 %v3980_v24, %v2975_v21 }
 0x848   :  { %v2995_v53 = vmul.f32 %v3982_v54, %v2994_v37 }
 0x849   :  { %v3984_v16 = vpop.eup %3983  ;;  %v2977_v40 = vadd.f32 %v3980_v24, %v2976_v49 }
 0x84a   :  { %v2996_v26 = vadd.f32 %v3982_v54, %v2995_v53  ;;  %v3013_v23 = vmul.f32 %v3984_v16, %v3011_v22  ;;  %v3986_v18 = vpop.eup %3985  ;;  %vm3018_vm13 = vweird.f32 %v3984_v16  ;;  %v3023_v53 = vand.u32 2147483648, %v3011_v22  ;;  %v7101_v22 = vld [vmem:[#allocation18_spill] sm:$0xff] }
 0x84b   :  { %v2981_v50 = vsel %vm2980_vm9, %v3980_v24, %v2977_v40  ;;  %vm3019_vm15 = vmor %vm3017_vm14, %vm3018_vm13  ;;  %v7102_v40 = vld [vmem:[#allocation21_spill] sm:$0xff] }
 0x84c   :  { %v2986_v6 = vsel %vm2983_vm11, %v2985_v43, %v2981_v50  ;;  %v3000_v21 = vsel %vm2999_vm10, %v3982_v54, %v2996_v26  ;;  %v3014_v57 = vsub.f32 1.0, %v3013_v23  ;;  %v3024_v27 = vor.u32 1.1754944e-38, %v3023_v53  ;;  %v7103_v43 = vld [vmem:[#allocation28_spill] sm:$0xff]  ;;  %v7104_v26 = vld [vmem:[#allocation37_spill] sm:$0xff]  ;;  %v7105_v23 = vld [vmem:[#allocation19_spill] sm:$0xff] }
 0x84d   :  { %v3005_v37 = vsel %vm3002_vm12, %v3004_v20, %v3000_v21  ;;  %v3028_v5 = vmul.f32 %v3986_v18, %v2986_v6  ;;  %v7100_v6 = vld [vmem:[#allocation17_spill] sm:$0xff]  ;;  %v7106_v20 = vld [vmem:[#allocation22_spill] sm:$0xff]  ;;  %v7108_v18 = vld [vmem:[#allocation23_spill] sm:$0xff] }
 0x84e   :  { %v3027_v10 = vmul.f32 %v3005_v37, %v6275_v11  ;;  %v3015_v49 = vmul.f32 %v3984_v16, %v3014_v57  ;;  %v7095_v11 = vld [vmem:[#allocation20_spill] sm:$0xff]  ;;  %v7107_v50 = vld [vmem:[#allocation58_spill] sm:$0xff]  ;;  %v7110_v37 = vld [vmem:[#allocation25_spill] sm:$0xff] }
 0x84f   :  { %v7098_v57 = vld [vmem:[#allocation52_spill] sm:$0xff]  ;;  %v7113_v53 = vld [vmem:[#allocation27_spill] sm:$0xff] }
 0x850   :  { %v6353_v58 = vadd.f32 %v3028_v5, %v3027_v10  ;;  %v3016_v56 = vadd.f32 %v3984_v16, %v3015_v49  ;;  %v7096_v10 = vld [vmem:[#allocation50_spill] sm:$0xff]  ;;  %v7097_v5 = vld [vmem:[#allocation51_spill] sm:$0xff]  ;;  %v7109_v21 = vld [vmem:[#allocation16_spill] sm:$0xff] }
 0x851   :  { %v7111_v49 = vld [vmem:[#allocation41_spill] sm:$0xff] }
 0x852   :  { %3987 = vtanh.f32 %v6353_v58  ;;  %v3020_v24 = vsel %vm3019_vm15, %v3984_v16, %v3016_v56  ;;  %v7099_v16 = vld [vmem:[#allocation24_spill] sm:$0xff]  ;;  %v7112_v56 = vld [vmem:[#allocation57_spill] sm:$0xff] }
 0x853   :  { %v3025_v54 = vsel %vm3022_vm0, %v3024_v27, %v3020_v24  ;;  %v7115_v24 = vld [vmem:[#allocation26_spill] sm:$0xff] }
 0x854   :  { %v7116_v27 = vld [vmem:[#allocation42_spill] sm:$0xff] }
 0x858   :  { %v3988_v51 = vpop.eup %3987 }
 0x859   :  { %v3031_v55 = vmul.f32 %v3988_v51, %v3025_v54  ;;  %v7117_v51 = vld [vmem:[#allocation55_spill] sm:$0xff] }
 0x85a   :  { %v7118_v54 = vld [vmem:[#allocation59_spill] sm:$0xff] }
 0x85b   :  { %3052 = vmatmul.f32.vlgmr.msra.gmra.mxu0 %v3031_v55  ;;  %3072 = vmatmul.f32.vlgmr.msrb.gmra.mxu1 %v3031_v55 }
 0x85c   :  { %3092 = vmatmul.f32.vlgmr.msrb.gmra.mxu2 %v3031_v55  ;;  %3112 = vmatmul.f32.vlgmr.msrb.gmra.mxu3 %v3031_v55  ;;  %v7119_v55 = vld [vmem:[#allocation43_spill] sm:$0xff] }
 0x85d   :  { %3338 = vmatpush.msra.mxu0 %v6076_v13  ;;  %3358 = vmatpush.msrb.mxu1 %v6079_v3 }
 0x85e   :  { %3378 = vmatpush.msrb.mxu2 %v6082_v12  ;;  %3398 = vmatpush.msrb.mxu3 %v6085_v15 }
 0x85f   :  { %3339 = vmatpush.msra.mxu0 %v6088_v29  ;;  %3359 = vmatpush.msrb.mxu1 %v6091_v46 }
 0x860   :  { %3379 = vmatpush.msrb.mxu2 %v6094_v38  ;;  %3399 = vmatpush.msrb.mxu3 %v6097_v63 }
 0x861   :  { %3340 = vmatpush.msra.mxu0 %v6100_v61  ;;  %3360 = vmatpush.msrb.mxu1 %v6103_v52 }
 0x862   :  { %3380 = vmatpush.msrb.mxu2 %v6106_v4  ;;  %3400 = vmatpush.msrb.mxu3 %v6109_v32 }
 0x863   :  { %3341 = vmatpush.msra.mxu0 %v6112_v45  ;;  %3361 = vmatpush.msrb.mxu1 %v6115_v44 }
 0x864   :  { %3381 = vmatpush.msrb.mxu2 %v6118_v39  ;;  %3401 = vmatpush.msrb.mxu3 %v6121_v31 }
 0x865   :  { %3342 = vmatpush.msra.mxu0 %v6124_v33  ;;  %3362 = vmatpush.msrb.mxu1 %v6127_v9 }
 0x866   :  { %3382 = vmatpush.msrb.mxu2 %v6130_v19  ;;  %3402 = vmatpush.msrb.mxu3 %v6133_v62 }
 0x867   :  { %3343 = vmatpush.msra.mxu0 %v6136_v25  ;;  %3363 = vmatpush.msrb.mxu1 %v6139_v17 }
 0x868   :  { %3383 = vmatpush.msrb.mxu2 %v6142_v42  ;;  %3403 = vmatpush.msrb.mxu3 %v6145_v7 }
 0x869   :  { %3344 = vmatpush.msra.mxu0 %v6148_v47  ;;  %3364 = vmatpush.msrb.mxu1 %v6151_v59 }
 0x86a   :  { %3384 = vmatpush.msrb.mxu2 %v6154_v34  ;;  %3404 = vmatpush.msrb.mxu3 %v6157_v28 }
 0x86b   :  { %3345 = vmatpush.msra.mxu0 %v6160_v60  ;;  %3365 = vmatpush.msrb.mxu1 %v6163_v41 }
 0x86c   :  { %3385 = vmatpush.msrb.mxu2 %v6166_v8  ;;  %3405 = vmatpush.msrb.mxu3 %v6169_v2 }
 0x86d   :  { %3346 = vmatpush.msra.mxu0 %v6172_v30  ;;  %3366 = vmatpush.msrb.mxu1 %v6175_v36 }
 0x86e   :  { %3386 = vmatpush.msrb.mxu2 %v6178_v48  ;;  %3406 = vmatpush.msrb.mxu3 %v6181_v14 }
 0x86f   :  { %3347 = vmatpush.msra.mxu0 %v6184_v0  ;;  %3367 = vmatpush.msrb.mxu1 %v6187_v35 }
 0x870   :  { %3387 = vmatpush.msrb.mxu2 %v7095_v11  ;;  %3407 = vmatpush.msrb.mxu3 %v7096_v10 }
 0x871   :  { %3348 = vmatpush.msra.mxu0 %v7097_v5  ;;  %3368 = vmatpush.msrb.mxu1 %v7098_v57 }
 0x872   :  { %3388 = vmatpush.msrb.mxu2 %v7099_v16  ;;  %3408 = vmatpush.msrb.mxu3 %v7100_v6 }
 0x873   :  { %3349 = vmatpush.msra.mxu0 %v7101_v22  ;;  %3369 = vmatpush.msrb.mxu1 %v7102_v40 }
 0x874   :  { %3389 = vmatpush.msrb.mxu2 %v7103_v43  ;;  %3409 = vmatpush.msrb.mxu3 %v7104_v26  ;;  %v7126_v43 = vld [vmem:[#allocation44_spill] sm:$0xff] }
 0x875   :  { %3350 = vmatpush.msra.mxu0 %v7105_v23  ;;  %3370 = vmatpush.msrb.mxu1 %v7106_v20 }
 0x876   :  { %3390 = vmatpush.msrb.mxu2 %v7107_v50  ;;  %3410 = vmatpush.msrb.mxu3 %v7108_v18  ;;  %v7124_v50 = vld [vmem:[#allocation34_spill] sm:$0xff] }
 0x877   :  { %3351 = vmatpush.msra.mxu0 %v7109_v21  ;;  %3371 = vmatpush.msrb.mxu1 %v7110_v37  ;;  %v7120_v21 = vld [vmem:[#allocation15_spill] sm:$0xff]  ;;  %v7121_v37 = vld [vmem:[#allocation65_spill] sm:$0xff] }
 0x878   :  { %3391 = vmatpush.msrb.mxu2 %v7111_v49  ;;  %3411 = vmatpush.msrb.mxu3 %v7112_v56  ;;  %v7122_v49 = vld [vmem:[#allocation31_spill] sm:$0xff]  ;;  %v7123_v56 = vld [vmem:[#allocation66_spill] sm:$0xff] }
 0x879   :  { %3352 = vmatpush.msra.mxu0 %v7113_v53  ;;  %3372 = vmatpush.msrb.mxu1 %v7114_v1  ;;  %v2198_v18 = vadd.f32 %v7122_v49, %v7121_v37  ;;  %v2239_v53 = vadd.f32 %v7124_v50, %v7123_v56 }
 0x87a   :  { %3392 = vmatpush.msrb.mxu2 %v7115_v24  ;;  %3412 = vmatpush.msrb.mxu3 %v7116_v27 }
 0x87b   :  { %3353 = vmatpush.msra.mxu0 %v7117_v51  ;;  %3373 = vmatpush.msrb.mxu1 %v7118_v54  ;;  %v7125_v51 = vld [vmem:[#allocation69_spill] sm:$0xff] }
 0x87c   :  { %3393 = vmatpush.msrb.mxu2 %v7119_v55  ;;  %3413 = vmatpush.msrb.mxu3 %v7120_v21  ;;  %v2321_v54 = vadd.f32 %v7126_v43, %v7125_v51 }
 0x8d8   :  { %v3053_v20 = vpop.f32.mrf.mxu0  ;;  %v3073_v1 = vpop.f32.mrf.mxu1 }
 0x8d9   :  { %v3116_v23 = vadd.f32 %v3053_v20, %v2198_v18  ;;  %v3117_v24 = vadd.f32 %v3073_v1, %v2239_v53  ;;  %v7127_v18 = vld [vmem:[#allocation71_spill] sm:$0xff] }
 0x8db   :  { %v3771_v26 = vmul.f32 -1.442695, %v3116_v23  ;;  %v3772_v27 = vmul.f32 -1.442695, %v3117_v24  ;;  %v7128_v23 = vld [vmem:[#allocation46_spill] sm:$0xff] }
 0x8dc   :  { %v2280_v53 = vadd.f32 %v7128_v23, %v7127_v18 }
 0x8dd   :  { %3989 = vpow2.f32 %v3771_v26 }
 0x8de   :  { %3991 = vpow2.f32 %v3772_v27 }
 0x8df   :  { %v3113_v55 = vpop.f32.mrf.mxu3  ;;  %v3093_v50 = vpop.f32.mrf.mxu2 }
 0x8e0   :  { %v3119_v40 = vadd.f32 %v3113_v55, %v2321_v54  ;;  %v3118_v24 = vadd.f32 %v3093_v50, %v2280_v53 }
 0x8e2   :  { %v3773_v21 = vmul.f32 -1.442695, %v3119_v40 }
 0x8e3   :  { %v3990_v22 = vpop.eup %3989 }
 0x8e4   :  { %v3992_v6 = vpop.eup %3991  ;;  %v3123_v49 = vadd.f32 1.0, %v3990_v22  ;;  %3993 = vpow2.f32 %v3773_v21 }
 0x8e5   :  { %v3142_v37 = vadd.f32 1.0, %v3992_v6 }
 0x8e6   :  { %3995 = vrcp.f32 %v3123_v49  ;;  %v3135_v51 = vand.u32 2147483648, %v3123_v49  ;;  %v3133_v21 = vand.u32 2147483647, %v3123_v49  ;;  %vm3129_vm3 = vweird.f32 %v3123_v49 }
 0x8e7   :  { %3997 = vrcp.f32 %v3142_v37  ;;  %v3154_v22 = vand.u32 2147483648, %v3142_v37  ;;  %v3152_v16 = vand.u32 2147483647, %v3142_v37  ;;  %vm3148_vm4 = vweird.f32 %v3142_v37 }
 0x8e8   :  { %v3136_v50 = vor.u32 1.1754944e-38, %v3135_v51  ;;  %vm3134_vm7 = vcmp.eq.f32.partialorder %v3133_v21, 8.507059e+37 }
 0x8e9   :  { %vm3153_vm8 = vcmp.eq.f32.partialorder %v3152_v16, 8.507059e+37 }
 0x8ea   :  { %v3994_v20 = vpop.eup %3993 }
 0x8eb   :  { %v3162_v26 = vadd.f32 1.0, %v3994_v20 }
 0x8ec   :  { %v3996_v1 = vpop.eup %3995 }
 0x8ed   :  { %v3998_v43 = vpop.eup %3997  ;;  %v3125_v27 = vmul.f32 %v3996_v1, %v3123_v49  ;;  %3999 = vrcp.f32 %v3162_v26  ;;  %vm3130_vm1 = vweird.f32 %v3996_v1  ;;  %vm3168_vm10 = vweird.f32 %v3162_v26 }
 0x8ee   :  { %v3144_v54 = vmul.f32 %v3998_v43, %v3142_v37  ;;  %4001 = vtanh.f32 %v3118_v24  ;;  %vm3149_vm2 = vweird.f32 %v3998_v43  ;;  %vm3131_vm5 = vmor %vm3129_vm3, %vm3130_vm1  ;;  %v3172_v51 = vand.u32 2147483647, %v3162_v26 }
 0x8ef   :  { %v3126_v40 = vsub.f32 1.0, %v3125_v27  ;;  %vm3150_vm6 = vmor %vm3148_vm4, %vm3149_vm2  ;;  %v3155_v27 = vor.u32 1.1754944e-38, %v3154_v22 }
 0x8f0   :  { %v3145_v55 = vsub.f32 1.0, %v3144_v54  ;;  %vm3173_vm12 = vcmp.eq.f32.partialorder %v3172_v51, 8.507059e+37 }
 0x8f1   :  { %v3127_v6 = vmul.f32 %v3996_v1, %v3126_v40 }
 0x8f2   :  { %v3146_v56 = vmul.f32 %v3998_v43, %v3145_v55 }
 0x8f3   :  { %v4000_v57 = vpop.eup %3999  ;;  %v3128_v23 = vadd.f32 %v3996_v1, %v3127_v6 }
 0x8f4   :  { %v3147_v20 = vadd.f32 %v3998_v43, %v3146_v56  ;;  %v3164_v53 = vmul.f32 %v4000_v57, %v3162_v26  ;;  %v4002_v24 = vpop.eup %4001  ;;  %vm3169_vm9 = vweird.f32 %v4000_v57  ;;  %v3174_v56 = vand.u32 2147483648, %v3162_v26 }
 0x8f5   :  { %v3132_v54 = vsel %vm3131_vm5, %v3996_v1, %v3128_v23  ;;  %vm3170_vm11 = vmor %vm3168_vm10, %vm3169_vm9 }
 0x8f6   :  { %v3137_v18 = vsel %vm3134_vm7, %v3136_v50, %v3132_v54  ;;  %v3151_v40 = vsel %vm3150_vm6, %v3998_v43, %v3147_v20  ;;  %v3165_v5 = vsub.f32 1.0, %v3164_v53  ;;  %v3175_v22 = vor.u32 1.1754944e-38, %v3174_v56  ;;  %v7161_v54 = vld [vmem:[#allocation71_spill] sm:$0xff] }
 0x8f7   :  { %v3156_v55 = vsel %vm3153_vm8, %v3155_v27, %v3151_v40  ;;  %v3179_v10 = vmul.f32 %v4002_v24, %v3137_v18  ;;  %v7162_v24 = vld [vmem:[#allocation61_spill] sm:$0xff] }
 0x8f8   :  { %v3178_v11 = vmul.f32 %v3156_v55, %v6353_v58  ;;  %v3166_v6 = vmul.f32 %v4000_v57, %v3165_v5  ;;  %v7159_v58 = vld [vmem:[#allocation69_spill] sm:$0xff]  ;;  %v2283_v40 = vadd.f32 %v7162_v24, %v7161_v54 }
 0x8fa   :  { %v6429_v49 = vadd.f32 %v3179_v10, %v3178_v11  ;;  %v3167_v37 = vadd.f32 %v4000_v57, %v3166_v6  ;;  %v7160_v11 = vld [vmem:[#allocation48_spill] sm:$0xff] }
 0x8fb   :  { %v2324_v10 = vadd.f32 %v7160_v11, %v7159_v58 }
 0x8fc   :  { %4003 = vtanh.f32 %v6429_v49  ;;  %v3171_v1 = vsel %vm3170_vm11, %v4000_v57, %v3167_v37 }
 0x8fd   :  { %v3176_v43 = vsel %vm3173_vm12, %v3175_v22, %v3171_v1 }
 0x902   :  { %v4004_v16 = vpop.eup %4003 }
 0x903   :  { %v3182_v21 = vmul.f32 %v4004_v16, %v3176_v43 }
 0x905   :  { %3203 = vmatmul.f32.vlgmr.msrb.gmra.mxu0 %v3182_v21  ;;  %3223 = vmatmul.f32.vlgmr.msra.gmra.mxu1 %v3182_v21 }
 0x906   :  { %3243 = vmatmul.f32.vlgmr.msra.gmra.mxu2 %v3182_v21  ;;  %3263 = vmatmul.f32.vlgmr.msra.gmra.mxu3 %v3182_v21 }
 0x907   :  { %3489 = vmatpush.msrb.mxu0 %v6076_v13  ;;  %3509 = vmatpush.msra.mxu1 %v6079_v3  ;;  %v7129_v13 = vld [vmem:[#allocation20_spill] sm:$0xff]  ;;  %v7130_v3 = vld [vmem:[#allocation50_spill] sm:$0xff] }
 0x908   :  { %3529 = vmatpush.msra.mxu2 %v6082_v12  ;;  %3549 = vmatpush.msra.mxu3 %v6085_v15  ;;  %v7131_v12 = vld [vmem:[#allocation51_spill] sm:$0xff]  ;;  %v7132_v15 = vld [vmem:[#allocation52_spill] sm:$0xff] }
 0x909   :  { %3490 = vmatpush.msrb.mxu0 %v6088_v29  ;;  %3510 = vmatpush.msra.mxu1 %v6091_v46  ;;  %v7133_v29 = vld [vmem:[#allocation24_spill] sm:$0xff]  ;;  %v7134_v46 = vld [vmem:[#allocation17_spill] sm:$0xff] }
 0x90a   :  { %3530 = vmatpush.msra.mxu2 %v6094_v38  ;;  %3550 = vmatpush.msra.mxu3 %v6097_v63  ;;  %v7135_v38 = vld [vmem:[#allocation18_spill] sm:$0xff]  ;;  %v7136_v63 = vld [vmem:[#allocation21_spill] sm:$0xff] }
 0x90b   :  { %3491 = vmatpush.msrb.mxu0 %v6100_v61  ;;  %3511 = vmatpush.msra.mxu1 %v6103_v52  ;;  %v7137_v61 = vld [vmem:[#allocation28_spill] sm:$0xff]  ;;  %v7138_v52 = vld [vmem:[#allocation37_spill] sm:$0xff] }
 0x90c   :  { %3531 = vmatpush.msra.mxu2 %v6106_v4  ;;  %3551 = vmatpush.msra.mxu3 %v6109_v32  ;;  %v7139_v4 = vld [vmem:[#allocation19_spill] sm:$0xff]  ;;  %v7140_v32 = vld [vmem:[#allocation22_spill] sm:$0xff] }
 0x90d   :  { %3492 = vmatpush.msrb.mxu0 %v6112_v45  ;;  %3512 = vmatpush.msra.mxu1 %v6115_v44  ;;  %v7141_v45 = vld [vmem:[#allocation58_spill] sm:$0xff]  ;;  %v7142_v44 = vld [vmem:[#allocation23_spill] sm:$0xff] }
 0x90e   :  { %3532 = vmatpush.msra.mxu2 %v6118_v39  ;;  %3552 = vmatpush.msra.mxu3 %v6121_v31  ;;  %v7143_v39 = vld [vmem:[#allocation16_spill] sm:$0xff]  ;;  %v7144_v31 = vld [vmem:[#allocation25_spill] sm:$0xff] }
 0x90f   :  { %3493 = vmatpush.msrb.mxu0 %v6124_v33  ;;  %3513 = vmatpush.msra.mxu1 %v6127_v9  ;;  %v7145_v33 = vld [vmem:[#allocation41_spill] sm:$0xff] }
 0x910   :  { %3533 = vmatpush.msra.mxu2 %v6130_v19  ;;  %3553 = vmatpush.msra.mxu3 %v6133_v62  ;;  %v7146_v9 = vld [vmem:[#allocation57_spill] sm:$0xff]  ;;  %v7147_v19 = vld [vmem:[#allocation27_spill] sm:$0xff] }
 0x911   :  { %3494 = vmatpush.msrb.mxu0 %v6136_v25  ;;  %3514 = vmatpush.msra.mxu1 %v6139_v17  ;;  %v7148_v62 = vld [vmem:[#allocation39_spill] sm:$0xff]  ;;  %v7149_v25 = vld [vmem:[#allocation26_spill] sm:$0xff] }
 0x912   :  { %3534 = vmatpush.msra.mxu2 %v6142_v42  ;;  %3554 = vmatpush.msra.mxu3 %v6145_v7  ;;  %v7150_v17 = vld [vmem:[#allocation42_spill] sm:$0xff]  ;;  %v7151_v42 = vld [vmem:[#allocation55_spill] sm:$0xff] }
 0x913   :  { %3495 = vmatpush.msrb.mxu0 %v6148_v47  ;;  %3515 = vmatpush.msra.mxu1 %v6151_v59  ;;  %v7152_v7 = vld [vmem:[#allocation59_spill] sm:$0xff] }
 0x914   :  { %3535 = vmatpush.msra.mxu2 %v6154_v34  ;;  %3555 = vmatpush.msra.mxu3 %v6157_v28  ;;  %v7153_v47 = vld [vmem:[#allocation43_spill] sm:$0xff]  ;;  %v7155_v34 = vld [vmem:[#allocation65_spill] sm:$0xff] }
 0x915   :  { %3496 = vmatpush.msrb.mxu0 %v6160_v60  ;;  %3516 = vmatpush.msra.mxu1 %v6163_v41  ;;  %v7154_v59 = vld [vmem:[#allocation15_spill] sm:$0xff]  ;;  %v7156_v28 = vld [vmem:[#allocation45_spill] sm:$0xff]  ;;  %v7157_v41 = vld [vmem:[#allocation66_spill] sm:$0xff] }
 0x916   :  { %3536 = vmatpush.msra.mxu2 %v6166_v8  ;;  %3556 = vmatpush.msra.mxu3 %v6169_v2  ;;  %v2201_v60 = vadd.f32 %v7156_v28, %v7155_v34  ;;  %v7158_v8 = vld [vmem:[#allocation47_spill] sm:$0xff] }
 0x917   :  { %3497 = vmatpush.msrb.mxu0 %v6172_v30  ;;  %3517 = vmatpush.msra.mxu1 %v6175_v36  ;;  %v2242_v2 = vadd.f32 %v7158_v8, %v7157_v41 }
 0x918   :  { %3537 = vmatpush.msra.mxu2 %v6178_v48  ;;  %3557 = vmatpush.msra.mxu3 %v6181_v14 }
 0x919   :  { %3498 = vmatpush.msrb.mxu0 %v6184_v0  ;;  %3518 = vmatpush.msra.mxu1 %v6187_v35 }
 0x91a   :  { %3538 = vmatpush.msra.mxu2 %v7129_v13  ;;  %3558 = vmatpush.msra.mxu3 %v7130_v3 }
 0x91b   :  { %3499 = vmatpush.msrb.mxu0 %v7131_v12  ;;  %3519 = vmatpush.msra.mxu1 %v7132_v15 }
 0x91c   :  { %3539 = vmatpush.msra.mxu2 %v7133_v29  ;;  %3559 = vmatpush.msra.mxu3 %v7134_v46 }
 0x91d   :  { %3500 = vmatpush.msrb.mxu0 %v7135_v38  ;;  %3520 = vmatpush.msra.mxu1 %v7136_v63 }
 0x91e   :  { %3540 = vmatpush.msra.mxu2 %v7137_v61  ;;  %3560 = vmatpush.msra.mxu3 %v7138_v52 }
 0x91f   :  { %3501 = vmatpush.msrb.mxu0 %v7139_v4  ;;  %3521 = vmatpush.msra.mxu1 %v7140_v32 }
 0x920   :  { %3541 = vmatpush.msra.mxu2 %v7141_v45  ;;  %3561 = vmatpush.msra.mxu3 %v7142_v44 }
 0x921   :  { %3502 = vmatpush.msrb.mxu0 %v7143_v39  ;;  %3522 = vmatpush.msra.mxu1 %v7144_v31 }
 0x922   :  { %3542 = vmatpush.msra.mxu2 %v7145_v33  ;;  %3562 = vmatpush.msra.mxu3 %v7146_v9 }
 0x923   :  { %3503 = vmatpush.msrb.mxu0 %v7147_v19  ;;  %3523 = vmatpush.msra.mxu1 %v7148_v62 }
 0x924   :  { %3543 = vmatpush.msra.mxu2 %v7149_v25  ;;  %3563 = vmatpush.msra.mxu3 %v7150_v17 }
 0x925   :  { %3504 = vmatpush.msrb.mxu0 %v7151_v42  ;;  %3524 = vmatpush.msra.mxu1 %v7152_v7 }
 0x926   :  { %3544 = vmatpush.msra.mxu2 %v7153_v47  ;;  %3564 = vmatpush.msra.mxu3 %v7154_v59 }
 0x982   :  { %v3204_v30 = vpop.f32.mrf.mxu0  ;;  %v3224_v36 = vpop.f32.mrf.mxu1 }
 0x983   :  { %v3267_v48 = vadd.f32 %v3204_v30, %v2201_v60  ;;  %v3268_v14 = vadd.f32 %v3224_v36, %v2242_v2  ;;  %v7164_v2 = vld [vmem:[#allocation60_spill] sm:$0xff] }
 0x984   :  { %v2245_v30 = vadd.f32 %v7164_v2, %v7157_v41  ;;  %v3650_v2 = vld [vmem:[%s6590_s7 + $0x70] sm:$0xff] }
 0x985   :  { %v3774_v0 = vmul.f32 -1.442695, %v3267_v48  ;;  %v3775_v35 = vmul.f32 -1.442695, %v3268_v14 }
 0x987   :  { %4005 = vpow2.f32 %v3774_v0 }
 0x988   :  { %4007 = vpow2.f32 %v3775_v35 }
 0x989   :  { %v3264_v5 = vpop.f32.mrf.mxu3  ;;  %v3244_v53 = vpop.f32.mrf.mxu2 }
 0x98a   :  { %v3270_v57 = vadd.f32 %v3264_v5, %v2324_v10  ;;  %v3269_v37 = vadd.f32 %v3244_v53, %v2283_v40  ;;  %v7165_v10 = vld [vmem:[#allocation62_spill] sm:$0xff]  ;;  %v7166_v40 = vld [vmem:[#allocation67_spill] sm:$0xff] }
 0x98b   :  { %v2327_v5 = vadd.f32 %v7165_v10, %v7159_v58  ;;  %v7167_v10 = vld [vmem:[#allocation63_spill] sm:$0xff] }
 0x98c   :  { %v3776_v18 = vmul.f32 -1.442695, %v3270_v57 }
 0x98d   :  { %v4006_v26 = vpop.eup %4005 }
 0x98e   :  { %v4008_v23 = vpop.eup %4007  ;;  %v3274_v50 = vadd.f32 1.0, %v4006_v26  ;;  %4009 = vpow2.f32 %v3776_v18 }
 0x98f   :  { %v3293_v20 = vadd.f32 1.0, %v4008_v23 }
 0x990   :  { %4011 = vrcp.f32 %v3274_v50  ;;  %v3286_v43 = vand.u32 2147483648, %v3274_v50  ;;  %v3284_v3 = vand.u32 2147483647, %v3274_v50  ;;  %vm3280_vm15 = vweird.f32 %v3274_v50 }
 0x991   :  { %4013 = vrcp.f32 %v3293_v20  ;;  %v3305_v21 = vand.u32 2147483648, %v3293_v20  ;;  %v3303_v15 = vand.u32 2147483647, %v3293_v20  ;;  %vm3299_vm0 = vweird.f32 %v3293_v20 }
 0x992   :  { %v3287_v38 = vor.u32 1.1754944e-38, %v3286_v43  ;;  %vm3285_vm3 = vcmp.eq.f32.partialorder %v3284_v3, 8.507059e+37 }
 0x993   :  { %v3306_v52 = vor.u32 1.1754944e-38, %v3305_v21  ;;  %vm3304_vm4 = vcmp.eq.f32.partialorder %v3303_v15, 8.507059e+37 }
 0x994   :  { %v4010_v27 = vpop.eup %4009 }
 0x995   :  { %v3313_v55 = vadd.f32 1.0, %v4010_v27 }
 0x996   :  { %v4012_v6 = vpop.eup %4011 }
 0x997   :  { %v4014_v56 = vpop.eup %4013  ;;  %v3276_v51 = vmul.f32 %v4012_v6, %v3274_v50  ;;  %4015 = vrcp.f32 %v3313_v55  ;;  %vm3281_vm13 = vweird.f32 %v4012_v6  ;;  %v3325_v17 = vand.u32 2147483648, %v3313_v55 }
 0x998   :  { %v3295_v1 = vmul.f32 %v4014_v56, %v3293_v20  ;;  %4017 = vtanh.f32 %v3269_v37  ;;  %vm3300_vm14 = vweird.f32 %v4014_v56  ;;  %vm3282_vm1 = vmor %vm3280_vm15, %vm3281_vm13  ;;  %vm3319_vm6 = vweird.f32 %v3313_v55 }
 0x999   :  { %v3277_v22 = vsub.f32 1.0, %v3276_v51  ;;  %vm3301_vm2 = vmor %vm3299_vm0, %vm3300_vm14  ;;  %v3323_v42 = vand.u32 2147483647, %v3313_v55  ;;  %v3326_v47 = vor.u32 1.1754944e-38, %v3325_v17 }
 0x99a   :  { %v3296_v16 = vsub.f32 1.0, %v3295_v1 }
 0x99b   :  { %v3278_v13 = vmul.f32 %v4012_v6, %v3277_v22  ;;  %vm3324_vm8 = vcmp.eq.f32.partialorder %v3323_v42, 8.507059e+37 }
 0x99c   :  { %v3297_v12 = vmul.f32 %v4014_v56, %v3296_v16 }
 0x99d   :  { %v4016_v29 = vpop.eup %4015  ;;  %v3279_v46 = vadd.f32 %v4012_v6, %v3278_v13 }
 0x99e   :  { %v3298_v63 = vadd.f32 %v4014_v56, %v3297_v12  ;;  %v3315_v61 = vmul.f32 %v4016_v29, %v3313_v55  ;;  %v4018_v32 = vpop.eup %4017  ;;  %vm3320_vm5 = vweird.f32 %v4016_v29  ;;  %v2286_v55 = vadd.f32 %v7166_v40, %v7161_v54 }
 0x99f   :  { %v3283_v4 = vsel %vm3282_vm1, %v4012_v6, %v3279_v46  ;;  %vm3321_vm7 = vmor %vm3319_vm6, %vm3320_vm5 }
 0x9a0   :  { %v3288_v45 = vsel %vm3285_vm3, %v3287_v38, %v3283_v4  ;;  %v3302_v44 = vsel %vm3301_vm2, %v4014_v56, %v3298_v63  ;;  %v3316_v39 = vsub.f32 1.0, %v3315_v61 }
 0x9a1   :  { %v3307_v31 = vsel %vm3304_vm4, %v3306_v52, %v3302_v44  ;;  %v3330_v33 = vmul.f32 %v4018_v32, %v3288_v45 }
 0x9a2   :  { %v3329_v9 = vmul.f32 %v3307_v31, %v6429_v49  ;;  %v3317_v19 = vmul.f32 %v4016_v29, %v3316_v39  ;;  %v7163_v49 = vld [vmem:[#allocation49_spill] sm:$0xff] }
 0x9a3   :  { %v2204_v8 = vadd.f32 %v7163_v49, %v7155_v34 }
 0x9a4   :  { %v6505_v62 = vadd.f32 %v3330_v33, %v3329_v9  ;;  %v3318_v25 = vadd.f32 %v4016_v29, %v3317_v19 }
 0x9a6   :  { %4019 = vtanh.f32 %v6505_v62  ;;  %v3322_v7 = vsel %vm3321_vm7, %v4016_v29, %v3318_v25 }
 0x9a7   :  { %v3327_v28 = vsel %vm3324_vm8, %v3326_v47, %v3322_v7 }
 0x9ac   :  { %v4020_v59 = vpop.eup %4019 }
 0x9ad   :  { %v3333_v60 = vmul.f32 %v4020_v59, %v3327_v28 }
 0x9af   :  { %3354 = vmatmul.f32.vlgmr.msra.gmra.mxu0 %v3333_v60  ;;  %3374 = vmatmul.f32.vlgmr.msrb.gmra.mxu1 %v3333_v60 }
 0x9b0   :  { %3394 = vmatmul.f32.vlgmr.msrb.gmra.mxu2 %v3333_v60  ;;  %3414 = vmatmul.f32.vlgmr.msrb.gmra.mxu3 %v3333_v60 }
 0xa2c   :  { %v3355_v36 = vpop.f32.mrf.mxu0  ;;  %v3375_v48 = vpop.f32.mrf.mxu1 }
 0xa2d   :  { %v3418_v14 = vadd.f32 %v3355_v36, %v2204_v8  ;;  %v3419_v0 = vadd.f32 %v3375_v48, %v2245_v30  ;;  %v3649_v30 = vld [vmem:[%s6590_s7 + $0x68] sm:$0xff]  ;;  %v3648_v36 = vld [vmem:[%s6590_s7 + $0x60] sm:$0xff]  ;;  %v3647_v48 = vld [vmem:[%s6590_s7 + $0x58] sm:$0xff] }
 0xa2f   :  { %v3777_v35 = vmul.f32 -1.442695, %v3418_v14  ;;  %v3778_v11 = vmul.f32 -1.442695, %v3419_v0  ;;  %v3646_v14 = vld [vmem:[%s6590_s7 + $0x50] sm:$0xff]  ;;  %v3645_v0 = vld [vmem:[%s6590_s7 + $0x48] sm:$0xff] }
 0xa31   :  { %4021 = vpow2.f32 %v3777_v35  ;;  %v3644_v35 = vld [vmem:[%s6590_s7 + $0x40] sm:$0xff] }
 0xa32   :  { %4023 = vpow2.f32 %v3778_v11  ;;  %v3643_v11 = vld [vmem:[%s6590_s7 + $0x38] sm:$0xff] }
 0xa33   :  { %v3415_v57 = vpop.f32.mrf.mxu3  ;;  %v3395_v27 = vpop.f32.mrf.mxu2 }
 0xa34   :  { %v3421_v18 = vadd.f32 %v3415_v57, %v2327_v5  ;;  %v3420_v56 = vadd.f32 %v3395_v27, %v2286_v55  ;;  %v2207_v5 = vadd.f32 %v7167_v10, %v7155_v34  ;;  %v7168_v57 = vld [vmem:[#allocation64_spill] sm:$0xff]  ;;  %v3641_v27 = vld [vmem:[%s6590_s7 + $0x28] sm:$0xff]  ;;  %v3640_v34 = vld [vmem:[%s6590_s7 + $0x20] sm:$0xff] }
 0xa35   :  { %v7169_v55 = vld [vmem:[#allocation68_spill] sm:$0xff] }
 0xa36   :  { %v3779_v26 = vmul.f32 -1.442695, %v3421_v18  ;;  %v2248_v18 = vadd.f32 %v7168_v57, %v7157_v41  ;;  %v3639_v41 = vld [vmem:[%s6590_s7 + $0x18] sm:$0xff] }
 0xa37   :  { %v4022_v23 = vpop.eup %4021 }
 0xa38   :  { %v4024_v50 = vpop.eup %4023  ;;  %v3425_v20 = vadd.f32 1.0, %v4022_v23  ;;  %4025 = vpow2.f32 %v3779_v26 }
 0xa39   :  { %v3444_v53 = vadd.f32 1.0, %v4024_v50  ;;  %v3642_v50 = vld [vmem:[%s6590_s7 + $0x30] sm:$0xff] }
 0xa3a   :  { %4027 = vrcp.f32 %v3425_v20  ;;  %v3437_v21 = vand.u32 2147483648, %v3425_v20  ;;  %v3435_v12 = vand.u32 2147483647, %v3425_v20  ;;  %vm3431_vm11 = vweird.f32 %v3425_v20 }
 0xa3b   :  { %4029 = vrcp.f32 %v3444_v53  ;;  %v3456_v13 = vand.u32 2147483648, %v3444_v53  ;;  %v3454_v29 = vand.u32 2147483647, %v3444_v53  ;;  %vm3450_vm12 = vweird.f32 %v3444_v53 }
 0xa3c   :  { %v3438_v63 = vor.u32 1.1754944e-38, %v3437_v21  ;;  %vm3436_vm15 = vcmp.eq.f32.partialorder %v3435_v12, 8.507059e+37 }
 0xa3d   :  { %v3457_v4 = vor.u32 1.1754944e-38, %v3456_v13  ;;  %vm3455_vm0 = vcmp.eq.f32.partialorder %v3454_v29, 8.507059e+37 }
 0xa3e   :  { %v4026_v24 = vpop.eup %4025 }
 0xa3f   :  { %v3464_v6 = vadd.f32 1.0, %v4026_v24 }
 0xa40   :  { %v4028_v37 = vpop.eup %4027 }
 0xa41   :  { %v4030_v51 = vpop.eup %4029  ;;  %v3427_v1 = vmul.f32 %v4028_v37, %v3425_v20  ;;  %4031 = vrcp.f32 %v3464_v6  ;;  %vm3432_vm9 = vweird.f32 %v4028_v37  ;;  %v3476_v7 = vand.u32 2147483648, %v3464_v6 }
 0xa42   :  { %v3446_v22 = vmul.f32 %v4030_v51, %v3444_v53  ;;  %4033 = vtanh.f32 %v3420_v56  ;;  %vm3451_vm10 = vweird.f32 %v4030_v51  ;;  %vm3433_vm13 = vmor %vm3431_vm11, %vm3432_vm9  ;;  %vm3470_vm2 = vweird.f32 %v3464_v6 }
 0xa43   :  { %v3428_v16 = vsub.f32 1.0, %v3427_v1  ;;  %vm3452_vm14 = vmor %vm3450_vm12, %vm3451_vm10  ;;  %v3474_v47 = vand.u32 2147483647, %v3464_v6  ;;  %v3477_v28 = vor.u32 1.1754944e-38, %v3476_v7  ;;  %v3637_v1 = vld [vmem:[%s6590_s7 + $0x8] sm:$0xff] }
 0xa44   :  { %v3447_v43 = vsub.f32 1.0, %v3446_v22 }
 0xa45   :  { %v3429_v3 = vmul.f32 %v4028_v37, %v3428_v16  ;;  %vm3475_vm4 = vcmp.eq.f32.partialorder %v3474_v47, 8.507059e+37  ;;  %v3636_v16 = vld [vmem:[%s6590_s7] sm:$0xff] }
 0xa46   :  { %v3448_v15 = vmul.f32 %v4030_v51, %v3447_v43 }
 0xa47   :  { %v4032_v46 = vpop.eup %4031  ;;  %v3430_v38 = vadd.f32 %v4028_v37, %v3429_v3 }
 0xa48   :  { %v3449_v61 = vadd.f32 %v4030_v51, %v3448_v15  ;;  %v3466_v52 = vmul.f32 %v4032_v46, %v3464_v6  ;;  %v4034_v45 = vpop.eup %4033  ;;  %vm3471_vm1 = vweird.f32 %v4032_v46  ;;  %v2330_v6 = vadd.f32 %v7169_v55, %v7159_v58  ;;  %v7170_v15 = vld [vmem:[#allocation70_spill] sm:$0xff] }
 0xa49   :  { %v3434_v32 = vsel %vm3433_vm13, %v4028_v37, %v3430_v38  ;;  %vm3472_vm3 = vmor %vm3470_vm2, %vm3471_vm1  ;;  %v3638_v37 = vld [vmem:[%s6590_s7 + $0x10] sm:$0xff]  ;;  %v2289_v29 = vadd.f32 %v7170_v15, %v7161_v54  ;;  %vm3676_vm1 = vcmask 25600  }
 0xa4a   :  { %v3439_v44 = vsel %vm3436_vm15, %v3438_v63, %v3434_v32  ;;  %v3453_v39 = vsel %vm3452_vm14, %v4030_v51, %v3449_v61  ;;  %v3467_v31 = vsub.f32 1.0, %v3466_v52 }
 0xa4b   :  { %v3458_v33 = vsel %vm3455_vm0, %v3457_v4, %v3453_v39  ;;  %v3481_v9 = vmul.f32 %v4034_v45, %v3439_v44 }
 0xa4c   :  { %v3480_v19 = vmul.f32 %v3458_v33, %v6505_v62  ;;  %v3468_v25 = vmul.f32 %v4032_v46, %v3467_v31  ;;  %v3651_v62 = vld [vmem:[%s6590_s7 + $0x78] sm:$0xff] }
 0xa4d   :  { %3656 = vmatpush.msra.mxu0 %v3651_v62 }
 0xa4e   :  { %v6517_v17 = vadd.f32 %v3481_v9, %v3480_v19  ;;  %v3469_v42 = vadd.f32 %v4032_v46, %v3468_v25 }
 0xa4f   :  { %3657 = vmatpush.msra.mxu0 %v3650_v2 }
 0xa50   :  { %4035 = vtanh.f32 %v6517_v17  ;;  %v3473_v59 = vsel %vm3472_vm3, %v4032_v46, %v3469_v42 }
 0xa51   :  { %v3478_v49 = vsel %vm3475_vm4, %v3477_v28, %v3473_v59  ;;  %3658 = vmatpush.msra.mxu0 %v3649_v30 }
 0xa53   :  { %3659 = vmatpush.msra.mxu0 %v3648_v36 }
 0xa55   :  { %3660 = vmatpush.msra.mxu0 %v3647_v48 }
 0xa56   :  { %v4036_v60 = vpop.eup %4035 }
 0xa57   :  { %v3484_v8 = vmul.f32 %v4036_v60, %v3478_v49  ;;  %3661 = vmatpush.msra.mxu0 %v3646_v14 }
 0xa59   :  { %3505 = vmatmul.f32.vlgmr.msrb.gmra.mxu0 %v3484_v8  ;;  %3525 = vmatmul.f32.vlgmr.msra.gmra.mxu1 %v3484_v8 }
 0xa5a   :  { %3545 = vmatmul.f32.vlgmr.msra.gmra.mxu2 %v3484_v8  ;;  %3565 = vmatmul.f32.vlgmr.msra.gmra.mxu3 %v3484_v8 }
 0xa5b   :  { %3662 = vmatpush.msra.mxu0 %v3645_v0 }
 0xa5d   :  { %3663 = vmatpush.msra.mxu0 %v3644_v35 }
 0xa5f   :  { %3664 = vmatpush.msra.mxu0 %v3643_v11 }
 0xa61   :  { %3665 = vmatpush.msra.mxu0 %v3642_v50 }
 0xa63   :  { %3666 = vmatpush.msra.mxu0 %v3641_v27 }
 0xa65   :  { %3667 = vmatpush.msra.mxu0 %v3640_v34 }
 0xa67   :  { %3668 = vmatpush.msra.mxu0 %v3639_v41 }
 0xa69   :  { %3669 = vmatpush.msra.mxu0 %v3638_v37 }
 0xa6b   :  { %3670 = vmatpush.msra.mxu0 %v3637_v1 }
 0xa6d   :  { %3671 = vmatpush.msra.mxu0 %v3636_v16 }
 0xad6   :  { %v3506_v26 = vpop.f32.mrf.mxu0  ;;  %v3526_v23 = vpop.f32.mrf.mxu1 }
 0xad7   :  { %v3569_v20 = vadd.f32 %v3506_v26, %v2207_v5  ;;  %v3570_v53 = vadd.f32 %v3526_v23, %v2248_v18 }
 0xad9   :  { %v3780_v24 = vmul.f32 -1.442695, %v3569_v20  ;;  %v3781_v40 = vmul.f32 -1.442695, %v3570_v53 }
 0xadb   :  { %4037 = vpow2.f32 %v3780_v24 }
 0xadc   :  { %4039 = vpow2.f32 %v3781_v40 }
 0xadd   :  { %v3566_v56 = vpop.f32.mrf.mxu3  ;;  %v3546_v3 = vpop.f32.mrf.mxu2 }
 0xade   :  { %v3572_v51 = vadd.f32 %v3566_v56, %v2330_v6  ;;  %v3571_v63 = vadd.f32 %v3546_v3, %v2289_v29 }
 0xae0   :  { %v3782_v22 = vmul.f32 -1.442695, %v3572_v51 }
 0xae1   :  { %v4038_v43 = vpop.eup %4037 }
 0xae2   :  { %v4040_v58 = vpop.eup %4039  ;;  %v3576_v21 = vadd.f32 1.0, %v4038_v43  ;;  %4041 = vpow2.f32 %v3782_v22 }
 0xae3   :  { %v3595_v13 = vadd.f32 1.0, %v4040_v58 }
 0xae4   :  { %4043 = vrcp.f32 %v3576_v21  ;;  %v3588_v44 = vand.u32 2147483648, %v3576_v21  ;;  %v3586_v33 = vand.u32 2147483647, %v3576_v21  ;;  %vm3582_vm7 = vweird.f32 %v3576_v21 }
 0xae5   :  { %4045 = vrcp.f32 %v3595_v13  ;;  %v3607_v39 = vand.u32 2147483648, %v3595_v13  ;;  %v3605_v19 = vand.u32 2147483647, %v3595_v13  ;;  %vm3601_vm8 = vweird.f32 %v3595_v13 }
 0xae6   :  { %v3589_v42 = vor.u32 1.1754944e-38, %v3588_v44  ;;  %vm3587_vm11 = vcmp.eq.f32.partialorder %v3586_v33, 8.507059e+37 }
 0xae7   :  { %v3608_v59 = vor.u32 1.1754944e-38, %v3607_v39  ;;  %vm3606_vm12 = vcmp.eq.f32.partialorder %v3605_v19, 8.507059e+37 }
 0xae8   :  { %v4042_v12 = vpop.eup %4041 }
 0xae9   :  { %v3615_v46 = vadd.f32 1.0, %v4042_v12 }
 0xaea   :  { %v4044_v38 = vpop.eup %4043 }
 0xaeb   :  { %v4046_v61 = vpop.eup %4045  ;;  %v3578_v52 = vmul.f32 %v4044_v38, %v3576_v21  ;;  %4047 = vrcp.f32 %v3615_v46  ;;  %vm3583_vm5 = vweird.f32 %v4044_v38  ;;  %v3627_v35 = vand.u32 2147483648, %v3615_v46 }
 0xaec   :  { %v3597_v4 = vmul.f32 %v4046_v61, %v3595_v13  ;;  %4049 = vtanh.f32 %v3571_v63  ;;  %vm3602_vm6 = vweird.f32 %v4046_v61  ;;  %vm3584_vm9 = vmor %vm3582_vm7, %vm3583_vm5  ;;  %vm3621_vm14 = vweird.f32 %v3615_v46 }
 0xaed   :  { %v3579_v32 = vsub.f32 1.0, %v3578_v52  ;;  %vm3603_vm10 = vmor %vm3601_vm8, %vm3602_vm6  ;;  %v3625_v11 = vand.u32 2147483647, %v3615_v46  ;;  %v3628_v5 = vor.u32 1.1754944e-38, %v3627_v35 }
 0xaee   :  { %v3598_v45 = vsub.f32 1.0, %v3597_v4 }
 0xaef   :  { %v3580_v31 = vmul.f32 %v4044_v38, %v3579_v32  ;;  %vm3626_vm0 = vcmp.eq.f32.partialorder %v3625_v11, 8.507059e+37 }
 0xaf0   :  { %v3599_v9 = vmul.f32 %v4046_v61, %v3598_v45 }
 0xaf1   :  { %v4048_v25 = vpop.eup %4047  ;;  %v3581_v54 = vadd.f32 %v4044_v38, %v3580_v31 }
 0xaf2   :  { %v3600_v7 = vadd.f32 %v4046_v61, %v3599_v9  ;;  %v3617_v47 = vmul.f32 %v4048_v25, %v3615_v46  ;;  %v4050_v60 = vpop.eup %4049  ;;  %vm3622_vm13 = vweird.f32 %v4048_v25 }
 0xaf3   :  { %v3585_v28 = vsel %vm3584_vm9, %v4044_v38, %v3581_v54  ;;  %vm3623_vm15 = vmor %vm3621_vm14, %vm3622_vm13 }
 0xaf4   :  { %v3590_v49 = vsel %vm3587_vm11, %v3589_v42, %v3585_v28  ;;  %v3604_v8 = vsel %vm3603_vm10, %v4046_v61, %v3600_v7  ;;  %v3618_v62 = vsub.f32 1.0, %v3617_v47 }
 0xaf5   :  { %v3609_v2 = vsel %vm3606_vm12, %v3608_v59, %v3604_v8  ;;  %v3632_v30 = vmul.f32 %v4050_v60, %v3590_v49 }
 0xaf6   :  { %v3631_v36 = vmul.f32 %v3609_v2, %v6517_v17  ;;  %v3619_v48 = vmul.f32 %v4048_v25, %v3618_v62  ;;  %v3796_v17 = vld [vmem:[%s6591_s8] ss:$0 sm:$0xff] }
 0xaf8   :  { %v3633_v14 = vadd.f32 %v3632_v30, %v3631_v36  ;;  %v3620_v0 = vadd.f32 %v4048_v25, %v3619_v48 }
 0xafa   :  { %4051 = vtanh.f32 %v3633_v14  ;;  %v3624_v10 = vsel %vm3623_vm15, %v4048_v25, %v3620_v0 }
 0xafb   :  { %v3629_v18 = vsel %vm3626_vm0, %v3628_v5, %v3624_v10 }
 0xb00   :  { %v4052_v57 = vpop.eup %4051 }
 0xb01   :  { %v3635_v26 = vmul.f32 %v4052_v57, %v3629_v18 }
 0xb03   :  { %3672 = vmatmul.f32.vlgmr.msra.gmra.mxu0 %v3635_v26 }
 0xb80   :  { %v3673_v23 = vpop.f32.mrf.mxu0 }
 0xb81   :  { %v3674_v50 = vadd.f32 %v3796_v17, %v3673_v23 }
 0xb83   :  { %3677 = vst.msk [vmem:[#allocation10] sm:$0x3] %vm3676_vm1, %v3674_v50 }
 0xb84   :  { %3688 = dma.vmem_to_hbm [thread:$0]  %s3684_s16, 32, %s3686_s19, [#allocation6]  }
 0xb85   :  { %4217 = dma.done.wait [#allocation6], 32  }
 0xb86   :  { %4218 = vsyncadd [#allocation6], 4294967264 }
 0xb87   :  { %3693 = vsyncpa [#allocation5], 1 }
 0xb88   :  { %3694 = vsyncpa [#allocation8], 1 }
 0xb89   :  { %3695 = vsyncpa [#allocation6], 1 }

</bundles_post_ra>
